<compile_context>
chip_gen: v5e
topology: v5e:2x2
jax: 0.10.0
libtpu: 0.0.40
codegen_flags: <defaults>
</compile_context>

<pallas_src>
import jax
import jax.numpy as jnp
from jax.experimental import pallas as pl
from jax.experimental.pallas import tpu as pltpu


def _round_up(n, m=128):
    return ((n + m - 1) // m) * m


# ----------------------------------------------------------------------------
# Fused whole-network kernel (one image per grid step)
# ----------------------------------------------------------------------------

def _make_fused_kernel(conv_shapes, n_dense):
    """conv_shapes: list of (H, W, Cin, Cout) per conv layer.
    n_dense: number of (weight, shift) dense pairs (fc layers + head)."""
    n_conv = len(conv_shapes)

    def kernel(*refs):
        # refs = (x, [conv_w, conv_shift]*n_conv, [dense_w, dense_shift]*n_dense,
        #         out, [xp, col, y3]*n_conv, flat)
        x_ref = refs[0]
        pos = 1
        conv_ws = []
        for _ in range(n_conv):
            conv_ws.append((refs[pos], refs[pos + 1]))
            pos += 2
        dense_ws = []
        for _ in range(n_dense):
            dense_ws.append((refs[pos], refs[pos + 1]))
            pos += 2
        o_ref = refs[pos]
        scr = refs[pos + 1:]
        flat_scr = scr[3 * n_conv]

        # ---- conv / folded-BN / ReLU / MaxPool stack (activations stay in VMEM)
        act = x_ref[0]                                        # (H0, W0, 1) f32
        for li, (H, W, Cin, Cout) in enumerate(conv_shapes):
            xp, col, y3 = scr[3 * li], scr[3 * li + 1], scr[3 * li + 2]
            w_ref, s_ref = conv_ws[li]
            H2, W2 = H // 2, W // 2

            # zero padding handled in VMEM (no HBM jnp.pad round trip)
            xp[...] = jnp.zeros_like(xp)
            xp[1:H + 1, 1:W + 1, :] = act

            # im2col: 9 taps written side-by-side -> one K=9*Cin MXU matmul
            for k in range(9):
                dh, dw = k // 3, k % 3
                col[:, k * Cin:(k + 1) * Cin] = (
                    xp[dh:dh + H, dw:dw + W, :].reshape(H * W, Cin))

            y = jnp.dot(col[...], w_ref[...],
                        preferred_element_type=jnp.float32)   # (H*W, Cout)
            y = jnp.maximum(y + s_ref[...], 0.0)               # folded BN + ReLU
            y3[...] = y.reshape(H, W, Cout)

            # MaxPool2d(2): stride-2 sublane reads (W) + major-dim pair max (H)
            wmax = jnp.maximum(y3[:, pl.ds(0, W2, 2), :],
                               y3[:, pl.ds(1, W2, 2), :])      # (H, W2, Cout)
            act = jnp.max(wmax.reshape(H2, 2, W2, Cout), axis=1)  # (H2, W2, Cout)
            # Dropout: identity in eval mode.

        # ---- flatten into a lane-dense 128-padded row (HWC order; the CHW
        #      permutation of PyTorch's x.view(N, -1) is folded into the first
        #      dense weight at init time)
        fs_h, fs_w, C = act.shape
        flat_scr[...] = jnp.zeros_like(flat_scr)
        for hh in range(fs_h):
            for ww in range(fs_w):
                p = hh * fs_w + ww
                flat_scr[:, p * C:(p + 1) * C] = act[hh:hh + 1, ww, :]

        # ---- fused FC stack + head: bf16 MXU operands, f32 accumulation,
        #      all feature dims padded to multiples of 128 (lane-dense)
        h = flat_scr[...]                                      # (1, F_p) f32
        for i, (w_ref, s_ref) in enumerate(dense_ws):
            z = jnp.dot(h.astype(jnp.bfloat16), w_ref[...],
                        preferred_element_type=jnp.float32) + s_ref[...]
            h = jnp.maximum(z, 0.0) if i < n_dense - 1 else z
        o_ref[0] = h                                           # (1, out_p) store

    return kernel


def _fused_forward_call(x_nhwc, params):
    N, H0, W0, _ = x_nhwc.shape
    conv_shapes = params['conv_shapes']
    assert (H0, W0) == conv_shapes[0][:2], "input spatial size mismatch"
    conv_ws = params['conv']
    dense_ws = list(params['fc']) + [params['head']]
    n_dense = len(dense_ws)
    out_p = dense_ws[-1][0].shape[1]
    f_p = dense_ws[0][0].shape[0]

    kernel = _make_fused_kernel(conv_shapes, n_dense)

    in_specs = [pl.BlockSpec((1, H0, W0, 1), lambda n: (n, 0, 0, 0))]
    args = [x_nhwc]
    flops = 0
    bytes_acc = x_nhwc.size * x_nhwc.dtype.itemsize
    for (w, s), (H, W, Cin, Cout) in zip(conv_ws, conv_shapes):
        in_specs += [pl.BlockSpec(w.shape, lambda n: (0, 0)),
                     pl.BlockSpec(s.shape, lambda n: (0, 0))]
        args += [w, s]
        flops += 2 * N * H * W * 9 * Cin * Cout
        bytes_acc += w.size * w.dtype.itemsize + s.size * 4
    for (w, s) in dense_ws:
        in_specs += [pl.BlockSpec(w.shape, lambda n: (0, 0)),
                     pl.BlockSpec(s.shape, lambda n: (0, 0))]
        args += [w, s]
        flops += 2 * N * w.shape[0] * w.shape[1]
        bytes_acc += w.size * w.dtype.itemsize + s.size * 4
    bytes_acc += N * out_p * 4

    scratch = []
    for (H, W, Cin, Cout) in conv_shapes:
        scratch += [pltpu.VMEM((H + 2, W + 2, Cin), jnp.float32),   # padded act
                    pltpu.VMEM((H * W, 9 * Cin), jnp.float32),      # im2col
                    pltpu.VMEM((H, W, Cout), jnp.float32)]          # pre-pool act
    scratch += [pltpu.VMEM((1, f_p), jnp.float32)]                  # flat features

    out = pl.pallas_call(
        kernel,
        out_shape=jax.ShapeDtypeStruct((N, 1, out_p), jnp.float32),
        grid=(N,),
        in_specs=in_specs,
        out_specs=pl.BlockSpec((1, 1, out_p), lambda n: (n, 0, 0)),
        scratch_shapes=scratch,
        compiler_params=pltpu.CompilerParams(
            dimension_semantics=("parallel",),
            vmem_limit_bytes=32 * 1024 * 1024),
        cost_estimate=pl.CostEstimate(flops=flops, transcendentals=0,
                                      bytes_accessed=bytes_acc),
    )(*args)
    return out[:, 0, :]


# ----------------------------------------------------------------------------
# Parameter init (mirrors _initialize_weights statistics; BN folded in;
# PyTorch NCHW-flatten permutation folded into the first dense weight)
# ----------------------------------------------------------------------------

def init_params(key, *, task_type, num_classes, num_conv_layers, conv_channels,
                fc_layers, input_size):
    eps = 1e-5
    conv_params, conv_shapes = [], []
    in_ch = 1
    H = W = input_size
    for _ in range(num_conv_layers):
        assert H % 2 == 0 and W % 2 == 0, (
            "TODO(synk): odd spatial dims under MaxPool2d(2) not supported")
        key, k1 = jax.random.split(key)
        fan_out = conv_channels * 9                       # kaiming_normal fan_out
        std = (2.0 / fan_out) ** 0.5
        # im2col layout: row = (dh*3+dw)*Cin + ci  (real torch weights would be
        # W_pt(Cout,Cin,3,3).transpose(2,3,1,0).reshape(9*Cin, Cout))
        w = jax.random.normal(k1, (9 * in_ch, conv_channels), jnp.float32) * std
        b = jnp.zeros((conv_channels,), jnp.float32)
        # BatchNorm2d eval stats: gamma=1, beta=0, mean=0, var=1 -> fold
        scale = jnp.ones((conv_channels,)) / jnp.sqrt(jnp.ones((conv_channels,)) + eps)
        shift = jnp.zeros((conv_channels,))
        conv_params.append((w * scale[None, :],
                            (b * scale + shift)[None, :].astype(jnp.float32)))
        conv_shapes.append((H, W, in_ch, conv_channels))
        in_ch = conv_channels
        H, W = H // 2, W // 2

    fs = max(1, input_size // (2 ** num_conv_layers))
    assert fs == H == W, "flatten-size formula disagrees with pooled dims"
    prev = conv_channels * fs * fs
    prev_p = _round_up(prev)
    need_chw_perm = True                       # first dense sees HWC flatten

    fc_params = []
    for fc in fc_layers:
        key, k1 = jax.random.split(key)
        std = (2.0 / (prev + fc)) ** 0.5                  # xavier_normal
        w = jax.random.normal(k1, (prev, fc), jnp.float32) * std
        if need_chw_perm:                       # fold CHW->HWC row permutation
            w = (w.reshape(conv_channels, fs, fs, fc)
                   .transpose(1, 2, 0, 3).reshape(prev, fc))
            need_chw_perm = False
        b = jnp.zeros((fc,), jnp.float32)
        scale = jnp.ones((fc,)) / jnp.sqrt(jnp.ones((fc,)) + eps)   # BN1d fold
        shift = jnp.zeros((fc,))
        fc_p = _round_up(fc)
        w_pad = jnp.zeros((prev_p, fc_p), jnp.float32).at[:prev, :fc].set(
            w * scale[None, :])
        s_pad = jnp.zeros((1, fc_p), jnp.float32).at[0, :fc].set(b * scale + shift)
        fc_params.append((w_pad.astype(jnp.bfloat16), s_pad))
        prev, prev_p = fc, fc_p

    out_dim = num_classes if task_type == 'classification' else 1
    out_p = _round_up(out_dim)
    key, k1 = jax.random.split(key)
    std = (2.0 / (prev + out_dim)) ** 0.5
    w = jax.random.normal(k1, (prev, out_dim), jnp.float32) * std
    if need_chw_perm:
        w = (w.reshape(conv_channels, fs, fs, out_dim)
               .transpose(1, 2, 0, 3).reshape(prev, out_dim))
    w_pad = jnp.zeros((prev_p, out_p), jnp.float32).at[:prev, :out_dim].set(w)
    b_pad = jnp.zeros((1, out_p), jnp.float32)
    return dict(conv=conv_params, fc=fc_params,
                head=(w_pad.astype(jnp.bfloat16), b_pad),
                conv_shapes=conv_shapes, out_dim=out_dim)


# ----------------------------------------------------------------------------
# Forward wrapper
# ----------------------------------------------------------------------------

def medical_cnn_forward(x, params):
    if x.ndim == 3:                                   # mirrors x.unsqueeze(1)
        x = x[:, None, :, :]
    x = jnp.transpose(x, (0, 2, 3, 1)).astype(jnp.float32)   # NCHW -> NHWC
    out = _fused_forward_call(x, params)
    return out[:, :params['out_dim']]                 # strip lane padding


# ----------------------------------------------------------------------------

if __name__ == "__main__":
    key = jax.random.PRNGKey(0)
    kx, kp = jax.random.split(key)

    # Small configuration consistent with the module (shrunk hyperparameters):
    cfg = dict(task_type='classification', num_classes=2, num_conv_layers=2,
               conv_channels=8, fc_layers=[32, 16], input_size=16)
    N = 2
    # Grayscale NCHW input, like PyTorch (batch=2, 1 channel, 16x16).
    x = jax.random.normal(kx, (N, 1, cfg['input_size'], cfg['input_size']),
                          jnp.float32)

    params = init_params(kp, **cfg)
    out = medical_cnn_forward(x, params)
    out = jax.block_until_ready(out)
    assert out.shape == (N, cfg['num_classes']), out.shape
    assert bool(jnp.all(jnp.isfinite(out)))
    print("KERNEL_OK")
</pallas_src>

<mosaic_0001>
module attributes {stable_mosaic.version = 11 : i64} {
  func.func @kernel(%arg0: i32, %arg1: memref<1x16x16x1xf32, #tpu.memory_space<vmem>>, %arg2: memref<9x8xf32, #tpu.memory_space<vmem>>, %arg3: memref<1x8xf32, #tpu.memory_space<vmem>>, %arg4: memref<72x8xf32, #tpu.memory_space<vmem>>, %arg5: memref<1x8xf32, #tpu.memory_space<vmem>>, %arg6: memref<128x128xbf16, #tpu.memory_space<vmem>>, %arg7: memref<1x128xf32, #tpu.memory_space<vmem>>, %arg8: memref<128x128xbf16, #tpu.memory_space<vmem>>, %arg9: memref<1x128xf32, #tpu.memory_space<vmem>>, %arg10: memref<128x128xbf16, #tpu.memory_space<vmem>>, %arg11: memref<1x128xf32, #tpu.memory_space<vmem>>, %arg12: memref<1x1x128xf32, #tpu.memory_space<vmem>>, %arg13: memref<18x18x1xf32, #tpu.memory_space<vmem>>, %arg14: memref<256x9xf32, #tpu.memory_space<vmem>>, %arg15: memref<16x16x8xf32, #tpu.memory_space<vmem>>, %arg16: memref<10x10x8xf32, #tpu.memory_space<vmem>>, %arg17: memref<64x72xf32, #tpu.memory_space<vmem>>, %arg18: memref<8x8x8xf32, #tpu.memory_space<vmem>>, %arg19: memref<1x128xf32, #tpu.memory_space<vmem>>) attributes {dimension_semantics = [#tpu.dimension_semantics<parallel>], iteration_bounds = array<i64: 2>, scalar_prefetch = 0 : i64, scratch_operands = 7 : i64, tpu.core_type = #tpu.core_type<tc>, window_params = [{transform_indices = @transform_0, window_bounds = array<i64: 1, 16, 16, 1>}, {pipeline_mode = #tpu.pipeline_mode<synchronous>, transform_indices = @transform_1, window_bounds = array<i64: 9, 8>}, {pipeline_mode = #tpu.pipeline_mode<synchronous>, transform_indices = @transform_2, window_bounds = array<i64: 1, 8>}, {pipeline_mode = #tpu.pipeline_mode<synchronous>, transform_indices = @transform_3, window_bounds = array<i64: 72, 8>}, {pipeline_mode = #tpu.pipeline_mode<synchronous>, transform_indices = @transform_4, window_bounds = array<i64: 1, 8>}, {pipeline_mode = #tpu.pipeline_mode<synchronous>, transform_indices = @transform_5, window_bounds = array<i64: 128, 128>}, {pipeline_mode = #tpu.pipeline_mode<synchronous>, transform_indices = @transform_6, window_bounds = array<i64: 1, 128>}, {pipeline_mode = #tpu.pipeline_mode<synchronous>, transform_indices = @transform_7, window_bounds = array<i64: 128, 128>}, {pipeline_mode = #tpu.pipeline_mode<synchronous>, transform_indices = @transform_8, window_bounds = array<i64: 1, 128>}, {pipeline_mode = #tpu.pipeline_mode<synchronous>, transform_indices = @transform_9, window_bounds = array<i64: 128, 128>}, {pipeline_mode = #tpu.pipeline_mode<synchronous>, transform_indices = @transform_10, window_bounds = array<i64: 1, 128>}, {transform_indices = @transform_11, window_bounds = array<i64: 1, 1, 128>}]} {
    %c0 = arith.constant 0 : index
    %c0_0 = arith.constant 0 : index
    %c0_1 = arith.constant 0 : index
    %c0_2 = arith.constant 0 : index
    %0 = vector.load %arg1[%c0, %c0_0, %c0_1, %c0_2] : memref<1x16x16x1xf32, #tpu.memory_space<vmem>>, vector<1x16x16x1xf32>
    %1 = vector.shape_cast %0 : vector<1x16x16x1xf32> to vector<16x16x1xf32>
    %cst = arith.constant 0.000000e+00 : f32
    %2 = vector.broadcast %cst : f32 to vector<18x18x1xf32>
    %c0_3 = arith.constant 0 : index
    %c0_4 = arith.constant 0 : index
    %c0_5 = arith.constant 0 : index
    %3 = vector.load %arg13[%c0_3, %c0_4, %c0_5] : memref<18x18x1xf32, #tpu.memory_space<vmem>>, vector<18x18x1xf32>
    tpu.vector_store %arg13[%c0_3, %c0_4, %c0_5], %2 {strides = array<i32>} : memref<18x18x1xf32, #tpu.memory_space<vmem>>, vector<18x18x1xf32>,
    %c1 = arith.constant 1 : index
    %c1_6 = arith.constant 1 : index
    %c0_7 = arith.constant 0 : index
    %4 = vector.load %arg13[%c1, %c1_6, %c0_7] : memref<18x18x1xf32, #tpu.memory_space<vmem>>, vector<16x16x1xf32>
    tpu.vector_store %arg13[%c1, %c1_6, %c0_7], %1 {strides = array<i32>} : memref<18x18x1xf32, #tpu.memory_space<vmem>>, vector<16x16x1xf32>,
    %c0_8 = arith.constant 0 : index
    %c0_9 = arith.constant 0 : index
    %c0_10 = arith.constant 0 : index
    %5 = vector.load %arg13[%c0_8, %c0_9, %c0_10] : memref<18x18x1xf32, #tpu.memory_space<vmem>>, vector<16x16x1xf32>
    %6 = vector.shape_cast %5 : vector<16x16x1xf32> to vector<256x1xf32>
    %c0_11 = arith.constant 0 : index
    %c0_12 = arith.constant 0 : index
    %7 = vector.load %arg14[%c0_11, %c0_12] : memref<256x9xf32, #tpu.memory_space<vmem>>, vector<256x1xf32>
    tpu.vector_store %arg14[%c0_11, %c0_12], %6 {strides = array<i32>} : memref<256x9xf32, #tpu.memory_space<vmem>>, vector<256x1xf32>,
    %c0_13 = arith.constant 0 : index
    %c1_14 = arith.constant 1 : index
    %c0_15 = arith.constant 0 : index
    %8 = vector.load %arg13[%c0_13, %c1_14, %c0_15] : memref<18x18x1xf32, #tpu.memory_space<vmem>>, vector<16x16x1xf32>
    %9 = vector.shape_cast %8 : vector<16x16x1xf32> to vector<256x1xf32>
    %c0_16 = arith.constant 0 : index
    %c1_17 = arith.constant 1 : index
    %10 = vector.load %arg14[%c0_16, %c1_17] : memref<256x9xf32, #tpu.memory_space<vmem>>, vector<256x1xf32>
    tpu.vector_store %arg14[%c0_16, %c1_17], %9 {strides = array<i32>} : memref<256x9xf32, #tpu.memory_space<vmem>>, vector<256x1xf32>,
    %c0_18 = arith.constant 0 : index
    %c2 = arith.constant 2 : index
    %c0_19 = arith.constant 0 : index
    %11 = vector.load %arg13[%c0_18, %c2, %c0_19] : memref<18x18x1xf32, #tpu.memory_space<vmem>>, vector<16x16x1xf32>
    %12 = vector.shape_cast %11 : vector<16x16x1xf32> to vector<256x1xf32>
    %c0_20 = arith.constant 0 : index
    %c2_21 = arith.constant 2 : index
    %13 = vector.load %arg14[%c0_20, %c2_21] : memref<256x9xf32, #tpu.memory_space<vmem>>, vector<256x1xf32>
    tpu.vector_store %arg14[%c0_20, %c2_21], %12 {strides = array<i32>} : memref<256x9xf32, #tpu.memory_space<vmem>>, vector<256x1xf32>,
    %c1_22 = arith.constant 1 : index
    %c0_23 = arith.constant 0 : index
    %c0_24 = arith.constant 0 : index
    %14 = vector.load %arg13[%c1_22, %c0_23, %c0_24] : memref<18x18x1xf32, #tpu.memory_space<vmem>>, vector<16x16x1xf32>
    %15 = vector.shape_cast %14 : vector<16x16x1xf32> to vector<256x1xf32>
    %c0_25 = arith.constant 0 : index
    %c3 = arith.constant 3 : index
    %16 = vector.load %arg14[%c0_25, %c3] : memref<256x9xf32, #tpu.memory_space<vmem>>, vector<256x1xf32>
    tpu.vector_store %arg14[%c0_25, %c3], %15 {strides = array<i32>} : memref<256x9xf32, #tpu.memory_space<vmem>>, vector<256x1xf32>,
    %c1_26 = arith.constant 1 : index
    %c1_27 = arith.constant 1 : index
    %c0_28 = arith.constant 0 : index
    %17 = vector.load %arg13[%c1_26, %c1_27, %c0_28] : memref<18x18x1xf32, #tpu.memory_space<vmem>>, vector<16x16x1xf32>
    %18 = vector.shape_cast %17 : vector<16x16x1xf32> to vector<256x1xf32>
    %c0_29 = arith.constant 0 : index
    %c4 = arith.constant 4 : index
    %19 = vector.load %arg14[%c0_29, %c4] : memref<256x9xf32, #tpu.memory_space<vmem>>, vector<256x1xf32>
    tpu.vector_store %arg14[%c0_29, %c4], %18 {strides = array<i32>} : memref<256x9xf32, #tpu.memory_space<vmem>>, vector<256x1xf32>,
    %c1_30 = arith.constant 1 : index
    %c2_31 = arith.constant 2 : index
    %c0_32 = arith.constant 0 : index
    %20 = vector.load %arg13[%c1_30, %c2_31, %c0_32] : memref<18x18x1xf32, #tpu.memory_space<vmem>>, vector<16x16x1xf32>
    %21 = vector.shape_cast %20 : vector<16x16x1xf32> to vector<256x1xf32>
    %c0_33 = arith.constant 0 : index
    %c5 = arith.constant 5 : index
    %22 = vector.load %arg14[%c0_33, %c5] : memref<256x9xf32, #tpu.memory_space<vmem>>, vector<256x1xf32>
    tpu.vector_store %arg14[%c0_33, %c5], %21 {strides = array<i32>} : memref<256x9xf32, #tpu.memory_space<vmem>>, vector<256x1xf32>,
    %c2_34 = arith.constant 2 : index
    %c0_35 = arith.constant 0 : index
    %c0_36 = arith.constant 0 : index
    %23 = vector.load %arg13[%c2_34, %c0_35, %c0_36] : memref<18x18x1xf32, #tpu.memory_space<vmem>>, vector<16x16x1xf32>
    %24 = vector.shape_cast %23 : vector<16x16x1xf32> to vector<256x1xf32>
    %c0_37 = arith.constant 0 : index
    %c6 = arith.constant 6 : index
    %25 = vector.load %arg14[%c0_37, %c6] : memref<256x9xf32, #tpu.memory_space<vmem>>, vector<256x1xf32>
    tpu.vector_store %arg14[%c0_37, %c6], %24 {strides = array<i32>} : memref<256x9xf32, #tpu.memory_space<vmem>>, vector<256x1xf32>,
    %c2_38 = arith.constant 2 : index
    %c1_39 = arith.constant 1 : index
    %c0_40 = arith.constant 0 : index
    %26 = vector.load %arg13[%c2_38, %c1_39, %c0_40] : memref<18x18x1xf32, #tpu.memory_space<vmem>>, vector<16x16x1xf32>
    %27 = vector.shape_cast %26 : vector<16x16x1xf32> to vector<256x1xf32>
    %c0_41 = arith.constant 0 : index
    %c7 = arith.constant 7 : index
    %28 = vector.load %arg14[%c0_41, %c7] : memref<256x9xf32, #tpu.memory_space<vmem>>, vector<256x1xf32>
    tpu.vector_store %arg14[%c0_41, %c7], %27 {strides = array<i32>} : memref<256x9xf32, #tpu.memory_space<vmem>>, vector<256x1xf32>,
    %c2_42 = arith.constant 2 : index
    %c2_43 = arith.constant 2 : index
    %c0_44 = arith.constant 0 : index
    %29 = vector.load %arg13[%c2_42, %c2_43, %c0_44] : memref<18x18x1xf32, #tpu.memory_space<vmem>>, vector<16x16x1xf32>
    %30 = vector.shape_cast %29 : vector<16x16x1xf32> to vector<256x1xf32>
    %c0_45 = arith.constant 0 : index
    %c8 = arith.constant 8 : index
    %31 = vector.load %arg14[%c0_45, %c8] : memref<256x9xf32, #tpu.memory_space<vmem>>, vector<256x1xf32>
    tpu.vector_store %arg14[%c0_45, %c8], %30 {strides = array<i32>} : memref<256x9xf32, #tpu.memory_space<vmem>>, vector<256x1xf32>,
    %c0_46 = arith.constant 0 : index
    %c0_47 = arith.constant 0 : index
    %32 = vector.load %arg14[%c0_46, %c0_47] : memref<256x9xf32, #tpu.memory_space<vmem>>, vector<256x9xf32>
    %c0_48 = arith.constant 0 : index
    %c0_49 = arith.constant 0 : index
    %33 = vector.load %arg2[%c0_48, %c0_49] : memref<9x8xf32, #tpu.memory_space<vmem>>, vector<9x8xf32>
    %cst_50 = arith.constant dense<0.000000e+00> : vector<256x8xf32>
    %34 = tpu.matmul %32, %33, %cst_50 {dimension_numbers = #tpu.dot_dimension_numbers<[1], [0], [0], [1], [0, 0, 1, 1], [], []>} : vector<256x9xf32>, vector<9x8xf32>, vector<256x8xf32> -> vector<256x8xf32>
    %c0_51 = arith.constant 0 : index
    %c0_52 = arith.constant 0 : index
    %35 = vector.load %arg3[%c0_51, %c0_52] : memref<1x8xf32, #tpu.memory_space<vmem>>, vector<1x8xf32>
    %36 = vector.broadcast %35 : vector<1x8xf32> to vector<256x8xf32>
    %37 = arith.addf %34, %36 : vector<256x8xf32>
    %cst_53 = arith.constant 0.000000e+00 : f32
    %38 = vector.broadcast %cst_53 : f32 to vector<256x8xf32>
    %39 = arith.maximumf %37, %38 : vector<256x8xf32>
    %40 = vector.shape_cast %39 : vector<256x8xf32> to vector<16x16x8xf32>
    %c0_54 = arith.constant 0 : index
    %c0_55 = arith.constant 0 : index
    %c0_56 = arith.constant 0 : index
    %41 = vector.load %arg15[%c0_54, %c0_55, %c0_56] : memref<16x16x8xf32, #tpu.memory_space<vmem>>, vector<16x16x8xf32>
    tpu.vector_store %arg15[%c0_54, %c0_55, %c0_56], %40 {strides = array<i32>} : memref<16x16x8xf32, #tpu.memory_space<vmem>>, vector<16x16x8xf32>,
    %c0_57 = arith.constant 0 : index
    %c0_58 = arith.constant 0 : index
    %c0_59 = arith.constant 0 : index
    %42 = tpu.strided_load %arg15[%c0_57, %c0_58, %c0_59] {strides = array<i32: 1, 2, 1>} : memref<16x16x8xf32, #tpu.memory_space<vmem>>, vector<16x8x8xf32>
    %c0_60 = arith.constant 0 : index
    %c1_61 = arith.constant 1 : index
    %c0_62 = arith.constant 0 : index
    %43 = tpu.strided_load %arg15[%c0_60, %c1_61, %c0_62] {strides = array<i32: 1, 2, 1>} : memref<16x16x8xf32, #tpu.memory_space<vmem>>, vector<16x8x8xf32>
    %44 = arith.maximumf %42, %43 : vector<16x8x8xf32>
    %45 = vector.shape_cast %44 : vector<16x8x8xf32> to vector<8x2x8x8xf32>
    %cst_63 = arith.constant dense<0xFF800000> : vector<8x8x8xf32>
    %46 = vector.multi_reduction <maximumf>, %45, %cst_63 [1] : vector<8x2x8x8xf32> to vector<8x8x8xf32>
    %cst_64 = arith.constant 0.000000e+00 : f32
    %47 = vector.broadcast %cst_64 : f32 to vector<10x10x8xf32>
    %c0_65 = arith.constant 0 : index
    %c0_66 = arith.constant 0 : index
    %c0_67 = arith.constant 0 : index
    %48 = vector.load %arg16[%c0_65, %c0_66, %c0_67] : memref<10x10x8xf32, #tpu.memory_space<vmem>>, vector<10x10x8xf32>
    tpu.vector_store %arg16[%c0_65, %c0_66, %c0_67], %47 {strides = array<i32>} : memref<10x10x8xf32, #tpu.memory_space<vmem>>, vector<10x10x8xf32>,
    %c1_68 = arith.constant 1 : index
    %c1_69 = arith.constant 1 : index
    %c0_70 = arith.constant 0 : index
    %49 = vector.load %arg16[%c1_68, %c1_69, %c0_70] : memref<10x10x8xf32, #tpu.memory_space<vmem>>, vector<8x8x8xf32>
    tpu.vector_store %arg16[%c1_68, %c1_69, %c0_70], %46 {strides = array<i32>} : memref<10x10x8xf32, #tpu.memory_space<vmem>>, vector<8x8x8xf32>,
    %c0_71 = arith.constant 0 : index
    %c0_72 = arith.constant 0 : index
    %c0_73 = arith.constant 0 : index
    %50 = vector.load %arg16[%c0_71, %c0_72, %c0_73] : memref<10x10x8xf32, #tpu.memory_space<vmem>>, vector<8x8x8xf32>
    %51 = vector.shape_cast %50 : vector<8x8x8xf32> to vector<64x8xf32>
    %c0_74 = arith.constant 0 : index
    %c0_75 = arith.constant 0 : index
    %52 = vector.load %arg17[%c0_74, %c0_75] : memref<64x72xf32, #tpu.memory_space<vmem>>, vector<64x8xf32>
    tpu.vector_store %arg17[%c0_74, %c0_75], %51 {strides = array<i32>} : memref<64x72xf32, #tpu.memory_space<vmem>>, vector<64x8xf32>,
    %c0_76 = arith.constant 0 : index
    %c1_77 = arith.constant 1 : index
    %c0_78 = arith.constant 0 : index
    %53 = vector.load %arg16[%c0_76, %c1_77, %c0_78] : memref<10x10x8xf32, #tpu.memory_space<vmem>>, vector<8x8x8xf32>
    %54 = vector.shape_cast %53 : vector<8x8x8xf32> to vector<64x8xf32>
    %c0_79 = arith.constant 0 : index
    %c8_80 = arith.constant 8 : index
    %55 = vector.load %arg17[%c0_79, %c8_80] : memref<64x72xf32, #tpu.memory_space<vmem>>, vector<64x8xf32>
    tpu.vector_store %arg17[%c0_79, %c8_80], %54 {strides = array<i32>} : memref<64x72xf32, #tpu.memory_space<vmem>>, vector<64x8xf32>,
    %c0_81 = arith.constant 0 : index
    %c2_82 = arith.constant 2 : index
    %c0_83 = arith.constant 0 : index
    %56 = vector.load %arg16[%c0_81, %c2_82, %c0_83] : memref<10x10x8xf32, #tpu.memory_space<vmem>>, vector<8x8x8xf32>
    %57 = vector.shape_cast %56 : vector<8x8x8xf32> to vector<64x8xf32>
    %c0_84 = arith.constant 0 : index
    %c16 = arith.constant 16 : index
    %58 = vector.load %arg17[%c0_84, %c16] : memref<64x72xf32, #tpu.memory_space<vmem>>, vector<64x8xf32>
    tpu.vector_store %arg17[%c0_84, %c16], %57 {strides = array<i32>} : memref<64x72xf32, #tpu.memory_space<vmem>>, vector<64x8xf32>,
    %c1_85 = arith.constant 1 : index
    %c0_86 = arith.constant 0 : index
    %c0_87 = arith.constant 0 : index
    %59 = vector.load %arg16[%c1_85, %c0_86, %c0_87] : memref<10x10x8xf32, #tpu.memory_space<vmem>>, vector<8x8x8xf32>
    %60 = vector.shape_cast %59 : vector<8x8x8xf32> to vector<64x8xf32>
    %c0_88 = arith.constant 0 : index
    %c24 = arith.constant 24 : index
    %61 = vector.load %arg17[%c0_88, %c24] : memref<64x72xf32, #tpu.memory_space<vmem>>, vector<64x8xf32>
    tpu.vector_store %arg17[%c0_88, %c24], %60 {strides = array<i32>} : memref<64x72xf32, #tpu.memory_space<vmem>>, vector<64x8xf32>,
    %c1_89 = arith.constant 1 : index
    %c1_90 = arith.constant 1 : index
    %c0_91 = arith.constant 0 : index
    %62 = vector.load %arg16[%c1_89, %c1_90, %c0_91] : memref<10x10x8xf32, #tpu.memory_space<vmem>>, vector<8x8x8xf32>
    %63 = vector.shape_cast %62 : vector<8x8x8xf32> to vector<64x8xf32>
    %c0_92 = arith.constant 0 : index
    %c32 = arith.constant 32 : index
    %64 = vector.load %arg17[%c0_92, %c32] : memref<64x72xf32, #tpu.memory_space<vmem>>, vector<64x8xf32>
    tpu.vector_store %arg17[%c0_92, %c32], %63 {strides = array<i32>} : memref<64x72xf32, #tpu.memory_space<vmem>>, vector<64x8xf32>,
    %c1_93 = arith.constant 1 : index
    %c2_94 = arith.constant 2 : index
    %c0_95 = arith.constant 0 : index
    %65 = vector.load %arg16[%c1_93, %c2_94, %c0_95] : memref<10x10x8xf32, #tpu.memory_space<vmem>>, vector<8x8x8xf32>
    %66 = vector.shape_cast %65 : vector<8x8x8xf32> to vector<64x8xf32>
    %c0_96 = arith.constant 0 : index
    %c40 = arith.constant 40 : index
    %67 = vector.load %arg17[%c0_96, %c40] : memref<64x72xf32, #tpu.memory_space<vmem>>, vector<64x8xf32>
    tpu.vector_store %arg17[%c0_96, %c40], %66 {strides = array<i32>} : memref<64x72xf32, #tpu.memory_space<vmem>>, vector<64x8xf32>,
    %c2_97 = arith.constant 2 : index
    %c0_98 = arith.constant 0 : index
    %c0_99 = arith.constant 0 : index
    %68 = vector.load %arg16[%c2_97, %c0_98, %c0_99] : memref<10x10x8xf32, #tpu.memory_space<vmem>>, vector<8x8x8xf32>
    %69 = vector.shape_cast %68 : vector<8x8x8xf32> to vector<64x8xf32>
    %c0_100 = arith.constant 0 : index
    %c48 = arith.constant 48 : index
    %70 = vector.load %arg17[%c0_100, %c48] : memref<64x72xf32, #tpu.memory_space<vmem>>, vector<64x8xf32>
    tpu.vector_store %arg17[%c0_100, %c48], %69 {strides = array<i32>} : memref<64x72xf32, #tpu.memory_space<vmem>>, vector<64x8xf32>,
    %c2_101 = arith.constant 2 : index
    %c1_102 = arith.constant 1 : index
    %c0_103 = arith.constant 0 : index
    %71 = vector.load %arg16[%c2_101, %c1_102, %c0_103] : memref<10x10x8xf32, #tpu.memory_space<vmem>>, vector<8x8x8xf32>
    %72 = vector.shape_cast %71 : vector<8x8x8xf32> to vector<64x8xf32>
    %c0_104 = arith.constant 0 : index
    %c56 = arith.constant 56 : index
    %73 = vector.load %arg17[%c0_104, %c56] : memref<64x72xf32, #tpu.memory_space<vmem>>, vector<64x8xf32>
    tpu.vector_store %arg17[%c0_104, %c56], %72 {strides = array<i32>} : memref<64x72xf32, #tpu.memory_space<vmem>>, vector<64x8xf32>,
    %c2_105 = arith.constant 2 : index
    %c2_106 = arith.constant 2 : index
    %c0_107 = arith.constant 0 : index
    %74 = vector.load %arg16[%c2_105, %c2_106, %c0_107] : memref<10x10x8xf32, #tpu.memory_space<vmem>>, vector<8x8x8xf32>
    %75 = vector.shape_cast %74 : vector<8x8x8xf32> to vector<64x8xf32>
    %c0_108 = arith.constant 0 : index
    %c64 = arith.constant 64 : index
    %76 = vector.load %arg17[%c0_108, %c64] : memref<64x72xf32, #tpu.memory_space<vmem>>, vector<64x8xf32>
    tpu.vector_store %arg17[%c0_108, %c64], %75 {strides = array<i32>} : memref<64x72xf32, #tpu.memory_space<vmem>>, vector<64x8xf32>,
    %c0_109 = arith.constant 0 : index
    %c0_110 = arith.constant 0 : index
    %77 = vector.load %arg17[%c0_109, %c0_110] : memref<64x72xf32, #tpu.memory_space<vmem>>, vector<64x72xf32>
    %c0_111 = arith.constant 0 : index
    %c0_112 = arith.constant 0 : index
    %78 = vector.load %arg4[%c0_111, %c0_112] : memref<72x8xf32, #tpu.memory_space<vmem>>, vector<72x8xf32>
    %cst_113 = arith.constant dense<0.000000e+00> : vector<64x8xf32>
    %79 = tpu.matmul %77, %78, %cst_113 {dimension_numbers = #tpu.dot_dimension_numbers<[1], [0], [0], [1], [0, 0, 1, 1], [], []>} : vector<64x72xf32>, vector<72x8xf32>, vector<64x8xf32> -> vector<64x8xf32>
    %c0_114 = arith.constant 0 : index
    %c0_115 = arith.constant 0 : index
    %80 = vector.load %arg5[%c0_114, %c0_115] : memref<1x8xf32, #tpu.memory_space<vmem>>, vector<1x8xf32>
    %81 = vector.broadcast %80 : vector<1x8xf32> to vector<64x8xf32>
    %82 = arith.addf %79, %81 : vector<64x8xf32>
    %cst_116 = arith.constant 0.000000e+00 : f32
    %83 = vector.broadcast %cst_116 : f32 to vector<64x8xf32>
    %84 = arith.maximumf %82, %83 : vector<64x8xf32>
    %85 = vector.shape_cast %84 : vector<64x8xf32> to vector<8x8x8xf32>
    %c0_117 = arith.constant 0 : index
    %c0_118 = arith.constant 0 : index
    %c0_119 = arith.constant 0 : index
    %86 = vector.load %arg18[%c0_117, %c0_118, %c0_119] : memref<8x8x8xf32, #tpu.memory_space<vmem>>, vector<8x8x8xf32>
    tpu.vector_store %arg18[%c0_117, %c0_118, %c0_119], %85 {strides = array<i32>} : memref<8x8x8xf32, #tpu.memory_space<vmem>>, vector<8x8x8xf32>,
    %c0_120 = arith.constant 0 : index
    %c0_121 = arith.constant 0 : index
    %c0_122 = arith.constant 0 : index
    %87 = tpu.strided_load %arg18[%c0_120, %c0_121, %c0_122] {strides = array<i32: 1, 2, 1>} : memref<8x8x8xf32, #tpu.memory_space<vmem>>, vector<8x4x8xf32>
    %c0_123 = arith.constant 0 : index
    %c1_124 = arith.constant 1 : index
    %c0_125 = arith.constant 0 : index
    %88 = tpu.strided_load %arg18[%c0_123, %c1_124, %c0_125] {strides = array<i32: 1, 2, 1>} : memref<8x8x8xf32, #tpu.memory_space<vmem>>, vector<8x4x8xf32>
    %89 = arith.maximumf %87, %88 : vector<8x4x8xf32>
    %90 = vector.shape_cast %89 : vector<8x4x8xf32> to vector<4x2x4x8xf32>
    %cst_126 = arith.constant dense<0xFF800000> : vector<4x4x8xf32>
    %91 = vector.multi_reduction <maximumf>, %90, %cst_126 [1] : vector<4x2x4x8xf32> to vector<4x4x8xf32>
    %cst_127 = arith.constant 0.000000e+00 : f32
    %92 = vector.broadcast %cst_127 : f32 to vector<1x128xf32>
    %c0_128 = arith.constant 0 : index
    %c0_129 = arith.constant 0 : index
    %93 = vector.load %arg19[%c0_128, %c0_129] : memref<1x128xf32, #tpu.memory_space<vmem>>, vector<1x128xf32>
    tpu.vector_store %arg19[%c0_128, %c0_129], %92 {strides = array<i32>} : memref<1x128xf32, #tpu.memory_space<vmem>>, vector<1x128xf32>,
    %94 = vector.extract_strided_slice %91 {offsets = [0, 0, 0], sizes = [1, 1, 8], strides = [1, 1, 1]} : vector<4x4x8xf32> to vector<1x1x8xf32>
    %95 = vector.shape_cast %94 : vector<1x1x8xf32> to vector<1x8xf32>
    %c0_130 = arith.constant 0 : index
    %c0_131 = arith.constant 0 : index
    %96 = vector.load %arg19[%c0_130, %c0_131] : memref<1x128xf32, #tpu.memory_space<vmem>>, vector<1x8xf32>
    tpu.vector_store %arg19[%c0_130, %c0_131], %95 {strides = array<i32>} : memref<1x128xf32, #tpu.memory_space<vmem>>, vector<1x8xf32>,
    %97 = vector.extract_strided_slice %91 {offsets = [0, 1, 0], sizes = [1, 1, 8], strides = [1, 1, 1]} : vector<4x4x8xf32> to vector<1x1x8xf32>
    %98 = vector.shape_cast %97 : vector<1x1x8xf32> to vector<1x8xf32>
    %c0_132 = arith.constant 0 : index
    %c8_133 = arith.constant 8 : index
    %99 = vector.load %arg19[%c0_132, %c8_133] : memref<1x128xf32, #tpu.memory_space<vmem>>, vector<1x8xf32>
    tpu.vector_store %arg19[%c0_132, %c8_133], %98 {strides = array<i32>} : memref<1x128xf32, #tpu.memory_space<vmem>>, vector<1x8xf32>,
    %100 = vector.extract_strided_slice %91 {offsets = [0, 2, 0], sizes = [1, 1, 8], strides = [1, 1, 1]} : vector<4x4x8xf32> to vector<1x1x8xf32>
    %101 = vector.shape_cast %100 : vector<1x1x8xf32> to vector<1x8xf32>
    %c0_134 = arith.constant 0 : index
    %c16_135 = arith.constant 16 : index
    %102 = vector.load %arg19[%c0_134, %c16_135] : memref<1x128xf32, #tpu.memory_space<vmem>>, vector<1x8xf32>
    tpu.vector_store %arg19[%c0_134, %c16_135], %101 {strides = array<i32>} : memref<1x128xf32, #tpu.memory_space<vmem>>, vector<1x8xf32>,
    %103 = vector.extract_strided_slice %91 {offsets = [0, 3, 0], sizes = [1, 1, 8], strides = [1, 1, 1]} : vector<4x4x8xf32> to vector<1x1x8xf32>
    %104 = vector.shape_cast %103 : vector<1x1x8xf32> to vector<1x8xf32>
    %c0_136 = arith.constant 0 : index
    %c24_137 = arith.constant 24 : index
    %105 = vector.load %arg19[%c0_136, %c24_137] : memref<1x128xf32, #tpu.memory_space<vmem>>, vector<1x8xf32>
    tpu.vector_store %arg19[%c0_136, %c24_137], %104 {strides = array<i32>} : memref<1x128xf32, #tpu.memory_space<vmem>>, vector<1x8xf32>,
    %106 = vector.extract_strided_slice %91 {offsets = [1, 0, 0], sizes = [1, 1, 8], strides = [1, 1, 1]} : vector<4x4x8xf32> to vector<1x1x8xf32>
    %107 = vector.shape_cast %106 : vector<1x1x8xf32> to vector<1x8xf32>
    %c0_138 = arith.constant 0 : index
    %c32_139 = arith.constant 32 : index
    %108 = vector.load %arg19[%c0_138, %c32_139] : memref<1x128xf32, #tpu.memory_space<vmem>>, vector<1x8xf32>
    tpu.vector_store %arg19[%c0_138, %c32_139], %107 {strides = array<i32>} : memref<1x128xf32, #tpu.memory_space<vmem>>, vector<1x8xf32>,
    %109 = vector.extract_strided_slice %91 {offsets = [1, 1, 0], sizes = [1, 1, 8], strides = [1, 1, 1]} : vector<4x4x8xf32> to vector<1x1x8xf32>
    %110 = vector.shape_cast %109 : vector<1x1x8xf32> to vector<1x8xf32>
    %c0_140 = arith.constant 0 : index
    %c40_141 = arith.constant 40 : index
    %111 = vector.load %arg19[%c0_140, %c40_141] : memref<1x128xf32, #tpu.memory_space<vmem>>, vector<1x8xf32>
    tpu.vector_store %arg19[%c0_140, %c40_141], %110 {strides = array<i32>} : memref<1x128xf32, #tpu.memory_space<vmem>>, vector<1x8xf32>,
    %112 = vector.extract_strided_slice %91 {offsets = [1, 2, 0], sizes = [1, 1, 8], strides = [1, 1, 1]} : vector<4x4x8xf32> to vector<1x1x8xf32>
    %113 = vector.shape_cast %112 : vector<1x1x8xf32> to vector<1x8xf32>
    %c0_142 = arith.constant 0 : index
    %c48_143 = arith.constant 48 : index
    %114 = vector.load %arg19[%c0_142, %c48_143] : memref<1x128xf32, #tpu.memory_space<vmem>>, vector<1x8xf32>
    tpu.vector_store %arg19[%c0_142, %c48_143], %113 {strides = array<i32>} : memref<1x128xf32, #tpu.memory_space<vmem>>, vector<1x8xf32>,
    %115 = vector.extract_strided_slice %91 {offsets = [1, 3, 0], sizes = [1, 1, 8], strides = [1, 1, 1]} : vector<4x4x8xf32> to vector<1x1x8xf32>
    %116 = vector.shape_cast %115 : vector<1x1x8xf32> to vector<1x8xf32>
    %c0_144 = arith.constant 0 : index
    %c56_145 = arith.constant 56 : index
    %117 = vector.load %arg19[%c0_144, %c56_145] : memref<1x128xf32, #tpu.memory_space<vmem>>, vector<1x8xf32>
    tpu.vector_store %arg19[%c0_144, %c56_145], %116 {strides = array<i32>} : memref<1x128xf32, #tpu.memory_space<vmem>>, vector<1x8xf32>,
    %118 = vector.extract_strided_slice %91 {offsets = [2, 0, 0], sizes = [1, 1, 8], strides = [1, 1, 1]} : vector<4x4x8xf32> to vector<1x1x8xf32>
    %119 = vector.shape_cast %118 : vector<1x1x8xf32> to vector<1x8xf32>
    %c0_146 = arith.constant 0 : index
    %c64_147 = arith.constant 64 : index
    %120 = vector.load %arg19[%c0_146, %c64_147] : memref<1x128xf32, #tpu.memory_space<vmem>>, vector<1x8xf32>
    tpu.vector_store %arg19[%c0_146, %c64_147], %119 {strides = array<i32>} : memref<1x128xf32, #tpu.memory_space<vmem>>, vector<1x8xf32>,
    %121 = vector.extract_strided_slice %91 {offsets = [2, 1, 0], sizes = [1, 1, 8], strides = [1, 1, 1]} : vector<4x4x8xf32> to vector<1x1x8xf32>
    %122 = vector.shape_cast %121 : vector<1x1x8xf32> to vector<1x8xf32>
    %c0_148 = arith.constant 0 : index
    %c72 = arith.constant 72 : index
    %123 = vector.load %arg19[%c0_148, %c72] : memref<1x128xf32, #tpu.memory_space<vmem>>, vector<1x8xf32>
    tpu.vector_store %arg19[%c0_148, %c72], %122 {strides = array<i32>} : memref<1x128xf32, #tpu.memory_space<vmem>>, vector<1x8xf32>,
    %124 = vector.extract_strided_slice %91 {offsets = [2, 2, 0], sizes = [1, 1, 8], strides = [1, 1, 1]} : vector<4x4x8xf32> to vector<1x1x8xf32>
    %125 = vector.shape_cast %124 : vector<1x1x8xf32> to vector<1x8xf32>
    %c0_149 = arith.constant 0 : index
    %c80 = arith.constant 80 : index
    %126 = vector.load %arg19[%c0_149, %c80] : memref<1x128xf32, #tpu.memory_space<vmem>>, vector<1x8xf32>
    tpu.vector_store %arg19[%c0_149, %c80], %125 {strides = array<i32>} : memref<1x128xf32, #tpu.memory_space<vmem>>, vector<1x8xf32>,
    %127 = vector.extract_strided_slice %91 {offsets = [2, 3, 0], sizes = [1, 1, 8], strides = [1, 1, 1]} : vector<4x4x8xf32> to vector<1x1x8xf32>
    %128 = vector.shape_cast %127 : vector<1x1x8xf32> to vector<1x8xf32>
    %c0_150 = arith.constant 0 : index
    %c88 = arith.constant 88 : index
    %129 = vector.load %arg19[%c0_150, %c88] : memref<1x128xf32, #tpu.memory_space<vmem>>, vector<1x8xf32>
    tpu.vector_store %arg19[%c0_150, %c88], %128 {strides = array<i32>} : memref<1x128xf32, #tpu.memory_space<vmem>>, vector<1x8xf32>,
    %130 = vector.extract_strided_slice %91 {offsets = [3, 0, 0], sizes = [1, 1, 8], strides = [1, 1, 1]} : vector<4x4x8xf32> to vector<1x1x8xf32>
    %131 = vector.shape_cast %130 : vector<1x1x8xf32> to vector<1x8xf32>
    %c0_151 = arith.constant 0 : index
    %c96 = arith.constant 96 : index
    %132 = vector.load %arg19[%c0_151, %c96] : memref<1x128xf32, #tpu.memory_space<vmem>>, vector<1x8xf32>
    tpu.vector_store %arg19[%c0_151, %c96], %131 {strides = array<i32>} : memref<1x128xf32, #tpu.memory_space<vmem>>, vector<1x8xf32>,
    %133 = vector.extract_strided_slice %91 {offsets = [3, 1, 0], sizes = [1, 1, 8], strides = [1, 1, 1]} : vector<4x4x8xf32> to vector<1x1x8xf32>
    %134 = vector.shape_cast %133 : vector<1x1x8xf32> to vector<1x8xf32>
    %c0_152 = arith.constant 0 : index
    %c104 = arith.constant 104 : index
    %135 = vector.load %arg19[%c0_152, %c104] : memref<1x128xf32, #tpu.memory_space<vmem>>, vector<1x8xf32>
    tpu.vector_store %arg19[%c0_152, %c104], %134 {strides = array<i32>} : memref<1x128xf32, #tpu.memory_space<vmem>>, vector<1x8xf32>,
    %136 = vector.extract_strided_slice %91 {offsets = [3, 2, 0], sizes = [1, 1, 8], strides = [1, 1, 1]} : vector<4x4x8xf32> to vector<1x1x8xf32>
    %137 = vector.shape_cast %136 : vector<1x1x8xf32> to vector<1x8xf32>
    %c0_153 = arith.constant 0 : index
    %c112 = arith.constant 112 : index
    %138 = vector.load %arg19[%c0_153, %c112] : memref<1x128xf32, #tpu.memory_space<vmem>>, vector<1x8xf32>
    tpu.vector_store %arg19[%c0_153, %c112], %137 {strides = array<i32>} : memref<1x128xf32, #tpu.memory_space<vmem>>, vector<1x8xf32>,
    %139 = vector.extract_strided_slice %91 {offsets = [3, 3, 0], sizes = [1, 1, 8], strides = [1, 1, 1]} : vector<4x4x8xf32> to vector<1x1x8xf32>
    %140 = vector.shape_cast %139 : vector<1x1x8xf32> to vector<1x8xf32>
    %c0_154 = arith.constant 0 : index
    %c120 = arith.constant 120 : index
    %141 = vector.load %arg19[%c0_154, %c120] : memref<1x128xf32, #tpu.memory_space<vmem>>, vector<1x8xf32>
    tpu.vector_store %arg19[%c0_154, %c120], %140 {strides = array<i32>} : memref<1x128xf32, #tpu.memory_space<vmem>>, vector<1x8xf32>,
    %c0_155 = arith.constant 0 : index
    %c0_156 = arith.constant 0 : index
    %142 = vector.load %arg19[%c0_155, %c0_156] : memref<1x128xf32, #tpu.memory_space<vmem>>, vector<1x128xf32>
    %143 = arith.truncf %142 : vector<1x128xf32> to vector<1x128xbf16>
    %c0_157 = arith.constant 0 : index
    %c0_158 = arith.constant 0 : index
    %144 = vector.load %arg6[%c0_157, %c0_158] : memref<128x128xbf16, #tpu.memory_space<vmem>>, vector<128x128xbf16>
    %cst_159 = arith.constant dense<0.000000e+00> : vector<1x128xf32>
    %145 = tpu.matmul %143, %144, %cst_159 {dimension_numbers = #tpu.dot_dimension_numbers<[1], [0], [0], [1], [0, 0, 1, 1], [], []>} : vector<1x128xbf16>, vector<128x128xbf16>, vector<1x128xf32> -> vector<1x128xf32>
    %c0_160 = arith.constant 0 : index
    %c0_161 = arith.constant 0 : index
    %146 = vector.load %arg7[%c0_160, %c0_161] : memref<1x128xf32, #tpu.memory_space<vmem>>, vector<1x128xf32>
    %147 = arith.addf %145, %146 : vector<1x128xf32>
    %cst_162 = arith.constant 0.000000e+00 : f32
    %148 = vector.broadcast %cst_162 : f32 to vector<1x128xf32>
    %149 = arith.maximumf %147, %148 : vector<1x128xf32>
    %150 = arith.truncf %149 : vector<1x128xf32> to vector<1x128xbf16>
    %c0_163 = arith.constant 0 : index
    %c0_164 = arith.constant 0 : index
    %151 = vector.load %arg8[%c0_163, %c0_164] : memref<128x128xbf16, #tpu.memory_space<vmem>>, vector<128x128xbf16>
    %cst_165 = arith.constant dense<0.000000e+00> : vector<1x128xf32>
    %152 = tpu.matmul %150, %151, %cst_165 {dimension_numbers = #tpu.dot_dimension_numbers<[1], [0], [0], [1], [0, 0, 1, 1], [], []>} : vector<1x128xbf16>, vector<128x128xbf16>, vector<1x128xf32> -> vector<1x128xf32>
    %c0_166 = arith.constant 0 : index
    %c0_167 = arith.constant 0 : index
    %153 = vector.load %arg9[%c0_166, %c0_167] : memref<1x128xf32, #tpu.memory_space<vmem>>, vector<1x128xf32>
    %154 = arith.addf %152, %153 : vector<1x128xf32>
    %cst_168 = arith.constant 0.000000e+00 : f32
    %155 = vector.broadcast %cst_168 : f32 to vector<1x128xf32>
    %156 = arith.maximumf %154, %155 : vector<1x128xf32>
    %157 = arith.truncf %156 : vector<1x128xf32> to vector<1x128xbf16>
    %c0_169 = arith.constant 0 : index
    %c0_170 = arith.constant 0 : index
    %158 = vector.load %arg10[%c0_169, %c0_170] : memref<128x128xbf16, #tpu.memory_space<vmem>>, vector<128x128xbf16>
    %cst_171 = arith.constant dense<0.000000e+00> : vector<1x128xf32>
    %159 = tpu.matmul %157, %158, %cst_171 {dimension_numbers = #tpu.dot_dimension_numbers<[1], [0], [0], [1], [0, 0, 1, 1], [], []>} : vector<1x128xbf16>, vector<128x128xbf16>, vector<1x128xf32> -> vector<1x128xf32>
    %c0_172 = arith.constant 0 : index
    %c0_173 = arith.constant 0 : index
    %160 = vector.load %arg11[%c0_172, %c0_173] : memref<1x128xf32, #tpu.memory_space<vmem>>, vector<1x128xf32>
    %161 = arith.addf %159, %160 : vector<1x128xf32>
    %c0_174 = arith.constant 0 : index
    %c0_175 = arith.constant 0 : index
    %c0_176 = arith.constant 0 : index
    %162 = vector.load %arg12[%c0_174, %c0_175, %c0_176] : memref<1x1x128xf32, #tpu.memory_space<vmem>>, vector<1x1x128xf32>
    %163 = vector.shape_cast %162 : vector<1x1x128xf32> to vector<1x128xf32>
    %164 = vector.shape_cast %161 : vector<1x128xf32> to vector<1x1x128xf32>
    tpu.vector_store %arg12[%c0_174, %c0_175, %c0_176], %164 {strides = array<i32>} : memref<1x1x128xf32, #tpu.memory_space<vmem>>, vector<1x1x128xf32>,
    return
  }
  func.func @transform_0(%arg0: i32) -> (i32, i32, i32, i32) {
    %c0_i32 = arith.constant 0 : i32
    %c0_i32_0 = arith.constant 0 : i32
    %c0_i32_1 = arith.constant 0 : i32
    %c0_i32_2 = arith.constant 0 : i32
    return %arg0, %c0_i32, %c0_i32_0, %c0_i32_1 : i32, i32, i32, i32
  }
  func.func @transform_1(%arg0: i32) -> (i32, i32) {
    %c0_i32 = arith.constant 0 : i32
    %c0_i32_0 = arith.constant 0 : i32
    %c0_i32_1 = arith.constant 0 : i32
    return %c0_i32, %c0_i32_0 : i32, i32
  }
  func.func @transform_2(%arg0: i32) -> (i32, i32) {
    %c0_i32 = arith.constant 0 : i32
    %c0_i32_0 = arith.constant 0 : i32
    %c0_i32_1 = arith.constant 0 : i32
    return %c0_i32, %c0_i32_0 : i32, i32
  }
  func.func @transform_3(%arg0: i32) -> (i32, i32) {
    %c0_i32 = arith.constant 0 : i32
    %c0_i32_0 = arith.constant 0 : i32
    %c0_i32_1 = arith.constant 0 : i32
    return %c0_i32, %c0_i32_0 : i32, i32
  }
  func.func @transform_4(%arg0: i32) -> (i32, i32) {
    %c0_i32 = arith.constant 0 : i32
    %c0_i32_0 = arith.constant 0 : i32
    %c0_i32_1 = arith.constant 0 : i32
    return %c0_i32, %c0_i32_0 : i32, i32
  }
  func.func @transform_5(%arg0: i32) -> (i32, i32) {
    %c0_i32 = arith.constant 0 : i32
    %c0_i32_0 = arith.constant 0 : i32
    %c0_i32_1 = arith.constant 0 : i32
    return %c0_i32, %c0_i32_0 : i32, i32
  }
  func.func @transform_6(%arg0: i32) -> (i32, i32) {
    %c0_i32 = arith.constant 0 : i32
    %c0_i32_0 = arith.constant 0 : i32
    %c0_i32_1 = arith.constant 0 : i32
    return %c0_i32, %c0_i32_0 : i32, i32
  }
  func.func @transform_7(%arg0: i32) -> (i32, i32) {
    %c0_i32 = arith.constant 0 : i32
    %c0_i32_0 = arith.constant 0 : i32
    %c0_i32_1 = arith.constant 0 : i32
    return %c0_i32, %c0_i32_0 : i32, i32
  }
  func.func @transform_8(%arg0: i32) -> (i32, i32) {
    %c0_i32 = arith.constant 0 : i32
    %c0_i32_0 = arith.constant 0 : i32
    %c0_i32_1 = arith.constant 0 : i32
    return %c0_i32, %c0_i32_0 : i32, i32
  }
  func.func @transform_9(%arg0: i32) -> (i32, i32) {
    %c0_i32 = arith.constant 0 : i32
    %c0_i32_0 = arith.constant 0 : i32
    %c0_i32_1 = arith.constant 0 : i32
    return %c0_i32, %c0_i32_0 : i32, i32
  }
  func.func @transform_10(%arg0: i32) -> (i32, i32) {
    %c0_i32 = arith.constant 0 : i32
    %c0_i32_0 = arith.constant 0 : i32
    %c0_i32_1 = arith.constant 0 : i32
    return %c0_i32, %c0_i32_0 : i32, i32
  }
  func.func @transform_11(%arg0: i32) -> (i32, i32, i32) {
    %c0_i32 = arith.constant 0 : i32
    %c0_i32_0 = arith.constant 0 : i32
    %c0_i32_1 = arith.constant 0 : i32
    return %arg0, %c0_i32, %c0_i32_0 : i32, i32, i32
  }
}

</mosaic_0001>

<bundles_post_ra>
// kernel: tpu_custom_call.1
= control target key start
LH: loop header
LB: loop body
LE: loop exit
PB: predicated region body
PF: predicated region fallthrough
CT: control target
= control target key end

     0   :  { %s5574_s0 = inlined_call_operand.vmem [shape: f32[2,16,16,1], index: 0, kind: input, shape index: {}]   ;;  %s5575_s1 = inlined_call_operand.vmem [shape: f32[9,8], index: 1, kind: input, shape index: {}]   ;;  %s5576_s2 = inlined_call_operand.vmem [shape: f32[1,8], index: 2, kind: input, shape index: {}]   ;;  %s5577_s3 = inlined_call_operand.vmem [shape: f32[72,8], index: 3, kind: input, shape index: {}]   ;;  %s5578_s4 = inlined_call_operand.vmem [shape: f32[1,8], index: 4, kind: input, shape index: {}]   ;;  %s5579_s5 = inlined_call_operand.vmem [shape: bf16[128,128], index: 5, kind: input, shape index: {}]   ;;  %s5580_s6 = inlined_call_operand.vmem [shape: f32[1,128], index: 6, kind: input, shape index: {}]   ;;  %s5581_s7 = inlined_call_operand.vmem [shape: bf16[128,128], index: 7, kind: input, shape index: {}]   ;;  %s5582_s8 = inlined_call_operand.vmem [shape: f32[1,128], index: 8, kind: input, shape index: {}]   ;;  %s5583_s9 = inlined_call_operand.vmem [shape: bf16[128,128], index: 9, kind: input, shape index: {}]   ;;  %s5584_s10 = inlined_call_operand.vmem [shape: f32[1,128], index: 10, kind: input, shape index: {}]   ;;  %s5585_s11 = inlined_call_operand.hbm [shape: f32[2,1,128], index: 11, kind: output, shape index: {}]  }
   0x1   :  { %5606 = sst [smem:[#allocation12_spill]] %s5574_s0 }
   0x2   :  { %5607 = sst [smem:[#allocation13_spill]] %s5575_s1 }
   0x3   :  { %16 = vsyncpa [#allocation10], 0 }
   0x4   :  { %18 = vsyncpa [#allocation10 + $0x1], 0  ;;  %s3906_s17 = smov 0   ;;  %s3908_s18 = smov 0  }
   0x5   :  { %s3910_s19 = smov 0   ;;  %s3912_s20 = smov 0  }
   0x6 LB: > { %s3927_s21 = sadd.s32 4294967295, %s3821_s20   ;;  %s3519_s22 = sadd.s32 4294967294, %s3821_s20   ;;  %s3821_s20 = sphi %s3912_s20, %s5625_s20   ;;  %s3817_s19 = sphi %s3910_s19, %s5624_s19   ;;  %s3813_s18 = sphi %s3908_s18, %s5623_s18   ;;  %s3809_s17 = sphi %s3906_s17, %s5622_s17  }
   0x7   : > { %s3931_s23 = sadd.s32 1, %s3821_s20   ;;  %s267_s24 = sadd.s32 1, %s3817_s19 }
   0x8   : > { %s264_s25 = ssub.s32 %s3821_s20, %s3931_s23  ;;  %p277_p0 = scmp.ne.s32.totalorder %s3817_s19, %s3813_s18 }
   0x9   : > { %p265_p1 = scmp.eq.s32.totalorder %s264_s25, 0  ;;  %p278_p2 = scmp.eq.s32.totalorder %s3927_s21, 1 }
   0xa   : > { %p283_p3 = scmp.ne.s32.totalorder %s3813_s18, %s3809_s17  ;;  %p284_p4 = scmp.eq.s32.totalorder %s3519_s22, 1 }
   0xb   : > { %s3942_s26 = scalar_select %p265_p1, %s3817_s19, %s267_s24  }
   0xc   : > { %p3944_p5 = por %p278_p2, %p277_p0  ;;  %p3948_p6 = por %p284_p4, %p283_p3 }
   0xd   : > { %p3522_p7 = scmp.ge.s32.totalorder %s3821_s20, 1  ;;  %p340_p8 = scmp.lt.s32.totalorder %s3821_s20, 3 }
   0xf   : > { %p341_p9 = pnand %p3522_p7, %p340_p8 }
  0x10   : > { %s5588_s29 = smov (!%p341_p9), 1   ;;  %s3825_s30 = smov (!%p341_p9), 2  }
  0x11   : > { %344 = sbr.rel (%p341_p9) target bundleno = 1875 (0x753), region = 64  ;;  %p379_p10 = scmp.lt.s32.totalorder (!%p341_p9), %s3927_s21, 1 }
  0x12   : > { %s5610_s0 = sld [smem:[#allocation12_spill]] (!%p341_p9)  ;;  %s3826_s22 = smov (!%p341_p9), 3  }
  0x13   : > { %s5592_s24 = smov (!%p341_p9), 5   ;;  %s3828_s25 = smov (!%p341_p9), 4  }
  0x14   : > { %s5590_s14 = smov (!%p341_p9), 8   ;;  %s5611_s1 = sld [smem:[#allocation13_spill]] (!%p341_p9) }
  0x15   : > { %s5620_s15 = smov (!%p341_p9), 32  }
  0x16   : > { %vm416_vm0 = vcmask 7168   ;;  %v3823_v0 = vmov 0.0   ;;  %s380_s12 = scalar_select %p379_p10, %s3927_s21, 1  ;;  %vm419_vm1 = vcmask 1024   ;;  %vm729_vm2 = vcmask 15368  }
  0x17   : > { %417 = vst.msk [vmem:[#allocation2] sm:$0xff] %vm416_vm0, %v3823_v0  ;;  %vm922_vm3 = vcmask 23568   ;;  %vm2249_vm4 = vcmask 1040384   ;;  %vm1115_vm5 = vcmask 31768   ;;  %vm1308_vm6 = vcmask 39968  }
  0x18   : > { %418 = vst.msk [vmem:[#allocation2 + $0x8] sm:$0xff] %vm416_vm0, %v3823_v0  ;;  %s3664_s13 = sshll.u32 %s380_s12, 8  ;;  %s5586_s12 = smov 6   ;;  %vm1501_vm7 = vcmask 48168   ;;  %vm1695_vm8 = vcmask 56368   ;;  %vm1888_vm9 = vcmask 64568  }
  0x19   : > { %421 = vst.msk [vmem:[#allocation2 + $0x18] sm:$0xff] %vm416_vm0, %v3823_v0  ;;  %s4027_s16 = scalar_lea.vmem %s5610_s0, %s3664_s13  ;;  %s3830_s13 = smov 7   ;;  %vm2081_vm10 = vcmask 72768   ;;  %vm2152_vm11 = vcmask 72704   ;;  %vm2398_vm12 = vcmask 64512   ;;  %vm2535_vm13 = vcmask 58368  }
  0x1a   : > { %422 = vst.msk [vmem:[#allocation2 + $0x20] sm:$0xff] %vm416_vm0, %v3823_v0  ;;  %v384_v3 = vld [vmem:[%s4027_s16] sm:$0xff]  ;;  %v385_v4 = vld [vmem:[%s4027_s16 + $0x8] sm:$0xff]  ;;  %v386_v8 = vld [vmem:[%s4027_s16 + $0x10] sm:$0xff]  ;;  %vm2620_vm14 = vcmask 130112   ;;  %vm2669_vm15 = vcmask 195712  }
  0x1b   : > { %424 = vst.msk [vmem:[#allocation2 + $0x30] sm:$0xff] %vm416_vm0, %v3823_v0  ;;  %v387_v9 = vld [vmem:[%s4027_s16 + $0x18] sm:$0xff]  ;;  %v388_v15 = vld [vmem:[%s4027_s16 + $0x20] sm:$0xff]  ;;  %v389_v18 = vld [vmem:[%s4027_s16 + $0x28] sm:$0xff]  ;;  %s5621_s0 = smov 48  }
  0x1c   : > { %425 = vst.msk [vmem:[#allocation2 + $0x38] sm:$0xff] %vm416_vm0, %v3823_v0  ;;  %v390_v27 = vld [vmem:[%s4027_s16 + $0x30] sm:$0xff]  ;;  %v391_v28 = vld [vmem:[%s4027_s16 + $0x38] sm:$0xff]  ;;  %v404_v40 = vld [vmem:[%s4027_s16 + $0xa0] sm:$0xff] }
  0x1d   : > { %427 = vst.msk [vmem:[#allocation2 + $0x48] sm:$0xff] %vm416_vm0, %v3823_v0  ;;  %v403_v36 = vld [vmem:[%s4027_s16 + $0x98] sm:$0xff]  ;;  %v405_v41 = vld [vmem:[%s4027_s16 + $0xa8] sm:$0xff]  ;;  %v2146_v45 = vld [vmem:[%s5611_s1] sm:$0xff] }
  0x1e   : > { %428 = vst.msk [vmem:[#allocation2 + $0x50] sm:$0xff] %vm416_vm0, %v3823_v0  ;;  %v505_v34 = vld [vmem:[#allocation2] sm:$0xff]  ;;  %v2147_v43 = vld [vmem:[%s5611_s1 + $0x8] sm:$0x1]  ;;  %v406_v52 = vld [vmem:[%s4027_s16 + $0xb0] sm:$0xff] }
  0x1f   : > { %v569_v1 = vld [vmem:[#allocation2 + $0x1] sm:$0xff]  ;;  %430 = vst.msk [vmem:[#allocation2 + $0x60] sm:$0xff] %vm416_vm0, %v3823_v0  ;;  %3525 = vmatpush.msk.msra.mxu0 %vm2249_vm4, %v2147_v43  ;;  %3690 = vmatpush.msk.msra.mxu3 %vm2249_vm4, %v2147_v43  ;;  %v407_v53 = vld [vmem:[%s4027_s16 + $0xb8] sm:$0xff] }
  0x20   : > { %633 = vrot.lane.b32.xlu0 %v569_v1, %s5588_s29  ;;  %431 = vst.msk [vmem:[#allocation2 + $0x68] sm:$0xff] %vm416_vm0, %v3823_v0  ;;  %v762_v2 = vld [vmem:[#allocation2 + $0x2] sm:$0xff]  ;;  %3689 = vmatpush.msk.msra.mxu2 %vm2249_vm4, %v2147_v43  ;;  %vm2915_vm4 = vcmask 523712  }
  0x21   : > { %433 = vst.msk [vmem:[#allocation2 + $0x78] sm:$0xff] %vm416_vm0, %v3823_v0  ;;  %v506_v32 = vld [vmem:[#allocation2 + $0x8] sm:$0xff]  ;;  %2268 = vmatpush.msra.mxu0 %v2146_v45  ;;  %v392_v46 = vld [vmem:[%s4027_s16 + $0x40] sm:$0xff]  ;;  %3692 = vmatpush.msra.mxu3 %v2146_v45 }
  0x22   : > { %434 = vst.msk [vmem:[#allocation2 + $0x80] sm:$0xff] %vm416_vm0, %v3823_v0  ;;  %3691 = vmatpush.msra.mxu2 %v2146_v45  ;;  %v393_v56 = vld [vmem:[%s4027_s16 + $0x48] sm:$0xff] }
  0x23   : > { %436 = vst.msk [vmem:[#allocation2 + $0x90] sm:$0xff] %vm416_vm0, %v3823_v0 }
  0x24   : > { %437 = vst.msk [vmem:[#allocation2 + $0x98] sm:$0xff] %vm416_vm0, %v3823_v0 }
  0x25   : > { %439 = vst.msk [vmem:[#allocation2 + $0xa8] sm:$0xff] %vm416_vm0, %v3823_v0 }
  0x26   : > { %440 = vst.msk [vmem:[#allocation2 + $0xb0] sm:$0xff] %vm416_vm0, %v3823_v0 }
  0x27   : > { %442 = vst.msk [vmem:[#allocation2 + $0xc0] sm:$0xff] %vm416_vm0, %v3823_v0 }
  0x28   : > { %443 = vst.msk [vmem:[#allocation2 + $0xc8] sm:$0xff] %vm416_vm0, %v3823_v0  ;;  %826 = vrot.lane.b32.xlu0 %v762_v2, %s3825_s30 }
  0x29   : > { %445 = vst.msk [vmem:[#allocation2 + $0xd8] sm:$0xff] %vm416_vm0, %v3823_v0 }
  0x2a   : > { %446 = vst.msk [vmem:[#allocation2 + $0xe0] sm:$0xff] %vm416_vm0, %v3823_v0 }
  0x2b   : > { %448 = vst.msk [vmem:[#allocation2 + $0xf0] sm:$0xff] %vm416_vm0, %v3823_v0 }
  0x2c   : > { %449 = vst.msk [vmem:[#allocation2 + $0xf8] sm:$0xff] %vm416_vm0, %v3823_v0 }
  0x2d   : > { %451 = vst.msk [vmem:[#allocation2 + $0x108] sm:$0xff] %vm416_vm0, %v3823_v0 }
  0x2e   : > { %452 = vst.msk [vmem:[#allocation2 + $0x110] sm:$0xff] %vm416_vm0, %v3823_v0 }
  0x2f   : > { %454 = vst.msk [vmem:[#allocation2 + $0x120] sm:$0xff] %vm416_vm0, %v3823_v0 }
  0x30   : > { %455 = vst.msk [vmem:[#allocation2 + $0x128] sm:$0xff] %vm416_vm0, %v3823_v0 }
  0x31   : > { %457 = vst.msk [vmem:[#allocation2 + $0x138] sm:$0xff] %vm416_vm0, %v3823_v0 }
  0x32   : > { %458 = vst.msk [vmem:[#allocation2 + $0x140] sm:$0xff] %vm416_vm0, %v3823_v0 }
  0x33   : > { %460 = vst.msk [vmem:[#allocation2 + $0x150] sm:$0xff] %vm416_vm0, %v3823_v0 }
  0x34   : > { %461 = vst.msk [vmem:[#allocation2 + $0x158] sm:$0xff] %vm416_vm0, %v3823_v0 }
  0x35   : > { %463 = vst.msk [vmem:[#allocation2 + $0x168] sm:$0xff] %vm416_vm0, %v3823_v0 }
  0x36   : > { %464 = vst.msk [vmem:[#allocation2 + $0x170] sm:$0xff] %vm416_vm0, %v3823_v0 }
  0x37   : > { %466 = vst.msk [vmem:[#allocation2 + $0x180] sm:$0xff] %vm416_vm0, %v3823_v0 }
  0x38   : > { %467 = vst.msk [vmem:[#allocation2 + $0x188] sm:$0xff] %vm416_vm0, %v3823_v0 }
  0x39   : > { %469 = vst.msk [vmem:[#allocation2 + $0x198] sm:$0xff] %vm416_vm0, %v3823_v0 }
  0x3a   : > { %470 = vst.msk [vmem:[#allocation2 + $0x1a0] sm:$0xff] %vm416_vm0, %v3823_v0 }
  0x3b   : > { %3128 = vst [vmem:[#allocation8] sm:$0x1] %v3823_v0 }
  0x3c   : > { %423 = vst.msk [vmem:[#allocation2 + $0x28] sm:$0x3] %vm419_vm1, %v3823_v0 }
  0x3d   : > { %473 = vst.msk [vmem:[#allocation2 + $0x19] sm:$0xff] %vm416_vm0, %v384_v3 }
  0x3e   : > { %474 = vst.msk [vmem:[#allocation2 + $0x21] sm:$0xff] %vm416_vm0, %v385_v4 }
  0x3f   : > { %420 = vst.msk [vmem:[#allocation2 + $0x10] sm:$0x3] %vm419_vm1, %v3823_v0 }
  0x40   : > { %426 = vst.msk [vmem:[#allocation2 + $0x40] sm:$0x3] %vm419_vm1, %v3823_v0 }
  0x41   : > { %429 = vst.msk [vmem:[#allocation2 + $0x58] sm:$0x3] %vm419_vm1, %v3823_v0 }
  0x42   : > { %432 = vst.msk [vmem:[#allocation2 + $0x70] sm:$0x3] %vm419_vm1, %v3823_v0 }
  0x43   : > { %435 = vst.msk [vmem:[#allocation2 + $0x88] sm:$0x3] %vm419_vm1, %v3823_v0 }
  0x44   : > { %438 = vst.msk [vmem:[#allocation2 + $0xa0] sm:$0x3] %vm419_vm1, %v3823_v0  ;;  %v955_v5 = vld [vmem:[#allocation2 + $0x18] sm:$0xff] }
  0x45   : > { %v1341_v6 = vld [vmem:[#allocation2 + $0x1a] sm:$0xff]  ;;  %441 = vst.msk [vmem:[#allocation2 + $0xb8] sm:$0x3] %vm419_vm1, %v3823_v0  ;;  %1019 = vrot.lane.b32.xlu1 %v955_v5, %s3826_s22  ;;  %v1342_v21 = vld [vmem:[#allocation2 + $0x22] sm:$0xff] }
  0x46   : > { %1405 = vrot.lane.b32.xlu2 %v1341_v6, %s5592_s24  ;;  %444 = vst.msk [vmem:[#allocation2 + $0xd0] sm:$0x3] %vm419_vm1, %v3823_v0  ;;  %v1148_v7 = vld [vmem:[#allocation2 + $0x19] sm:$0xff]  ;;  %v570_v16 = vld [vmem:[#allocation2 + $0x9] sm:$0xff]  ;;  %v1149_v20 = vld [vmem:[#allocation2 + $0x21] sm:$0xff] }
  0x47   : > { %447 = vst.msk [vmem:[#allocation2 + $0xe8] sm:$0x3] %vm419_vm1, %v3823_v0  ;;  %v956_v10 = vld [vmem:[#allocation2 + $0x20] sm:$0xff]  ;;  %v763_v17 = vld [vmem:[#allocation2 + $0xa] sm:$0xff] }
  0x48   : > { %450 = vst.msk [vmem:[#allocation2 + $0x100] sm:$0x3] %vm419_vm1, %v3823_v0 }
  0x49   : > { %453 = vst.msk [vmem:[#allocation2 + $0x118] sm:$0x3] %vm419_vm1, %v3823_v0 }
  0x4a   : > { %456 = vst.msk [vmem:[#allocation2 + $0x130] sm:$0x3] %vm419_vm1, %v3823_v0 }
  0x4b   : > { %459 = vst.msk [vmem:[#allocation2 + $0x148] sm:$0x3] %vm419_vm1, %v3823_v0 }
  0x4c   : > { %462 = vst.msk [vmem:[#allocation2 + $0x160] sm:$0x3] %vm419_vm1, %v3823_v0 }
  0x4d   : > { %465 = vst.msk [vmem:[#allocation2 + $0x178] sm:$0x3] %vm419_vm1, %v3823_v0  ;;  %1212 = vrot.lane.b32.xlu1 %v1148_v7, %s3828_s25 }
  0x4e   : > { %468 = vst.msk [vmem:[#allocation2 + $0x190] sm:$0x3] %vm419_vm1, %v3823_v0 }
  0x4f   : > { %471 = vst.msk [vmem:[#allocation2 + $0x1a8] sm:$0x3] %vm419_vm1, %v3823_v0  ;;  %vm2767_vm1 = vcmask 326912  }
  0x50   : > { %475 = vst.msk [vmem:[#allocation2 + $0x31] sm:$0xff] %vm416_vm0, %v386_v8 }
  0x51   : > { %476 = vst.msk [vmem:[#allocation2 + $0x39] sm:$0xff] %vm416_vm0, %v387_v9 }
  0x52   : > { %539 = vst.msk [vmem:[#allocation3 + $0x10] sm:$0xff] %vm416_vm0, %v955_v5 }
  0x53   : > { %540 = vst.msk [vmem:[#allocation3 + $0x18] sm:$0xff] %vm416_vm0, %v956_v10 }
  0x54   : > { %477 = vst.msk [vmem:[#allocation2 + $0x49] sm:$0xff] %vm416_vm0, %v388_v15 }
  0x55   : > { %478 = vst.msk [vmem:[#allocation2 + $0x51] sm:$0xff] %vm416_vm0, %v389_v18 }
  0x56   : > { %479 = vst.msk [vmem:[#allocation2 + $0x61] sm:$0xff] %vm416_vm0, %v390_v27  ;;  %v409_v27 = vld [vmem:[%s4027_s16 + $0xc8] sm:$0xff] }
  0x57   : > { %v1535_v11 = vld [vmem:[#allocation2 + $0x30] sm:$0xff]  ;;  %480 = vst.msk [vmem:[#allocation2 + $0x69] sm:$0xff] %vm416_vm0, %v391_v28 }
  0x58   : > { %v4085_v12 = vld [vmem:[#allocation2 + $0x31] sm:$0xff]  ;;  %1599 = vrot.lane.b32.xlu2 %v1535_v11, %s5586_s12  ;;  %541 = vst.msk [vmem:[#allocation3 + $0x20] sm:$0xff] %vm416_vm0, %v1535_v11  ;;  %v1729_v22 = vld [vmem:[#allocation2 + $0x39] sm:$0xff] }
  0x59   : > { %1792 = vrot.lane.b32.xlu0 %v4085_v12, %s3830_s13  ;;  %v1921_v13 = vld [vmem:[#allocation2 + $0x32] sm:$0xff]  ;;  %v4104_v23 = vld [vmem:[#allocation2 + $0x3a] sm:$0xff]  ;;  %538 = vst.msk [vmem:[#allocation3 + $0x8] sm:$0xff] %vm416_vm0, %v506_v32 }
  0x5a   : > { %v1536_v14 = vld [vmem:[#allocation2 + $0x38] sm:$0xff]  ;;  %1985 = vrot.lane.b32.xlu1 %v1921_v13, %s5590_s14  ;;  %537 = vst.msk [vmem:[#allocation3] sm:$0xff] %vm416_vm0, %v505_v34 }
  0x5b   : > { %542 = vst.msk [vmem:[#allocation3 + $0x28] sm:$0xff] %vm416_vm0, %v1536_v14  ;;  %v1537_v19 = vld [vmem:[#allocation2 + $0x48] sm:$0xff] }
  0x5c   : > { %543 = vst.msk [vmem:[#allocation3 + $0x30] sm:$0xff] %vm416_vm0, %v1537_v19  ;;  %v4109_v24 = vld [vmem:[#allocation2 + $0x50] sm:$0xff] }
  0x5d   : > { %544 = vst.msk [vmem:[#allocation3 + $0x38] sm:$0xff] %vm416_vm0, %v4109_v24  ;;  %v4118_v25 = vld [vmem:[#allocation2 + $0x49] sm:$0xff]  ;;  %v4134_v29 = vld [vmem:[#allocation2 + $0x60] sm:$0xff]  ;;  %v4142_v30 = vld [vmem:[#allocation2 + $0x51] sm:$0xff] }
  0x5e   : > { %v4124_v26 = vld [vmem:[#allocation2 + $0x4a] sm:$0xff]  ;;  %545 = vst.msk [vmem:[#allocation3 + $0x40] sm:$0xff] %vm416_vm0, %v4134_v29  ;;  %v4144_v31 = vld [vmem:[#allocation2 + $0x52] sm:$0xff]  ;;  %v4168_v38 = vld [vmem:[#allocation2 + $0x61] sm:$0xff] }
  0x5f   : > { %492 = vst.msk [vmem:[#allocation2 + $0xf9] sm:$0xff] %vm416_vm0, %v403_v36  ;;  %v4170_v39 = vld [vmem:[#allocation2 + $0x62] sm:$0xff]  ;;  %v4215_v55 = vld [vmem:[#allocation2 + $0x6a] sm:$0xff] }
  0x60   : > { %635 = vrot.lane.b32.xlu2 %v570_v16, %s5588_s29  ;;  %493 = vst.msk [vmem:[#allocation2 + $0x109] sm:$0xff] %vm416_vm0, %v404_v40  ;;  %v4198_v49 = vld [vmem:[#allocation2 + $0x68] sm:$0xff] }
  0x61   : > { %828 = vrot.lane.b32.xlu0 %v763_v17, %s3825_s30  ;;  %494 = vst.msk [vmem:[#allocation2 + $0x111] sm:$0xff] %vm416_vm0, %v405_v41  ;;  %v4200_v50 = vld [vmem:[#allocation2 + $0x69] sm:$0xff] }
  0x62   : > { %1021 = vrot.lane.b32.xlu1 %v956_v10, %s3826_s22  ;;  %481 = vst.msk [vmem:[#allocation2 + $0x79] sm:$0xff] %vm416_vm0, %v392_v46  ;;  %v397_v41 = vld [vmem:[%s4027_s16 + $0x68] sm:$0xff] }
  0x63   : > { %495 = vst.msk [vmem:[#allocation2 + $0x121] sm:$0xff] %vm416_vm0, %v406_v52 }
  0x64   : > { %496 = vst.msk [vmem:[#allocation2 + $0x129] sm:$0xff] %vm416_vm0, %v407_v53 }
  0x65   : > { %482 = vst.msk [vmem:[#allocation2 + $0x81] sm:$0xff] %vm416_vm0, %v393_v56 }
  0x66   : > { %v590_v60 = vld [vmem:[#allocation2 + $0xf9] sm:$0xff]  ;;  %498 = vst.msk [vmem:[#allocation2 + $0x141] sm:$0xff] %vm416_vm0, %v409_v27 }
  0x67   : > { %v783_v61 = vld [vmem:[#allocation2 + $0xfa] sm:$0xff]  ;;  %486 = vst.msk [vmem:[#allocation2 + $0xb1] sm:$0xff] %vm416_vm0, %v397_v41 }
  0x68   : > { %1214 = vrot.lane.b32.xlu2 %v1149_v20, %s3828_s25  ;;  %v976_v48 = vld [vmem:[#allocation2 + $0x110] sm:$0xff]  ;;  %2534 = vst.msk [vmem:[#allocation5] sm:$0xff] %vm2398_vm12, %v3823_v0 }
  0x69   : > { %1407 = vrot.lane.b32.xlu0 %v1342_v21, %s5592_s24  ;;  %560 = vst.msk [vmem:[#allocation3 + $0xb8] sm:$0xff] %vm416_vm0, %v976_v48  ;;  %v4247_v8 = vld [vmem:[#allocation2 + $0x112] sm:$0xff]  ;;  %v784_v32 = vld [vmem:[#allocation2 + $0x10a] sm:$0xff] }
  0x6a   : > { %1601 = vrot.lane.b32.xlu1 %v1536_v14, %s5586_s12  ;;  %v977_v15 = vld [vmem:[#allocation2 + $0x120] sm:$0xff]  ;;  %2537 = vst.msk [vmem:[#allocation5 + $0x10] sm:$0xff] %vm2398_vm12, %v3823_v0 }
  0x6b   : > { %561 = vst.msk [vmem:[#allocation3 + $0xc0] sm:$0xff] %vm416_vm0, %v977_v15  ;;  %v4327_v46 = vld [vmem:[#allocation2 + $0x122] sm:$0xff] }
  0x6c   : > { %v4313_v40 = vld [vmem:[#allocation2 + $0x80] sm:$0xff]  ;;  %2539 = vst.msk [vmem:[#allocation5 + $0x20] sm:$0xff] %vm2398_vm12, %v3823_v0 }
  0x6d   : > { %2541 = vst.msk [vmem:[#allocation5 + $0x30] sm:$0xff] %vm2398_vm12, %v3823_v0 }
  0x6e   : > { %2543 = vst.msk [vmem:[#allocation5 + $0x40] sm:$0xff] %vm2398_vm12, %v3823_v0 }
  0x6f   : > { %2545 = vst.msk [vmem:[#allocation5 + $0x50] sm:$0xff] %vm2398_vm12, %v3823_v0 }
  0x70   : > { %1794 = vrot.lane.b32.xlu2 %v1729_v22, %s3830_s13  ;;  %2547 = vst.msk [vmem:[#allocation5 + $0x60] sm:$0xff] %vm2398_vm12, %v3823_v0 }
  0x71   : > { %1987 = vrot.lane.b32.xlu0 %v4104_v23, %s5590_s14  ;;  %2549 = vst.msk [vmem:[#allocation5 + $0x70] sm:$0xff] %vm2398_vm12, %v3823_v0 }
  0x72   : > { %637 = vrot.lane.b32.xlu1 %v1148_v7, %s5588_s29  ;;  %v4244_v7 = vld [vmem:[#allocation2 + $0x78] sm:$0xff]  ;;  %2551 = vst.msk [vmem:[#allocation5 + $0x80] sm:$0xff] %vm2398_vm12, %v3823_v0 }
  0x73   : > { %2553 = vst.msk [vmem:[#allocation5 + $0x90] sm:$0xff] %vm2398_vm12, %v3823_v0 }
  0x74   : > { %2536 = vst.msk [vmem:[#allocation5 + $0x8] sm:$0x3] %vm2535_vm13, %v3823_v0 }
  0x75   : > { %2538 = vst.msk [vmem:[#allocation5 + $0x18] sm:$0x3] %vm2535_vm13, %v3823_v0 }
  0x76   : > { %2540 = vst.msk [vmem:[#allocation5 + $0x28] sm:$0x3] %vm2535_vm13, %v3823_v0 }
  0x77   : > { %2542 = vst.msk [vmem:[#allocation5 + $0x38] sm:$0x3] %vm2535_vm13, %v3823_v0 }
  0x78   : > { %830 = vrot.lane.b32.xlu2 %v1341_v6, %s3825_s30  ;;  %v4242_v6 = vld [vmem:[#allocation2 + $0x111] sm:$0xff]  ;;  %2544 = vst.msk [vmem:[#allocation5 + $0x48] sm:$0x3] %vm2535_vm13, %v3823_v0 }
  0x79   : > { %1023 = vrot.lane.b32.xlu0 %v1535_v11, %s3826_s22  ;;  %2546 = vst.msk [vmem:[#allocation5 + $0x58] sm:$0x3] %vm2535_vm13, %v3823_v0 }
  0x7a   : > { %1216 = vrot.lane.b32.xlu1 %v4085_v12, %s3828_s25  ;;  %2548 = vst.msk [vmem:[#allocation5 + $0x68] sm:$0x3] %vm2535_vm13, %v3823_v0 }
  0x7b   : > { %2550 = vst.msk [vmem:[#allocation5 + $0x78] sm:$0x3] %vm2535_vm13, %v3823_v0 }
  0x7c   : > { %2552 = vst.msk [vmem:[#allocation5 + $0x88] sm:$0x3] %vm2535_vm13, %v3823_v0 }
  0x7d   : > { %2554 = vst.msk [vmem:[#allocation5 + $0x98] sm:$0x3] %vm2535_vm13, %v3823_v0  ;;  %vm3151_vm13 = vcmask 319744  }
  0x80   : > { %1409 = vrot.lane.b32.xlu2 %v1921_v13, %s5592_s24 }
  0x81   : > { %1603 = vrot.lane.b32.xlu0 %v1537_v19, %s5586_s12 }
  0x82   : > { %1796 = vrot.lane.b32.xlu1 %v4118_v25, %s3830_s13 }
  0x88   : > { %1989 = vrot.lane.b32.xlu2 %v4124_v26, %s5590_s14 }
  0x89   : > { %639 = vrot.lane.b32.xlu0 %v1149_v20, %s5588_s29  ;;  %v4274_v20 = vld [vmem:[#allocation2 + $0x129] sm:$0xff] }
  0x8a   : > { %832 = vrot.lane.b32.xlu1 %v1342_v21, %s3825_s30  ;;  %v408_v21 = vld [vmem:[%s4027_s16 + $0xc0] sm:$0xff] }
  0x8b   : > { %497 = vst.msk [vmem:[#allocation2 + $0x139] sm:$0xff] %vm416_vm0, %v408_v21 }
  0x90   : > { %1025 = vrot.lane.b32.xlu2 %v1536_v14, %s3826_s22  ;;  %v4262_v14 = vld [vmem:[#allocation2 + $0x7a] sm:$0xff] }
  0x91   : > { %1218 = vrot.lane.b32.xlu0 %v1729_v22, %s3828_s25 }
  0x92   : > { %1411 = vrot.lane.b32.xlu1 %v4104_v23, %s5592_s24  ;;  %v634_v33 = vpop.permute.xlu0 %633 }
  0x93   : > { %730 = vst.msk [vmem:[#allocation3] sm:$0xff] %vm729_vm2, %v634_v33  ;;  %v396_v33 = vld [vmem:[%s4027_s16 + $0x60] sm:$0xff] }
  0x94   : > { %485 = vst.msk [vmem:[#allocation2 + $0xa9] sm:$0xff] %vm416_vm0, %v396_v33 }
  0x98   : > { %1605 = vrot.lane.b32.xlu2 %v4109_v24, %s5586_s12 }
  0x99   : > { %1798 = vrot.lane.b32.xlu0 %v4142_v30, %s3830_s13 }
  0x9a   : > { %1991 = vrot.lane.b32.xlu1 %v4144_v31, %s5590_s14  ;;  %v827_v35 = vpop.permute.xlu0 %826 }
  0x9b   : > { %923 = vst.msk [vmem:[#allocation3] sm:$0xff] %vm922_vm3, %v827_v35 }
  0xa0   : > { %641 = vrot.lane.b32.xlu2 %v4085_v12, %s5588_s29  ;;  %v1406_v37 = vpop.permute.xlu2 %1405  ;;  %v4257_v12 = vld [vmem:[#allocation2 + $0x79] sm:$0xff] }
  0xa1   : > { %834 = vrot.lane.b32.xlu0 %v1921_v13, %s3825_s30  ;;  %v4259_v13 = vld [vmem:[#allocation2 + $0x128] sm:$0xff] }
  0xa2   : > { %1027 = vrot.lane.b32.xlu1 %v1537_v19, %s3826_s22 }
  0xa8   : > { %1220 = vrot.lane.b32.xlu2 %v4118_v25, %s3828_s25 }
  0xa9   : > { %1413 = vrot.lane.b32.xlu0 %v4124_v26, %s5592_s24 }
  0xaa   : > { %1607 = vrot.lane.b32.xlu1 %v4134_v29, %s5586_s12  ;;  %s5613_s12 = smov 8  }
  0xb0   : > { %1800 = vrot.lane.b32.xlu2 %v4168_v38, %s3830_s13 }
  0xb1   : > { %1993 = vrot.lane.b32.xlu0 %v4170_v39, %s5590_s14  ;;  %s5614_s14 = smov 1  }
  0xb2   : > { %643 = vrot.lane.b32.xlu1 %v1729_v22, %s5588_s29  ;;  %v1600_v42 = vpop.permute.xlu2 %1599  ;;  %s5612_s29 = smov 6  }
  0xb7   : > { %v1020_v44 = vpop.permute.xlu1 %1019 }
  0xb8   : > { %836 = vrot.lane.b32.xlu2 %v4104_v23, %s3825_s30  ;;  %1116 = vst.msk [vmem:[#allocation3] sm:$0xff] %vm1115_vm5, %v1020_v44 }
  0xb9   : > { %1029 = vrot.lane.b32.xlu0 %v4109_v24, %s3826_s22 }
  0xba   : > { %1222 = vrot.lane.b32.xlu1 %v4142_v30, %s3828_s25  ;;  %v636_v47 = vpop.permute.xlu2 %635 }
  0xbb   : > { %731 = vst.msk [vmem:[#allocation3 + $0x8] sm:$0xff] %vm729_vm2, %v636_v47  ;;  %v4329_v47 = vld [vmem:[#allocation2 + $0x81] sm:$0xff] }
  0xbf   : > { %v1213_v51 = vpop.permute.xlu1 %1212 }
  0xc0   : > { %1415 = vrot.lane.b32.xlu2 %v4144_v31, %s5592_s24  ;;  %1309 = vst.msk [vmem:[#allocation3] sm:$0xff] %vm1308_vm6, %v1213_v51 }
  0xc1   : > { %1609 = vrot.lane.b32.xlu0 %v4198_v49, %s5612_s29  ;;  %1502 = vst.msk [vmem:[#allocation3] sm:$0xff] %vm1501_vm7, %v1406_v37  ;;  %v4310_v37 = vld [vmem:[#allocation2 + $0x121] sm:$0xff] }
  0xc2   : > { %1802 = vrot.lane.b32.xlu1 %v4200_v50, %s3830_s13  ;;  %v1215_v54 = vpop.permute.xlu2 %1214  ;;  %1696 = vst.msk [vmem:[#allocation3] sm:$0xff] %vm1695_vm8, %v1600_v42  ;;  %v402_v42 = vld [vmem:[%s4027_s16 + $0x90] sm:$0xff] }
  0xc3   : > { %491 = vst.msk [vmem:[#allocation2 + $0xf1] sm:$0xff] %vm416_vm0, %v402_v42  ;;  %v4474_v42 = vld [vmem:[%s5576_s2] ss:$0 sm:$0xff] }
  0xc8   : > { %1995 = vrot.lane.b32.xlu2 %v4215_v55, %s5613_s12 }
  0xc9   : > { %645 = vrot.lane.b32.xlu0 %v4118_v25, %s5614_s14  ;;  %v4287_v25 = vld [vmem:[#allocation2 + $0x12a] sm:$0xff] }
  0xca   : > { %838 = vrot.lane.b32.xlu1 %v4124_v26, %s3825_s30  ;;  %v1795_v57 = vpop.permute.xlu2 %1794  ;;  %v591_v26 = vld [vmem:[#allocation2 + $0x109] sm:$0xff]  ;;  %v4338_v51 = vld [vmem:[#allocation2 + $0xf8] sm:$0xff] }
  0xcb   : > { %v1793_v58 = vpop.permute.xlu0 %1792  ;;  %558 = vst.msk [vmem:[#allocation3 + $0xa8] sm:$0xff] %vm416_vm0, %v4338_v51 }
  0xcc   : > { %1889 = vst.msk [vmem:[#allocation3] sm:$0xff] %vm1888_vm9, %v1793_v58  ;;  %v1986_v59 = vpop.permute.xlu1 %1985  ;;  %v4351_v58 = vld [vmem:[#allocation2 + $0x139] sm:$0xff] }
  0xcd   : > { %2082 = vst.msk [vmem:[#allocation3] sm:$0xff] %vm2081_vm10, %v1986_v59 }
  0xd0   : > { %675 = vrot.lane.b32.xlu2 %v590_v60, %s5614_s14  ;;  %v394_v60 = vld [vmem:[%s4027_s16 + $0x50] sm:$0xff] }
  0xd1   : > { %1031 = vrot.lane.b32.xlu0 %v4134_v29, %s3826_s22  ;;  %483 = vst.msk [vmem:[#allocation2 + $0x91] sm:$0xff] %vm416_vm0, %v394_v60 }
  0xd2   : > { %868 = vrot.lane.b32.xlu1 %v783_v61, %s3825_s30  ;;  %v831_v62 = vpop.permute.xlu2 %830 }
  0xd3   : > { %v829_v63 = vpop.permute.xlu0 %828 }
  0xd4   : > { %924 = vst.msk [vmem:[#allocation3 + $0x8] sm:$0xff] %vm922_vm3, %v829_v63  ;;  %v1022_v1 = vpop.permute.xlu1 %1021  ;;  %v2114_v2 = vld [vmem:[#allocation3] sm:$0xff] }
  0xd5   : > { %1117 = vst.msk [vmem:[#allocation3 + $0x8] sm:$0xff] %vm1115_vm5, %v1022_v1  ;;  %3526 = vmatmul.msk.f32.vlgmr.msra.gmra.mxu0 %vm2152_vm11, %v2114_v2  ;;  %v4364_v1 = vld [vmem:[#allocation2 + $0x13a] sm:$0xff] }
  0xd6   : > { %1310 = vst.msk [vmem:[#allocation3 + $0x8] sm:$0xff] %vm1308_vm6, %v1215_v54  ;;  %v399_v2 = vld [vmem:[%s4027_s16 + $0x78] sm:$0xff] }
  0xd7   : > { %488 = vst.msk [vmem:[#allocation2 + $0xc9] sm:$0xff] %vm416_vm0, %v399_v2  ;;  %v4506_v2 = vld [vmem:[#allocation2 + $0xb1] sm:$0xff] }
  0xd8   : > { %1224 = vrot.lane.b32.xlu2 %v4168_v38, %s3828_s25 }
  0xd9   : > { %1061 = vrot.lane.b32.xlu0 %v976_v48, %s3826_s22  ;;  %v4331_v48 = vld [vmem:[#allocation2 + $0x138] sm:$0xff] }
  0xda   : > { %1417 = vrot.lane.b32.xlu1 %v4170_v39, %s5592_s24  ;;  %v1410_v3 = vpop.permute.xlu2 %1409 }
  0xdb   : > { %v1408_v4 = vpop.permute.xlu0 %1407 }
  0xdc   : > { %1503 = vst.msk [vmem:[#allocation3 + $0x8] sm:$0xff] %vm1501_vm7, %v1408_v4  ;;  %v1602_v5 = vpop.permute.xlu1 %1601 }
  0xdd   : > { %1697 = vst.msk [vmem:[#allocation3 + $0x8] sm:$0xff] %vm1695_vm8, %v1602_v5 }
  0xde   : > { %1890 = vst.msk [vmem:[#allocation3 + $0x8] sm:$0xff] %vm1888_vm9, %v1795_v57  ;;  %v4348_v57 = vld [vmem:[#allocation2 + $0x82] sm:$0xff] }
  0xe0   : > { %1254 = vrot.lane.b32.xlu2 %v4242_v6, %s3828_s25 }
  0xe1   : > { %1611 = vrot.lane.b32.xlu0 %v4244_v7, %s5612_s29 }
  0xe2   : > { %1447 = vrot.lane.b32.xlu1 %v4247_v8, %s5592_s24  ;;  %v1990_v9 = vpop.permute.xlu2 %1989 }
  0xe3   : > { %v1988_v10 = vpop.permute.xlu0 %1987 }
  0xe4   : > { %2083 = vst.msk [vmem:[#allocation3 + $0x8] sm:$0xff] %vm2081_vm10, %v1988_v10  ;;  %v638_v11 = vpop.permute.xlu1 %637  ;;  %v395_v10 = vld [vmem:[%s4027_s16 + $0x58] sm:$0xff] }
  0xe5   : > { %732 = vst.msk [vmem:[#allocation3 + $0x10] sm:$0xff] %vm729_vm2, %v638_v11 }
  0xe6   : > { %925 = vst.msk [vmem:[#allocation3 + $0x10] sm:$0xff] %vm922_vm3, %v831_v62 }
  0xe7   : > { %484 = vst.msk [vmem:[#allocation2 + $0x99] sm:$0xff] %vm416_vm0, %v395_v10  ;;  %v410_v10 = vld [vmem:[%s4027_s16 + $0xd0] sm:$0xff] }
  0xe8   : > { %1804 = vrot.lane.b32.xlu2 %v4257_v12, %s3830_s13  ;;  %499 = vst.msk [vmem:[#allocation2 + $0x151] sm:$0xff] %vm416_vm0, %v410_v10 }
  0xe9   : > { %1641 = vrot.lane.b32.xlu0 %v4259_v13, %s5612_s29 }
  0xea   : > { %1997 = vrot.lane.b32.xlu1 %v4262_v14, %s5613_s12  ;;  %v1026_v16 = vpop.permute.xlu2 %1025 }
  0xeb   : > { %v1024_v17 = vpop.permute.xlu0 %1023  ;;  %v2115_v18 = vld [vmem:[#allocation3 + $0x8] sm:$0xff] }
  0xec   : > { %1118 = vst.msk [vmem:[#allocation3 + $0x10] sm:$0xff] %vm1115_vm5, %v1024_v17  ;;  %3527 = vmatmul.msk.f32.gmra.mxu0 %vm2152_vm11, %v2115_v18  ;;  %v1217_v19 = vpop.permute.xlu1 %1216 }
  0xed   : > { %1311 = vst.msk [vmem:[#allocation3 + $0x10] sm:$0xff] %vm1308_vm6, %v1217_v19 }
  0xee   : > { %1504 = vst.msk [vmem:[#allocation3 + $0x10] sm:$0xff] %vm1501_vm7, %v1410_v3  ;;  %v4468_v41 = vld [vmem:[#allocation2 + $0x92] sm:$0xff] }
  0xf0   : > { %647 = vrot.lane.b32.xlu2 %v4142_v30, %s5614_s14 }
  0xf1   : > { %1834 = vrot.lane.b32.xlu0 %v4274_v20, %s3830_s13 }
  0xf2   : > { %840 = vrot.lane.b32.xlu1 %v4144_v31, %s3825_s30  ;;  %v1606_v22 = vpop.permute.xlu2 %1605 }
  0xf3   : > { %v1604_v23 = vpop.permute.xlu0 %1603 }
  0xf4   : > { %1698 = vst.msk [vmem:[#allocation3 + $0x10] sm:$0xff] %vm1695_vm8, %v1604_v23  ;;  %v1797_v24 = vpop.permute.xlu1 %1796  ;;  %v4425_v23 = vld [vmem:[#allocation2 + $0x90] sm:$0xff] }
  0xf5   : > { %1891 = vst.msk [vmem:[#allocation3 + $0x10] sm:$0xff] %vm1888_vm9, %v1797_v24 }
  0xf6   : > { %2084 = vst.msk [vmem:[#allocation3 + $0x10] sm:$0xff] %vm2081_vm10, %v1990_v9  ;;  %v4380_v9 = vld [vmem:[#allocation2 + $0xaa] sm:$0xff] }
  0xf8   : > { %2027 = vrot.lane.b32.xlu2 %v4287_v25, %s5613_s12 }
  0xf9   : > { %677 = vrot.lane.b32.xlu0 %v591_v26, %s5614_s14  ;;  %v401_v26 = vld [vmem:[%s4027_s16 + $0x88] sm:$0xff] }
  0xfa   : > { %1033 = vrot.lane.b32.xlu1 %v4198_v49, %s3826_s22  ;;  %v642_v28 = vpop.permute.xlu2 %641  ;;  %v398_v49 = vld [vmem:[%s4027_s16 + $0x70] sm:$0xff]  ;;  %490 = vst.msk [vmem:[#allocation2 + $0xe1] sm:$0xff] %vm416_vm0, %v401_v26 }
  0xfb   : > { %v640_v29 = vpop.permute.xlu0 %639  ;;  %734 = vst.msk [vmem:[#allocation3 + $0x20] sm:$0xff] %vm729_vm2, %v642_v28 }
  0xfc   : > { %v833_v30 = vpop.permute.xlu1 %832  ;;  %733 = vst.msk [vmem:[#allocation3 + $0x18] sm:$0xff] %vm729_vm2, %v640_v29 }
  0xfd   : > { %v2116_v31 = vld [vmem:[#allocation3 + $0x10] sm:$0xff]  ;;  %926 = vst.msk [vmem:[#allocation3 + $0x18] sm:$0xff] %vm922_vm3, %v833_v30  ;;  %v4450_v30 = vld [vmem:[#allocation2 + $0x91] sm:$0xff] }
  0xfe   : > { %3528 = vmatmul.msk.f32.gmra.mxu0 %vm2152_vm11, %v2116_v31  ;;  %1119 = vst.msk [vmem:[#allocation3 + $0x18] sm:$0xff] %vm1115_vm5, %v1026_v16 }
  0xff   : > { %487 = vst.msk [vmem:[#allocation2 + $0xc1] sm:$0xff] %vm416_vm0, %v398_v49 }
 0x100   : > { %870 = vrot.lane.b32.xlu2 %v784_v32, %s3825_s30 }
 0x101   : > { %1226 = vrot.lane.b32.xlu0 %v4200_v50, %s3828_s25 }
 0x102   : > { %1063 = vrot.lane.b32.xlu1 %v977_v15, %s3826_s22  ;;  %v1221_v34 = vpop.permute.xlu2 %1220 }
 0x103   : > { %v1219_v35 = vpop.permute.xlu0 %1218 }
 0x104   : > { %1312 = vst.msk [vmem:[#allocation3 + $0x18] sm:$0xff] %vm1308_vm6, %v1219_v35  ;;  %v1412_v36 = vpop.permute.xlu1 %1411  ;;  %v4463_v35 = vld [vmem:[#allocation2 + $0x108] sm:$0xff] }
 0x105   : > { %1505 = vst.msk [vmem:[#allocation3 + $0x18] sm:$0xff] %vm1501_vm7, %v1412_v36  ;;  %v4466_v36 = vld [vmem:[#allocation2 + $0x140] sm:$0xff] }
 0x106   : > { %1699 = vst.msk [vmem:[#allocation3 + $0x18] sm:$0xff] %vm1695_vm8, %v1606_v22  ;;  %v969_v59 = vld [vmem:[#allocation2 + $0xc0] sm:$0xff] }
 0x107   : > { %553 = vst.msk [vmem:[#allocation3 + $0x80] sm:$0xff] %vm416_vm0, %v969_v59  ;;  %v4405_v19 = vld [vmem:[#allocation2 + $0xc1] sm:$0xff] }
 0x108   : > { %1419 = vrot.lane.b32.xlu2 %v4215_v55, %s5592_s24  ;;  %v4430_v24 = vld [vmem:[#allocation2 + $0xc2] sm:$0xff]  ;;  %559 = vst.msk [vmem:[#allocation3 + $0xb0] sm:$0xff] %vm416_vm0, %v4463_v35 }
 0x109   : > { %1256 = vrot.lane.b32.xlu0 %v4310_v37, %s3828_s25 }
 0x10a   : > { %1613 = vrot.lane.b32.xlu1 %v4313_v40, %s5612_s29  ;;  %v1801_v43 = vpop.permute.xlu2 %1800 }
 0x10b   : > { %v1799_v44 = vpop.permute.xlu0 %1798 }
 0x10c   : > { %1892 = vst.msk [vmem:[#allocation3 + $0x18] sm:$0xff] %vm1888_vm9, %v1799_v44  ;;  %v1992_v45 = vpop.permute.xlu1 %1991 }
 0x10d   : > { %2085 = vst.msk [vmem:[#allocation3 + $0x18] sm:$0xff] %vm2081_vm10, %v1992_v45 }
 0x110   : > { %1449 = vrot.lane.b32.xlu2 %v4327_v46, %s5592_s24 }
 0x111   : > { %1806 = vrot.lane.b32.xlu0 %v4329_v47, %s3830_s13 }
 0x112   : > { %1643 = vrot.lane.b32.xlu1 %v4331_v48, %s5612_s29  ;;  %v837_v52 = vpop.permute.xlu2 %836 }
 0x113   : > { %v835_v53 = vpop.permute.xlu0 %834 }
 0x114   : > { %927 = vst.msk [vmem:[#allocation3 + $0x20] sm:$0xff] %vm922_vm3, %v835_v53  ;;  %v1028_v54 = vpop.permute.xlu1 %1027  ;;  %v2117_v56 = vld [vmem:[#allocation3 + $0x18] sm:$0xff] }
 0x115   : > { %1120 = vst.msk [vmem:[#allocation3 + $0x20] sm:$0xff] %vm1115_vm5, %v1028_v54  ;;  %3529 = vmatmul.msk.f32.gmra.mxu0 %vm2152_vm11, %v2117_v56  ;;  %v4489_v56 = vld [vmem:[#allocation2 + $0x141] sm:$0xff] }
 0x116   : > { %1313 = vst.msk [vmem:[#allocation3 + $0x20] sm:$0xff] %vm1308_vm6, %v1221_v34 }
 0x118   : > { %1999 = vrot.lane.b32.xlu2 %v4348_v57, %s5613_s12 }
 0x119   : > { %649 = vrot.lane.b32.xlu0 %v4168_v38, %s5614_s14  ;;  %v4367_v38 = vld [vmem:[#allocation2 + $0xa9] sm:$0xff] }
 0x11a   : > { %1836 = vrot.lane.b32.xlu1 %v4351_v58, %s3830_s13  ;;  %v1416_v61 = vpop.permute.xlu2 %1415 }
 0x11b   : > { %v1414_v62 = vpop.permute.xlu0 %1413 }
 0x11c   : > { %1506 = vst.msk [vmem:[#allocation3 + $0x20] sm:$0xff] %vm1501_vm7, %v1414_v62  ;;  %v1608_v63 = vpop.permute.xlu1 %1607 }
 0x11d   : > { %1700 = vst.msk [vmem:[#allocation3 + $0x20] sm:$0xff] %vm1695_vm8, %v1608_v63  ;;  %v4504_v63 = vld [vmem:[#allocation2 + $0x142] sm:$0xff] }
 0x11e   : > { %1893 = vst.msk [vmem:[#allocation3 + $0x20] sm:$0xff] %vm1888_vm9, %v1801_v43 }
 0x120   : > { %842 = vrot.lane.b32.xlu2 %v4170_v39, %s3825_s30  ;;  %v400_v39 = vld [vmem:[%s4027_s16 + $0x80] sm:$0xff] }
 0x121   : > { %2029 = vrot.lane.b32.xlu0 %v4364_v1, %s5613_s12  ;;  %489 = vst.msk [vmem:[#allocation2 + $0xd9] sm:$0xff] %vm416_vm0, %v400_v39  ;;  %v4518_v39 = vld [vmem:[#allocation2 + $0xb2] sm:$0xff] }
 0x122   : > { %661 = vrot.lane.b32.xlu1 %v4367_v38, %s5614_s14  ;;  %v1996_v3 = vpop.permute.xlu2 %1995 }
 0x123   : > { %v1994_v4 = vpop.permute.xlu0 %1993 }
 0x124   : > { %2086 = vst.msk [vmem:[#allocation3 + $0x20] sm:$0xff] %vm2081_vm10, %v1994_v4  ;;  %v644_v5 = vpop.permute.xlu1 %643 }
 0x125   : > { %735 = vst.msk [vmem:[#allocation3 + $0x28] sm:$0xff] %vm729_vm2, %v644_v5 }
 0x126   : > { %928 = vst.msk [vmem:[#allocation3 + $0x28] sm:$0xff] %vm922_vm3, %v837_v52 }
 0x128   : > { %679 = vrot.lane.b32.xlu2 %v4242_v6, %s5614_s14  ;;  %v4453_v31 = vld [vmem:[#allocation2 + $0xd8] sm:$0xff] }
 0x129   : > { %1035 = vrot.lane.b32.xlu0 %v4244_v7, %s3826_s22  ;;  %v4487_v54 = vld [vmem:[#allocation2 + $0xd9] sm:$0xff] }
 0x12a   : > { %854 = vrot.lane.b32.xlu1 %v4380_v9, %s3825_s30  ;;  %v676_v11 = vpop.permute.xlu2 %675  ;;  %v4502_v62 = vld [vmem:[#allocation2 + $0xda] sm:$0xff] }
 0x12b   : > { %v1030_v15 = vpop.permute.xlu0 %1029  ;;  %v2118_v16 = vld [vmem:[#allocation3 + $0x20] sm:$0xff]  ;;  %751 = vst.msk [vmem:[#allocation3 + $0xa8] sm:$0xff] %vm729_vm2, %v676_v11 }
 0x12c   : > { %3530 = vmatmul.msk.f32.gmra.mxu0 %vm2152_vm11, %v2118_v16  ;;  %v1223_v17 = vpop.permute.xlu1 %1222  ;;  %1121 = vst.msk [vmem:[#allocation3 + $0x28] sm:$0xff] %vm1115_vm5, %v1030_v15 }
 0x12d   : > { %1314 = vst.msk [vmem:[#allocation3 + $0x28] sm:$0xff] %vm1308_vm6, %v1223_v17 }
 0x12e   : > { %1507 = vst.msk [vmem:[#allocation3 + $0x28] sm:$0xff] %vm1501_vm7, %v1416_v61 }
 0x130   : > { %872 = vrot.lane.b32.xlu2 %v4247_v8, %s3825_s30 }
 0x131   : > { %1228 = vrot.lane.b32.xlu0 %v4257_v12, %s3828_s25 }
 0x132   : > { %1047 = vrot.lane.b32.xlu1 %v969_v59, %s3826_s22  ;;  %v1225_v6 = vpop.permute.xlu2 %1224  ;;  %v970_v59 = vld [vmem:[#allocation2 + $0xc8] sm:$0xff] }
 0x133   : > { %v1610_v7 = vpop.permute.xlu0 %1609  ;;  %554 = vst.msk [vmem:[#allocation3 + $0x88] sm:$0xff] %vm416_vm0, %v970_v59 }
 0x134   : > { %1701 = vst.msk [vmem:[#allocation3 + $0x28] sm:$0xff] %vm1695_vm8, %v1610_v7  ;;  %v1803_v18 = vpop.permute.xlu1 %1802 }
 0x135   : > { %1894 = vst.msk [vmem:[#allocation3 + $0x28] sm:$0xff] %vm1888_vm9, %v1803_v18 }
 0x136   : > { %2087 = vst.msk [vmem:[#allocation3 + $0x28] sm:$0xff] %vm2081_vm10, %v1996_v3 }
 0x138   : > { %1065 = vrot.lane.b32.xlu2 %v4259_v13, %s3826_s22 }
 0x139   : > { %1421 = vrot.lane.b32.xlu0 %v4262_v14, %s5592_s24 }
 0x13a   : > { %1240 = vrot.lane.b32.xlu1 %v4405_v19, %s3828_s25  ;;  %v1255_v8 = vpop.permute.xlu2 %1254 }
 0x13b   : > { %v646_v21 = vpop.permute.xlu0 %645 }
 0x13c   : > { %736 = vst.msk [vmem:[#allocation3 + $0x30] sm:$0xff] %vm729_vm2, %v646_v21  ;;  %v839_v13 = vpop.permute.xlu1 %838  ;;  %v4542_v21 = vld [vmem:[#allocation2 + $0xc9] sm:$0xff] }
 0x13d   : > { %929 = vst.msk [vmem:[#allocation3 + $0x30] sm:$0xff] %vm922_vm3, %v839_v13  ;;  %v2119_v22 = vld [vmem:[#allocation3 + $0x28] sm:$0xff] }
 0x13e   : > { %3531 = vmatmul.msk.f32.gmra.mxu0 %vm2152_vm11, %v2119_v22 }
 0x140   : > { %1258 = vrot.lane.b32.xlu2 %v4274_v20, %s3828_s25 }
 0x141   : > { %1615 = vrot.lane.b32.xlu0 %v4425_v23, %s5612_s29 }
 0x142   : > { %1433 = vrot.lane.b32.xlu1 %v4430_v24, %s5592_s24  ;;  %v1805_v27 = vpop.permute.xlu2 %1804 }
 0x143   : > { %v1032_v28 = vpop.permute.xlu0 %1031 }
 0x144   : > { %1122 = vst.msk [vmem:[#allocation3 + $0x30] sm:$0xff] %vm1115_vm5, %v1032_v28  ;;  %v869_v29 = vpop.permute.xlu1 %868  ;;  %v411_v28 = vld [vmem:[%s4027_s16 + $0xd8] sm:$0xff] }
 0x145   : > { %1315 = vst.msk [vmem:[#allocation3 + $0x30] sm:$0xff] %vm1308_vm6, %v1225_v6 }
 0x146   : > { %944 = vst.msk [vmem:[#allocation3 + $0xa8] sm:$0xff] %vm922_vm3, %v869_v29  ;;  %v4558_v29 = vld [vmem:[#allocation2 + $0x98] sm:$0xff] }
 0x147   : > { %500 = vst.msk [vmem:[#allocation2 + $0x159] sm:$0xff] %vm416_vm0, %v411_v28 }
 0x148   : > { %1451 = vrot.lane.b32.xlu2 %v4287_v25, %s5592_s24  ;;  %s5615_s24 = smov 5  }
 0x149   : > { %1808 = vrot.lane.b32.xlu0 %v4450_v30, %s3830_s13 }
 0x14a   : > { %1627 = vrot.lane.b32.xlu1 %v4453_v31, %s5612_s29  ;;  %v648_v32 = vpop.permute.xlu2 %647 }
 0x14b   : > { %v1062_v33 = vpop.permute.xlu0 %1061  ;;  %737 = vst.msk [vmem:[#allocation3 + $0x38] sm:$0xff] %vm729_vm2, %v648_v32 }
 0x14c   : > { %v1418_v34 = vpop.permute.xlu1 %1417  ;;  %1137 = vst.msk [vmem:[#allocation3 + $0xa8] sm:$0xff] %vm1115_vm5, %v1062_v33  ;;  %v4561_v33 = vld [vmem:[#allocation2 + $0xca] sm:$0xff] }
 0x14d   : > { %1330 = vst.msk [vmem:[#allocation3 + $0xa8] sm:$0xff] %vm1308_vm6, %v1255_v8 }
 0x14e   : > { %1508 = vst.msk [vmem:[#allocation3 + $0x30] sm:$0xff] %vm1501_vm7, %v1418_v34 }
 0x150   : > { %1645 = vrot.lane.b32.xlu2 %v4466_v36, %s5612_s29 }
 0x151   : > { %2001 = vrot.lane.b32.xlu0 %v4468_v41, %s5613_s12 }
 0x152   : > { %v2270_v43 = vpop.f32.mrf.mxu0  ;;  %651 = vrot.lane.b32.xlu1 %v4200_v50, %s5614_s14  ;;  %v2028_v44 = vpop.permute.xlu2 %2027 }
 0x153   : > { %v1612_v45 = vpop.permute.xlu0 %1611  ;;  %v2271_v49 = vadd.f32 %v4474_v42, %v2270_v43 }
 0x154   : > { %1702 = vst.msk [vmem:[#allocation3 + $0x30] sm:$0xff] %vm1695_vm8, %v1612_v45  ;;  %v1448_v52 = vpop.permute.xlu1 %1447  ;;  %v4574_v45 = vld [vmem:[#allocation2 + $0x99] sm:$0xff] }
 0x155   : > { %1895 = vst.msk [vmem:[#allocation3 + $0x30] sm:$0xff] %vm1888_vm9, %v1805_v27  ;;  %v2366_v53 = vmax.f32 %v2271_v49, 0.0  ;;  %v4577_v49 = vld [vmem:[#allocation2 + $0xe0] sm:$0xff] }
 0x156   : > { %1523 = vst.msk [vmem:[#allocation3 + $0xa8] sm:$0xff] %vm1501_vm7, %v1448_v52 }
 0x157   : > { %2399 = vst.msk [vmem:[#allocation4] sm:$0xff] %vm2398_vm12, %v2366_v53 }
 0x158   : > { %1820 = vrot.lane.b32.xlu2 %v4487_v54, %s3830_s13 }
 0x159   : > { %1838 = vrot.lane.b32.xlu0 %v4489_v56, %s3830_s13 }
 0x15a   : > { %844 = vrot.lane.b32.xlu1 %v4215_v55, %s3825_s30  ;;  %v871_v50 = vpop.permute.xlu2 %870 }
 0x15b   : > { %v1642_v60 = vpop.permute.xlu0 %1641 }
 0x15c   : > { %1717 = vst.msk [vmem:[#allocation3 + $0xa8] sm:$0xff] %vm1695_vm8, %v1642_v60  ;;  %v1998_v61 = vpop.permute.xlu1 %1997  ;;  %v4593_v60 = vld [vmem:[#allocation2 + $0x150] sm:$0xff] }
 0x15d   : > { %2088 = vst.msk [vmem:[#allocation3 + $0x30] sm:$0xff] %vm2081_vm10, %v1998_v61  ;;  %v4595_v61 = vld [vmem:[#allocation2 + $0x9a] sm:$0xff] }
 0x160   : > { %2013 = vrot.lane.b32.xlu2 %v4502_v62, %s5613_s12 }
 0x161   : > { %2031 = vrot.lane.b32.xlu0 %v4504_v63, %s5613_s12 }
 0x162   : > { %663 = vrot.lane.b32.xlu1 %v4506_v2, %s5614_s14  ;;  %v1420_v55 = vpop.permute.xlu2 %1419 }
 0x163   : > { %v1835_v3 = vpop.permute.xlu0 %1834 }
 0x164   : > { %1910 = vst.msk [vmem:[#allocation3 + $0xa8] sm:$0xff] %vm1888_vm9, %v1835_v3  ;;  %v841_v4 = vpop.permute.xlu1 %840  ;;  %v2120_v5 = vld [vmem:[#allocation3 + $0x30] sm:$0xff] }
 0x165   : > { %2103 = vst.msk [vmem:[#allocation3 + $0xa8] sm:$0xff] %vm2081_vm10, %v2028_v44  ;;  %3532 = vmatmul.msk.f32.gmra.mxu0 %vm2152_vm11, %v2120_v5 }
 0x166   : > { %930 = vst.msk [vmem:[#allocation3 + $0x38] sm:$0xff] %vm922_vm3, %v841_v4 }
 0x168   : > { %681 = vrot.lane.b32.xlu2 %v4310_v37, %s5614_s14 }
 0x169   : > { %1037 = vrot.lane.b32.xlu0 %v4313_v40, %s3826_s22  ;;  %v2273_v11 = vpop.f32.mrf.mxu0 }
 0x16a   : > { %v2274_v15 = vadd.f32 %v4474_v42, %v2273_v11  ;;  %856 = vrot.lane.b32.xlu1 %v4518_v39, %s3825_s30  ;;  %v1450_v16 = vpop.permute.xlu2 %1449 }
 0x16b   : > { %v678_v17 = vpop.permute.xlu0 %677 }
 0x16c   : > { %v2367_v6 = vmax.f32 %v2274_v15, 0.0  ;;  %752 = vst.msk [vmem:[#allocation3 + $0xb0] sm:$0xff] %vm729_vm2, %v678_v17  ;;  %v1034_v7 = vpop.permute.xlu1 %1033  ;;  %v2135_v18 = vld [vmem:[#allocation3 + $0xa8] sm:$0xff]  ;;  %v4615_v15 = vld [vmem:[#allocation2 + $0xe1] sm:$0xff] }
 0x16d   : > { %945 = vst.msk [vmem:[#allocation3 + $0xb0] sm:$0xff] %vm922_vm3, %v871_v50  ;;  %3547 = vmatmul.msk.f32.vlgmr.msra.gmra.mxu3 %vm2152_vm11, %v2135_v18 }
 0x16e   : > { %2400 = vst.msk [vmem:[#allocation4 + $0x8] sm:$0xff] %vm2398_vm12, %v2367_v6 }
 0x16f   : > { %1123 = vst.msk [vmem:[#allocation3 + $0x38] sm:$0xff] %vm1115_vm5, %v1034_v7 }
 0x170   : > { %874 = vrot.lane.b32.xlu2 %v4327_v46, %s3825_s30  ;;  %v4550_v46 = vld [vmem:[#allocation2 + $0xa8] sm:$0xff] }
 0x171   : > { %1230 = vrot.lane.b32.xlu0 %v4329_v47, %s3828_s25  ;;  %551 = vst.msk [vmem:[#allocation3 + $0x70] sm:$0xff] %vm416_vm0, %v4550_v46 }
 0x172   : > { %1049 = vrot.lane.b32.xlu1 %v970_v59, %s3826_s22  ;;  %v2000_v37 = vpop.permute.xlu2 %1999 }
 0x173   : > { %v1227_v40 = vpop.permute.xlu0 %1226 }
 0x174   : > { %1316 = vst.msk [vmem:[#allocation3 + $0x38] sm:$0xff] %vm1308_vm6, %v1227_v40  ;;  %v1064_v8 = vpop.permute.xlu1 %1063  ;;  %v4638_v40 = vld [vmem:[#allocation2 + $0xe2] sm:$0xff] }
 0x175   : > { %1509 = vst.msk [vmem:[#allocation3 + $0x38] sm:$0xff] %vm1501_vm7, %v1420_v55  ;;  %v2463_v17 = vld [vmem:[#allocation4 + $0x1] ss:$2 sm:$0xff] }
 0x176   : > { %1138 = vst.msk [vmem:[#allocation3 + $0xb0] sm:$0xff] %vm1115_vm5, %v1064_v8 }
 0x178   : > { %1067 = vrot.lane.b32.xlu2 %v4331_v48, %s3826_s22 }
 0x179   : > { %1423 = vrot.lane.b32.xlu0 %v4348_v57, %s5615_s24 }
 0x17a   : > { %1242 = vrot.lane.b32.xlu1 %v4542_v21, %s3828_s25  ;;  %v843_v13 = vpop.permute.xlu2 %842 }
 0x17b   : > { %v1257_v22 = vpop.permute.xlu0 %1256  ;;  %v2276_v26 = vpop.f32.mrf.mxu0 }
 0x17c   : > { %1331 = vst.msk [vmem:[#allocation3 + $0xb0] sm:$0xff] %vm1308_vm6, %v1257_v22  ;;  %v1614_v27 = vpop.permute.xlu1 %1613  ;;  %v2277_v48 = vadd.f32 %v4474_v42, %v2276_v26  ;;  %v4640_v22 = vld [vmem:[#allocation2 + $0x152] sm:$0xff] }
 0x17d   : > { %1524 = vst.msk [vmem:[#allocation3 + $0xb0] sm:$0xff] %vm1501_vm7, %v1450_v16  ;;  %v2431_v16 = vld [vmem:[#allocation4] ss:$2 sm:$0xff] }
 0x17e   : > { %1703 = vst.msk [vmem:[#allocation3 + $0x38] sm:$0xff] %vm1695_vm8, %v1614_v27  ;;  %v2368_v32 = vmax.f32 %v2277_v48, 0.0 }
 0x180   : > { %1260 = vrot.lane.b32.xlu2 %v4351_v58, %s3828_s25  ;;  %2401 = vst.msk [vmem:[#allocation4 + $0x10] sm:$0xff] %vm2398_vm12, %v2368_v32 }
 0x181   : > { %1617 = vrot.lane.b32.xlu0 %v4558_v29, %s5612_s29 }
 0x182   : > { %1435 = vrot.lane.b32.xlu1 %v4561_v33, %s5615_s24  ;;  %v680_v34 = vpop.permute.xlu2 %679 }
 0x183   : > { %v1807_v43 = vpop.permute.xlu0 %1806  ;;  %753 = vst.msk [vmem:[#allocation3 + $0xb8] sm:$0xff] %vm729_vm2, %v680_v34 }
 0x184   : > { %v1644_v44 = vpop.permute.xlu1 %1643  ;;  %1896 = vst.msk [vmem:[#allocation3 + $0x38] sm:$0xff] %vm1888_vm9, %v1807_v43 }
 0x185   : > { %2089 = vst.msk [vmem:[#allocation3 + $0x38] sm:$0xff] %vm2081_vm10, %v2000_v37 }
 0x186   : > { %1718 = vst.msk [vmem:[#allocation3 + $0xb0] sm:$0xff] %vm1695_vm8, %v1644_v44  ;;  %v514_v44 = vld [vmem:[#allocation2 + $0x68] sm:$0xff] }
 0x187   : > { %546 = vst.msk [vmem:[#allocation3 + $0x48] sm:$0xff] %vm416_vm0, %v514_v44 }
 0x188   : > { %1453 = vrot.lane.b32.xlu2 %v4364_v1, %s5615_s24 }
 0x189   : > { %1810 = vrot.lane.b32.xlu0 %v4574_v45, %s3830_s13 }
 0x18a   : > { %1629 = vrot.lane.b32.xlu1 %v4577_v49, %s5612_s29  ;;  %v873_v52 = vpop.permute.xlu2 %872 }
 0x18b   : > { %v650_v53 = vpop.permute.xlu0 %649  ;;  %946 = vst.msk [vmem:[#allocation3 + $0xb8] sm:$0xff] %vm922_vm3, %v873_v52 }
 0x18c   : > { %v1837_v59 = vpop.permute.xlu1 %1836  ;;  %738 = vst.msk [vmem:[#allocation3 + $0x40] sm:$0xff] %vm729_vm2, %v650_v53  ;;  %v2121_v50 = vld [vmem:[#allocation3 + $0x38] sm:$0xff] }
 0x18d   : > { %931 = vst.msk [vmem:[#allocation3 + $0x40] sm:$0xff] %vm922_vm3, %v843_v13  ;;  %3533 = vmatmul.msk.f32.gmra.mxu0 %vm2152_vm11, %v2121_v50 }
 0x18e   : > { %1911 = vst.msk [vmem:[#allocation3 + $0xb0] sm:$0xff] %vm1888_vm9, %v1837_v59 }
 0x190   : > { %1647 = vrot.lane.b32.xlu2 %v4593_v60, %s5612_s29 }
 0x191   : > { %2003 = vrot.lane.b32.xlu0 %v4595_v61, %s5613_s12 }
 0x192   : > { %653 = vrot.lane.b32.xlu1 %v4257_v12, %s5614_s14  ;;  %v2279_v55 = vpop.f32.mrf.mxu0  ;;  %v1066_v3 = vpop.permute.xlu2 %1065  ;;  %v4617_v12 = vld [vmem:[#allocation2 + $0x151] sm:$0xff] }
 0x193   : > { %v2030_v4 = vpop.permute.xlu0 %2029  ;;  %v2280_v5 = vadd.f32 %v4474_v42, %v2279_v55  ;;  %1139 = vst.msk [vmem:[#allocation3 + $0xb8] sm:$0xff] %vm1115_vm5, %v1066_v3 }
 0x194   : > { %v662_v10 = vpop.permute.xlu1 %661  ;;  %2104 = vst.msk [vmem:[#allocation3 + $0xb0] sm:$0xff] %vm2081_vm10, %v2030_v4 }
 0x195   : > { %v2369_v11 = vmax.f32 %v2280_v5, 0.0  ;;  %744 = vst.msk [vmem:[#allocation3 + $0x70] sm:$0xff] %vm729_vm2, %v662_v10 }
 0x197   : > { %2402 = vst.msk [vmem:[#allocation4 + $0x18] sm:$0xff] %vm2398_vm12, %v2369_v11 }
 0x198   : > { %1822 = vrot.lane.b32.xlu2 %v4615_v15, %s3830_s13 }
 0x199   : > { %1840 = vrot.lane.b32.xlu0 %v4617_v12, %s3830_s13 }
 0x19a   : > { %846 = vrot.lane.b32.xlu1 %v4262_v14, %s3825_s30  ;;  %v1259_v6 = vpop.permute.xlu2 %1258  ;;  %v2494_v14 = vmax.f32 %v2431_v16, %v2463_v17 }
 0x19b   : > { %v1036_v7 = vpop.permute.xlu0 %1035  ;;  %1332 = vst.msk [vmem:[#allocation3 + $0xb8] sm:$0xff] %vm1308_vm6, %v1259_v6  ;;  %v2136_v18 = vld [vmem:[#allocation3 + $0xb0] sm:$0xff] }
 0x19c   : > { %v855_v37 = vpop.permute.xlu1 %854  ;;  %1124 = vst.msk [vmem:[#allocation3 + $0x40] sm:$0xff] %vm1115_vm5, %v1036_v7  ;;  %3548 = vmatmul.msk.f32.gmra.mxu3 %vm2152_vm11, %v2136_v18  ;;  %v2510_v27 = vsel %vm2398_vm12, %v2494_v14, -inf  ;;  %v4704_v7 = vld [vmem:[#allocation2 + $0xf0] sm:$0xff] }
 0x19d   : > { %937 = vst.msk [vmem:[#allocation3 + $0x70] sm:$0xff] %vm922_vm3, %v855_v37 }
 0x19e   : > { %v2433_v8 = vld [vmem:[#allocation4 + $0x10] ss:$2 sm:$0xff]  ;;  %v2465_v13 = vld [vmem:[#allocation4 + $0x11] ss:$2 sm:$0xff] }
 0x19f   : > { %v2495_v26 = vmax.f32 %v2433_v8, %v2465_v13  ;;  %v4716_v13 = vld [vmem:[#allocation2 + $0x158] sm:$0xff] }
 0x1a0   : > { %2015 = vrot.lane.b32.xlu2 %v4638_v40, %s5613_s12 }
 0x1a1   : > { %v2511_v0 = vsel %vm2398_vm12, %v2495_v26, -inf  ;;  %2033 = vrot.lane.b32.xlu0 %v4640_v22, %s5613_s12 }
 0x1a2   : > { %665 = vrot.lane.b32.xlu1 %v4405_v19, %s5614_s14  ;;  %v2512_v28 = vmax.f32 %v2510_v27, %v2511_v0  ;;  %v1452_v48 = vpop.permute.xlu2 %1451  ;;  %v4727_v27 = vld [vmem:[#allocation2 + $0xf1] sm:$0xff] }
 0x1a3   : > { %v1229_v32 = vpop.permute.xlu0 %1228  ;;  %1525 = vst.msk [vmem:[#allocation3 + $0xb8] sm:$0xff] %vm1501_vm7, %v1452_v48 }
 0x1a4   : > { %v1048_v34 = vpop.permute.xlu1 %1047  ;;  %1317 = vst.msk [vmem:[#allocation3 + $0x40] sm:$0xff] %vm1308_vm6, %v1229_v32 }
 0x1a5   : > { %1130 = vst.msk [vmem:[#allocation3 + $0x70] sm:$0xff] %vm1115_vm5, %v1048_v34  ;;  %v4741_v34 = vld [vmem:[#allocation2 + $0xf2] sm:$0xff] }
 0x1a6   : > { %2556 = vst.msk [vmem:[#allocation5 + $0x11] sm:$0xff] %vm2398_vm12, %v2512_v28  ;;  %v4729_v28 = vld [vmem:[#allocation2 + $0x159] sm:$0xff] }
 0x1a8   : > { %683 = vrot.lane.b32.xlu2 %v4274_v20, %s5614_s14 }
 0x1a9   : > { %1039 = vrot.lane.b32.xlu0 %v4425_v23, %s3826_s22  ;;  %v2282_v43 = vpop.f32.mrf.mxu0 }
 0x1aa   : > { %v2283_v19 = vadd.f32 %v4474_v42, %v2282_v43  ;;  %858 = vrot.lane.b32.xlu1 %v4430_v24, %s3825_s30  ;;  %v1646_v52 = vpop.permute.xlu2 %1645  ;;  %v4743_v43 = vld [vmem:[#allocation2 + $0x15a] sm:$0xff] }
 0x1ab   : > { %v1422_v53 = vpop.permute.xlu0 %1421  ;;  %1719 = vst.msk [vmem:[#allocation3 + $0xb8] sm:$0xff] %vm1695_vm8, %v1646_v52 }
 0x1ac   : > { %v2370_v59 = vmax.f32 %v2283_v19, 0.0  ;;  %v1241_v50 = vpop.permute.xlu1 %1240  ;;  %1510 = vst.msk [vmem:[#allocation3 + $0x40] sm:$0xff] %vm1501_vm7, %v1422_v53 }
 0x1ad   : > { %v4666_v20 = vld [vmem:[#allocation5 + $0x10] sm:$0xff]  ;;  %1323 = vst.msk [vmem:[#allocation3 + $0x70] sm:$0xff] %vm1308_vm6, %v1241_v50 }
 0x1ae   : > { %2403 = vst.msk [vmem:[#allocation4 + $0x20] sm:$0xff] %vm2398_vm12, %v2370_v59 }
 0x1af   : > { %2573 = vst.msk [vmem:[#allocation6 + $0x8] sm:$0xff] %vm2398_vm12, %v4666_v20 }
 0x1b0   : > { %876 = vrot.lane.b32.xlu2 %v4287_v25, %s3825_s30  ;;  %v4685_v25 = vld [vmem:[#allocation2 + $0xb0] sm:$0xff] }
 0x1b1   : > { %1232 = vrot.lane.b32.xlu0 %v4450_v30, %s3828_s25  ;;  %552 = vst.msk [vmem:[#allocation3 + $0x78] sm:$0xff] %vm416_vm0, %v4685_v25 }
 0x1b2   : > { %1051 = vrot.lane.b32.xlu1 %v4453_v31, %s3826_s22  ;;  %v1821_v23 = vpop.permute.xlu2 %1820 }
 0x1b3   : > { %v1616_v24 = vpop.permute.xlu0 %1615 }
 0x1b4   : > { %1704 = vst.msk [vmem:[#allocation3 + $0x40] sm:$0xff] %vm1695_vm8, %v1616_v24  ;;  %v1434_v55 = vpop.permute.xlu1 %1433 }
 0x1b5   : > { %1516 = vst.msk [vmem:[#allocation3 + $0x70] sm:$0xff] %vm1501_vm7, %v1434_v55 }
 0x1b8   : > { %1069 = vrot.lane.b32.xlu2 %v4466_v36, %s3826_s22 }
 0x1b9   : > { %1425 = vrot.lane.b32.xlu0 %v4468_v41, %s5615_s24 }
 0x1ba   : > { %1244 = vrot.lane.b32.xlu1 %v4487_v54, %s3828_s25  ;;  %v2014_v3 = vpop.permute.xlu2 %2013 }
 0x1bb   : > { %v1809_v31 = vpop.permute.xlu0 %1808  ;;  %v2285_v4 = vpop.f32.mrf.mxu0 }
 0x1bc   : > { %1897 = vst.msk [vmem:[#allocation3 + $0x40] sm:$0xff] %vm1888_vm9, %v1809_v31  ;;  %v1628_v5 = vpop.permute.xlu1 %1627  ;;  %v2286_v10 = vadd.f32 %v4474_v42, %v2285_v4 }
 0x1bd   : > { %1710 = vst.msk [vmem:[#allocation3 + $0x70] sm:$0xff] %vm1695_vm8, %v1628_v5 }
 0x1be   : > { %1903 = vst.msk [vmem:[#allocation3 + $0x70] sm:$0xff] %vm1888_vm9, %v1821_v23  ;;  %v2371_v36 = vmax.f32 %v2286_v10, 0.0  ;;  %v412_v23 = vld [vmem:[%s4027_s16 + $0xe0] sm:$0xff] }
 0x1bf   : > { %2096 = vst.msk [vmem:[#allocation3 + $0x70] sm:$0xff] %vm2081_vm10, %v2014_v3 }
 0x1c0   : > { %1262 = vrot.lane.b32.xlu2 %v4489_v56, %s3828_s25  ;;  %2404 = vst.msk [vmem:[#allocation4 + $0x28] sm:$0xff] %vm2398_vm12, %v2371_v36 }
 0x1c1   : > { %1619 = vrot.lane.b32.xlu0 %v4550_v46, %s5612_s29  ;;  %501 = vst.msk [vmem:[#allocation2 + $0x169] sm:$0xff] %vm416_vm0, %v412_v23 }
 0x1c2   : > { %1437 = vrot.lane.b32.xlu1 %v4502_v62, %s5615_s24  ;;  %v682_v11 = vpop.permute.xlu2 %681 }
 0x1c3   : > { %v2002_v16 = vpop.permute.xlu0 %2001  ;;  %754 = vst.msk [vmem:[#allocation3 + $0xc0] sm:$0xff] %vm729_vm2, %v682_v11 }
 0x1c4   : > { %v652_v17 = vpop.permute.xlu1 %651  ;;  %2090 = vst.msk [vmem:[#allocation3 + $0x40] sm:$0xff] %vm2081_vm10, %v2002_v16 }
 0x1c5   : > { %739 = vst.msk [vmem:[#allocation3 + $0x48] sm:$0xff] %vm729_vm2, %v652_v17 }
 0x1c6   : > { %v2128_v6 = vld [vmem:[#allocation3 + $0x70] sm:$0xff] }
 0x1c7   : > { %3540 = vmatmul.msk.f32.vlgmr.msra.gmra.mxu2 %vm2152_vm11, %v2128_v6 }
 0x1c8   : > { %1455 = vrot.lane.b32.xlu2 %v4504_v63, %s5615_s24 }
 0x1c9   : > { %1812 = vrot.lane.b32.xlu0 %v4367_v38, %s3830_s13 }
 0x1ca   : > { %1631 = vrot.lane.b32.xlu1 %v4704_v7, %s5612_s29  ;;  %v875_v18 = vpop.permute.xlu2 %874 }
 0x1cb   : > { %v1839_v37 = vpop.permute.xlu0 %1838  ;;  %947 = vst.msk [vmem:[#allocation3 + $0xc0] sm:$0xff] %vm922_vm3, %v875_v18  ;;  %v2122_v14 = vld [vmem:[#allocation3 + $0x40] sm:$0xff] }
 0x1cc   : > { %v845_v8 = vpop.permute.xlu1 %844  ;;  %1912 = vst.msk [vmem:[#allocation3 + $0xb8] sm:$0xff] %vm1888_vm9, %v1839_v37  ;;  %3534 = vmatmul.msk.f32.gmra.mxu0 %vm2152_vm11, %v2122_v14 }
 0x1cd   : > { %932 = vst.msk [vmem:[#allocation3 + $0x48] sm:$0xff] %vm922_vm3, %v845_v8 }
 0x1d0   : > { %1649 = vrot.lane.b32.xlu2 %v4716_v13, %s5612_s29 }
 0x1d1   : > { %2005 = vrot.lane.b32.xlu0 %v4380_v9, %s5613_s12 }
 0x1d2   : > { %655 = vrot.lane.b32.xlu1 %v4329_v47, %s5614_s14  ;;  %v1068_v38 = vpop.permute.xlu2 %1067 }
 0x1d3   : > { %v2032_v26 = vpop.permute.xlu0 %2031  ;;  %1140 = vst.msk [vmem:[#allocation3 + $0xc0] sm:$0xff] %vm1115_vm5, %v1068_v38 }
 0x1d4   : > { %v664_v0 = vpop.permute.xlu1 %663  ;;  %2105 = vst.msk [vmem:[#allocation3 + $0xb8] sm:$0xff] %vm2081_vm10, %v2032_v26 }
 0x1d5   : > { %745 = vst.msk [vmem:[#allocation3 + $0x78] sm:$0xff] %vm729_vm2, %v664_v0  ;;  %v4812_v0 = vld [vmem:[#allocation2 + $0x168] sm:$0xff] }
 0x1d8   : > { %1824 = vrot.lane.b32.xlu2 %v4727_v27, %s3830_s13 }
 0x1d9   : > { %1842 = vrot.lane.b32.xlu0 %v4729_v28, %s3830_s13 }
 0x1da   : > { %848 = vrot.lane.b32.xlu1 %v4348_v57, %s3825_s30  ;;  %v1261_v47 = vpop.permute.xlu2 %1260  ;;  %v530_v57 = vld [vmem:[#allocation2 + $0x128] sm:$0xff] }
 0x1db   : > { %v1038_v9 = vpop.permute.xlu0 %1037  ;;  %1333 = vst.msk [vmem:[#allocation3 + $0xc0] sm:$0xff] %vm1308_vm6, %v1261_v47  ;;  %v2137_v48 = vld [vmem:[#allocation3 + $0xb8] sm:$0xff] }
 0x1dc   : > { %v857_v32 = vpop.permute.xlu1 %856  ;;  %1125 = vst.msk [vmem:[#allocation3 + $0x48] sm:$0xff] %vm1115_vm5, %v1038_v9  ;;  %3549 = vmatmul.msk.f32.gmra.mxu3 %vm2152_vm11, %v2137_v48 }
 0x1dd   : > { %938 = vst.msk [vmem:[#allocation3 + $0x78] sm:$0xff] %vm922_vm3, %v857_v32 }
 0x1de   : > { %562 = vst.msk [vmem:[#allocation3 + $0xc8] sm:$0xff] %vm416_vm0, %v530_v57  ;;  %v4824_v57 = vld [vmem:[#allocation2 + $0xf9] sm:$0xff] }
 0x1e0   : > { %2017 = vrot.lane.b32.xlu2 %v4741_v34, %s5613_s12 }
 0x1e1   : > { %2035 = vrot.lane.b32.xlu0 %v4743_v43, %s5613_s12 }
 0x1e2   : > { %667 = vrot.lane.b32.xlu1 %v4542_v21, %s5614_s14  ;;  %v2288_v19 = vpop.f32.mrf.mxu0  ;;  %v1454_v44 = vpop.permute.xlu2 %1453  ;;  %v515_v21 = vld [vmem:[#allocation2 + $0x78] sm:$0xff] }
 0x1e3   : > { %v1231_v52 = vpop.permute.xlu0 %1230  ;;  %v2289_v53 = vadd.f32 %v4474_v42, %v2288_v19  ;;  %1526 = vst.msk [vmem:[#allocation3 + $0xc0] sm:$0xff] %vm1501_vm7, %v1454_v44  ;;  %v4826_v19 = vld [vmem:[#allocation2 + $0x169] sm:$0xff] }
 0x1e4   : > { %v1050_v59 = vpop.permute.xlu1 %1049  ;;  %1318 = vst.msk [vmem:[#allocation3 + $0x48] sm:$0xff] %vm1308_vm6, %v1231_v52 }
 0x1e5   : > { %v2372_v50 = vmax.f32 %v2289_v53, 0.0  ;;  %1131 = vst.msk [vmem:[#allocation3 + $0x78] sm:$0xff] %vm1115_vm5, %v1050_v59 }
 0x1e6   : > { %547 = vst.msk [vmem:[#allocation3 + $0x50] sm:$0xff] %vm416_vm0, %v515_v21 }
 0x1e7   : > { %2405 = vst.msk [vmem:[#allocation4 + $0x30] sm:$0xff] %vm2398_vm12, %v2372_v50 }
 0x1e8   : > { %685 = vrot.lane.b32.xlu2 %v4351_v58, %s5614_s14 }
 0x1e9   : > { %1041 = vrot.lane.b32.xlu0 %v4558_v29, %s3826_s22 }
 0x1ea   : > { %860 = vrot.lane.b32.xlu1 %v4561_v33, %s3825_s30  ;;  %v1648_v24 = vpop.permute.xlu2 %1647 }
 0x1eb   : > { %v1424_v55 = vpop.permute.xlu0 %1423  ;;  %1720 = vst.msk [vmem:[#allocation3 + $0xc0] sm:$0xff] %vm1695_vm8, %v1648_v24 }
 0x1ec   : > { %v1243_v3 = vpop.permute.xlu1 %1242  ;;  %1511 = vst.msk [vmem:[#allocation3 + $0x48] sm:$0xff] %vm1501_vm7, %v1424_v55  ;;  %v4840_v55 = vld [vmem:[#allocation2 + $0xfa] sm:$0xff] }
 0x1ed   : > { %1324 = vst.msk [vmem:[#allocation3 + $0x78] sm:$0xff] %vm1308_vm6, %v1243_v3 }
 0x1f0   : > { %v2333_v58 = vpop.f32.mrf.mxu3  ;;  %878 = vrot.lane.b32.xlu2 %v4364_v1, %s3825_s30  ;;  %v413_v1 = vld [vmem:[%s4027_s16 + $0xe8] sm:$0xff] }
 0x1f1   : > { %1234 = vrot.lane.b32.xlu0 %v4574_v45, %s3828_s25  ;;  %v2334_v29 = vadd.f32 %v4474_v42, %v2333_v58  ;;  %502 = vst.msk [vmem:[#allocation2 + $0x171] sm:$0xff] %vm416_vm0, %v413_v1 }
 0x1f2   : > { %1053 = vrot.lane.b32.xlu1 %v4577_v49, %s3826_s22  ;;  %v1823_v33 = vpop.permute.xlu2 %1822 }
 0x1f3   : > { %v1618_v31 = vpop.permute.xlu0 %1617  ;;  %v2387_v4 = vmax.f32 %v2334_v29, 0.0  ;;  %v531_v29 = vld [vmem:[#allocation2 + $0x138] sm:$0xff] }
 0x1f4   : > { %1705 = vst.msk [vmem:[#allocation3 + $0x48] sm:$0xff] %vm1695_vm8, %v1618_v31  ;;  %v1436_v5 = vpop.permute.xlu1 %1435 }
 0x1f5   : > { %2420 = vst.msk [vmem:[#allocation4 + $0xa8] sm:$0xff] %vm2398_vm12, %v2387_v4 }
 0x1f6   : > { %1517 = vst.msk [vmem:[#allocation3 + $0x78] sm:$0xff] %vm1501_vm7, %v1436_v5 }
 0x1f7   : > { %563 = vst.msk [vmem:[#allocation3 + $0xd0] sm:$0xff] %vm416_vm0, %v531_v29 }
 0x1f8   : > { %1071 = vrot.lane.b32.xlu2 %v4593_v60, %s3826_s22  ;;  %v4842_v3 = vld [vmem:[#allocation2 + $0x16a] sm:$0xff] }
 0x1f9   : > { %1427 = vrot.lane.b32.xlu0 %v4595_v61, %s5615_s24 }
 0x1fa   : > { %1246 = vrot.lane.b32.xlu1 %v4615_v15, %s3828_s25  ;;  %v2016_v49 = vpop.permute.xlu2 %2015 }
 0x1fb   : > { %v1811_v10 = vpop.permute.xlu0 %1810 }
 0x1fc   : > { %1898 = vst.msk [vmem:[#allocation3 + $0x48] sm:$0xff] %vm1888_vm9, %v1811_v10  ;;  %v1630_v36 = vpop.permute.xlu1 %1629 }
 0x1fd   : > { %1711 = vst.msk [vmem:[#allocation3 + $0x78] sm:$0xff] %vm1695_vm8, %v1630_v36 }
 0x1fe   : > { %1904 = vst.msk [vmem:[#allocation3 + $0x78] sm:$0xff] %vm1888_vm9, %v1823_v33 }
 0x1ff   : > { %2097 = vst.msk [vmem:[#allocation3 + $0x78] sm:$0xff] %vm2081_vm10, %v2016_v49 }
 0x200   : > { %1264 = vrot.lane.b32.xlu2 %v4617_v12, %s3828_s25 }
 0x201   : > { %1621 = vrot.lane.b32.xlu0 %v4685_v25, %s5612_s29 }
 0x202   : > { %1439 = vrot.lane.b32.xlu1 %v4638_v40, %s5615_s24  ;;  %v684_v60 = vpop.permute.xlu2 %683 }
 0x203   : > { %v2004_v11 = vpop.permute.xlu0 %2003  ;;  %755 = vst.msk [vmem:[#allocation3 + $0xc8] sm:$0xff] %vm729_vm2, %v684_v60  ;;  %v1160_v60 = vld [vmem:[#allocation2 + $0xa9] sm:$0xff] }
 0x204   : > { %v654_v16 = vpop.permute.xlu1 %653  ;;  %2091 = vst.msk [vmem:[#allocation3 + $0x48] sm:$0xff] %vm2081_vm10, %v2004_v11 }
 0x205   : > { %740 = vst.msk [vmem:[#allocation3 + $0x50] sm:$0xff] %vm729_vm2, %v654_v16  ;;  %v1353_v16 = vld [vmem:[#allocation2 + $0xaa] sm:$0xff] }
 0x206   : > { %v2129_v17 = vld [vmem:[#allocation3 + $0x78] sm:$0xff] }
 0x207   : > { %3541 = vmatmul.msk.f32.gmra.mxu2 %vm2152_vm11, %v2129_v17 }
 0x208   : > { %1457 = vrot.lane.b32.xlu2 %v4640_v22, %s5615_s24 }
 0x209   : > { %1814 = vrot.lane.b32.xlu0 %v4506_v2, %s3830_s13  ;;  %v2467_v2 = vld [vmem:[#allocation4 + $0x21] ss:$2 sm:$0xff] }
 0x20a   : > { %1633 = vrot.lane.b32.xlu1 %v4338_v51, %s5612_s29  ;;  %v877_v6 = vpop.permute.xlu2 %876  ;;  %v2291_v18 = vpop.f32.mrf.mxu0  ;;  %v2435_v51 = vld [vmem:[#allocation4 + $0x20] ss:$2 sm:$0xff] }
 0x20b   : > { %948 = vst.msk [vmem:[#allocation3 + $0xc8] sm:$0xff] %vm922_vm3, %v877_v6  ;;  %v2292_v37 = vadd.f32 %v4474_v42, %v2291_v18  ;;  %v1841_v14 = vpop.permute.xlu0 %1840  ;;  %v2123_v8 = vld [vmem:[#allocation3 + $0x48] sm:$0xff]  ;;  %v2496_v32 = vmax.f32 %v2435_v51, %v2467_v2 }
 0x20c   : > { %v847_v38 = vpop.permute.xlu1 %846  ;;  %1913 = vst.msk [vmem:[#allocation3 + $0xc0] sm:$0xff] %vm1888_vm9, %v1841_v14  ;;  %3535 = vmatmul.msk.f32.gmra.mxu0 %vm2152_vm11, %v2123_v8  ;;  %v1740_v14 = vld [vmem:[#allocation2 + $0xc1] sm:$0xff] }
 0x20d   : > { %v2373_v26 = vmax.f32 %v2292_v37, 0.0  ;;  %933 = vst.msk [vmem:[#allocation3 + $0x50] sm:$0xff] %vm922_vm3, %v847_v38 }
 0x20f   : > { %2406 = vst.msk [vmem:[#allocation4 + $0x38] sm:$0xff] %vm2398_vm12, %v2373_v26 }
 0x210   : > { %1651 = vrot.lane.b32.xlu2 %v4812_v0, %s5612_s29 }
 0x211   : > { %2007 = vrot.lane.b32.xlu0 %v4518_v39, %s5613_s12 }
 0x212   : > { %657 = vrot.lane.b32.xlu1 %v4450_v30, %s5614_s14  ;;  %v1070_v47 = vpop.permute.xlu2 %1069  ;;  %v2513_v30 = vsel %vm2398_vm12, %v2496_v32, -inf }
 0x213   : > { %1141 = vst.msk [vmem:[#allocation3 + $0xc8] sm:$0xff] %vm1115_vm5, %v1070_v47  ;;  %v2034_v9 = vpop.permute.xlu0 %2033 }
 0x214   : > { %v666_v48 = vpop.permute.xlu1 %665  ;;  %2106 = vst.msk [vmem:[#allocation3 + $0xc0] sm:$0xff] %vm2081_vm10, %v2034_v9 }
 0x215   : > { %746 = vst.msk [vmem:[#allocation3 + $0x80] sm:$0xff] %vm729_vm2, %v666_v48 }
 0x216   : > { %v2437_v39 = vld [vmem:[#allocation4 + $0x30] ss:$2 sm:$0xff]  ;;  %v2469_v44 = vld [vmem:[#allocation4 + $0x31] ss:$2 sm:$0xff] }
 0x217   : > { %v2497_v52 = vmax.f32 %v2437_v39, %v2469_v44 }
 0x218   : > { %1826 = vrot.lane.b32.xlu2 %v4824_v57, %s3830_s13 }
 0x219   : > { %1844 = vrot.lane.b32.xlu0 %v4826_v19, %s3830_s13  ;;  %v2514_v53 = vsel %vm2398_vm12, %v2497_v52, -inf  ;;  %v1933_v52 = vld [vmem:[#allocation2 + $0xc2] sm:$0xff] }
 0x21a   : > { %850 = vrot.lane.b32.xlu1 %v4468_v41, %s3825_s30  ;;  %v2515_v59 = vmax.f32 %v2513_v30, %v2514_v53  ;;  %v1263_v50 = vpop.permute.xlu2 %1262 }
 0x21b   : > { %1334 = vst.msk [vmem:[#allocation3 + $0xc8] sm:$0xff] %vm1308_vm6, %v1263_v50  ;;  %v1040_v23 = vpop.permute.xlu0 %1039  ;;  %v2138_v21 = vld [vmem:[#allocation3 + $0xc0] sm:$0xff] }
 0x21c   : > { %v859_v24 = vpop.permute.xlu1 %858  ;;  %1126 = vst.msk [vmem:[#allocation3 + $0x50] sm:$0xff] %vm1115_vm5, %v1040_v23  ;;  %3550 = vmatmul.msk.f32.gmra.mxu3 %vm2152_vm11, %v2138_v21  ;;  %v4923_v50 = vld [vmem:[#allocation2 + $0x171] sm:$0xff] }
 0x21d   : > { %939 = vst.msk [vmem:[#allocation3 + $0x80] sm:$0xff] %vm922_vm3, %v859_v24 }
 0x21e   : > { %2557 = vst.msk [vmem:[#allocation5 + $0x21] sm:$0xff] %vm2398_vm12, %v2515_v59  ;;  %v4921_v59 = vld [vmem:[#allocation2 + $0x109] sm:$0xff] }
 0x21f   : > { %v2336_v41 = vpop.f32.mrf.mxu3 }
 0x220   : > { %2019 = vrot.lane.b32.xlu2 %v4840_v55, %s5613_s12  ;;  %v2337_v58 = vadd.f32 %v4474_v42, %v2336_v41  ;;  %v4935_v41 = vld [vmem:[#allocation2 + $0x10a] sm:$0xff] }
 0x221   : > { %2037 = vrot.lane.b32.xlu0 %v4842_v3, %s5613_s12 }
 0x222   : > { %669 = vrot.lane.b32.xlu1 %v4487_v54, %s5614_s14  ;;  %v2388_v33 = vmax.f32 %v2337_v58, 0.0  ;;  %v1456_v31 = vpop.permute.xlu2 %1455  ;;  %v516_v54 = vld [vmem:[#allocation2 + $0x80] sm:$0xff]  ;;  %v4937_v58 = vld [vmem:[#allocation2 + $0x172] sm:$0xff] }
 0x223   : > { %1527 = vst.msk [vmem:[#allocation3 + $0xc8] sm:$0xff] %vm1501_vm7, %v1456_v31  ;;  %v1233_v4 = vpop.permute.xlu0 %1232 }
 0x224   : > { %v1052_v5 = vpop.permute.xlu1 %1051  ;;  %2421 = vst.msk [vmem:[#allocation4 + $0xb0] sm:$0xff] %vm2398_vm12, %v2388_v33  ;;  %v532_v33 = vld [vmem:[#allocation2 + $0x140] sm:$0xff] }
 0x225   : > { %1319 = vst.msk [vmem:[#allocation3 + $0x50] sm:$0xff] %vm1308_vm6, %v1233_v4  ;;  %v4857_v1 = vld [vmem:[#allocation5 + $0x20] sm:$0xff] }
 0x226   : > { %1132 = vst.msk [vmem:[#allocation3 + $0x80] sm:$0xff] %vm1115_vm5, %v1052_v5 }
 0x227   : > { %2574 = vst.msk [vmem:[#allocation6 + $0x10] sm:$0xff] %vm2398_vm12, %v4857_v1 }
 0x228   : > { %687 = vrot.lane.b32.xlu2 %v4489_v56, %s5614_s14  ;;  %548 = vst.msk [vmem:[#allocation3 + $0x58] sm:$0xff] %vm416_vm0, %v516_v54  ;;  %v4872_v56 = vld [vmem:[#allocation2 + $0x170] sm:$0xff] }
 0x229   : > { %1043 = vrot.lane.b32.xlu0 %v4550_v46, %s3826_s22  ;;  %568 = vst.msk [vmem:[#allocation3 + $0xf8] sm:$0xff] %vm416_vm0, %v4872_v56 }
 0x22a   : > { %862 = vrot.lane.b32.xlu1 %v4502_v62, %s3825_s30  ;;  %v1650_v49 = vpop.permute.xlu2 %1649  ;;  %564 = vst.msk [vmem:[#allocation3 + $0xd8] sm:$0xff] %vm416_vm0, %v532_v33 }
 0x22b   : > { %1721 = vst.msk [vmem:[#allocation3 + $0xc8] sm:$0xff] %vm1695_vm8, %v1650_v49  ;;  %v1426_v10 = vpop.permute.xlu0 %1425 }
 0x22c   : > { %v1245_v36 = vpop.permute.xlu1 %1244  ;;  %1512 = vst.msk [vmem:[#allocation3 + $0x50] sm:$0xff] %vm1501_vm7, %v1426_v10 }
 0x22d   : > { %1325 = vst.msk [vmem:[#allocation3 + $0x80] sm:$0xff] %vm1308_vm6, %v1245_v36 }
 0x230   : > { %880 = vrot.lane.b32.xlu2 %v4504_v63, %s3825_s30 }
 0x231   : > { %1236 = vrot.lane.b32.xlu0 %v1160_v60, %s3828_s25 }
 0x232   : > { %1055 = vrot.lane.b32.xlu1 %v4704_v7, %s3826_s22  ;;  %v1825_v62 = vpop.permute.xlu2 %1824  ;;  %v1547_v7 = vld [vmem:[#allocation2 + $0xc0] sm:$0xff] }
 0x233   : > { %v1620_v46 = vpop.permute.xlu0 %1619 }
 0x234   : > { %v1438_v11 = vpop.permute.xlu1 %1437  ;;  %1706 = vst.msk [vmem:[#allocation3 + $0x50] sm:$0xff] %vm1695_vm8, %v1620_v46  ;;  %v1354_v46 = vld [vmem:[#allocation2 + $0xb2] sm:$0xff] }
 0x235   : > { %1518 = vst.msk [vmem:[#allocation3 + $0x80] sm:$0xff] %vm1501_vm7, %v1438_v11  ;;  %v415_v11 = vld [vmem:[%s4027_s16 + $0xf8] sm:$0xff] }
 0x236   : > { %504 = vst.msk [vmem:[#allocation2 + $0x189] sm:$0xff] %vm416_vm0, %v415_v11 }
 0x238   : > { %1073 = vrot.lane.b32.xlu2 %v4716_v13, %s3826_s22 }
 0x239   : > { %1429 = vrot.lane.b32.xlu0 %v1353_v16, %s5615_s24 }
 0x23a   : > { %1248 = vrot.lane.b32.xlu1 %v4727_v27, %s3828_s25  ;;  %v2018_v63 = vpop.permute.xlu2 %2017 }
 0x23b   : > { %v1813_v17 = vpop.permute.xlu0 %1812 }
 0x23c   : > { %v1632_v6 = vpop.permute.xlu1 %1631  ;;  %1899 = vst.msk [vmem:[#allocation3 + $0x50] sm:$0xff] %vm1888_vm9, %v1813_v17 }
 0x23d   : > { %1712 = vst.msk [vmem:[#allocation3 + $0x80] sm:$0xff] %vm1695_vm8, %v1632_v6  ;;  %v1548_v6 = vld [vmem:[#allocation2 + $0xc8] sm:$0xff] }
 0x23e   : > { %1905 = vst.msk [vmem:[#allocation3 + $0x80] sm:$0xff] %vm1888_vm9, %v1825_v62  ;;  %v5068_v11 = vld [vmem:[#allocation2 + $0x189] sm:$0xff] }
 0x23f   : > { %2098 = vst.msk [vmem:[#allocation3 + $0x80] sm:$0xff] %vm2081_vm10, %v2018_v63 }
 0x240   : > { %1266 = vrot.lane.b32.xlu2 %v4729_v28, %s3828_s25 }
 0x241   : > { %1623 = vrot.lane.b32.xlu0 %v1547_v7, %s5612_s29 }
 0x242   : > { %1441 = vrot.lane.b32.xlu1 %v4741_v34, %s5615_s24  ;;  %v686_v13 = vpop.permute.xlu2 %685 }
 0x243   : > { %756 = vst.msk [vmem:[#allocation3 + $0xd0] sm:$0xff] %vm729_vm2, %v686_v13  ;;  %v2006_v18 = vpop.permute.xlu0 %2005  ;;  %v1741_v13 = vld [vmem:[#allocation2 + $0xc9] sm:$0xff] }
 0x244   : > { %v656_v37 = vpop.permute.xlu1 %655  ;;  %2092 = vst.msk [vmem:[#allocation3 + $0x50] sm:$0xff] %vm2081_vm10, %v2006_v18 }
 0x245   : > { %741 = vst.msk [vmem:[#allocation3 + $0x58] sm:$0xff] %vm729_vm2, %v656_v37  ;;  %v1554_v37 = vld [vmem:[#allocation2 + $0x110] sm:$0xff] }
 0x246   : > { %v2130_v8 = vld [vmem:[#allocation3 + $0x80] sm:$0xff] }
 0x247   : > { %3542 = vmatmul.msk.f32.gmra.mxu2 %vm2152_vm11, %v2130_v8 }
 0x248   : > { %1459 = vrot.lane.b32.xlu2 %v4743_v43, %s5615_s24 }
 0x249   : > { %1816 = vrot.lane.b32.xlu0 %v1740_v14, %s3830_s13  ;;  %v2294_v38 = vpop.f32.mrf.mxu0 }
 0x24a   : > { %1635 = vrot.lane.b32.xlu1 %v4463_v35, %s5612_s29  ;;  %v2312_v26 = vpop.f32.mrf.mxu2  ;;  %v879_v51 = vpop.permute.xlu2 %878  ;;  %v2295_v2 = vadd.f32 %v4474_v42, %v2294_v38  ;;  %v4998_v38 = vld [vmem:[%s5576_s2] ss:$0 sm:$0xff] }
 0x24b   : > { %v2313_v47 = vadd.f32 %v4474_v42, %v2312_v26  ;;  %949 = vst.msk [vmem:[#allocation3 + $0xd0] sm:$0xff] %vm922_vm3, %v879_v51  ;;  %v1843_v9 = vpop.permute.xlu0 %1842  ;;  %v2124_v48 = vld [vmem:[#allocation3 + $0x50] sm:$0xff] }
 0x24c   : > { %v849_v32 = vpop.permute.xlu1 %848  ;;  %v2374_v39 = vmax.f32 %v2295_v2, 0.0  ;;  %1914 = vst.msk [vmem:[#allocation3 + $0xc8] sm:$0xff] %vm1888_vm9, %v1843_v9  ;;  %3536 = vmatmul.msk.f32.gmra.mxu0 %vm2152_vm11, %v2124_v48 }
 0x24d   : > { %v2380_v44 = vmax.f32 %v2313_v47, 0.0  ;;  %934 = vst.msk [vmem:[#allocation3 + $0x58] sm:$0xff] %vm922_vm3, %v849_v32 }
 0x24e   : > { %2407 = vst.msk [vmem:[#allocation4 + $0x40] sm:$0xff] %vm2398_vm12, %v2374_v39 }
 0x24f   : > { %2413 = vst.msk [vmem:[#allocation4 + $0x70] sm:$0xff] %vm2398_vm12, %v2380_v44  ;;  %v1934_v44 = vld [vmem:[#allocation2 + $0xca] sm:$0xff] }
 0x250   : > { %1653 = vrot.lane.b32.xlu2 %v4872_v56, %s5612_s29 }
 0x251   : > { %2009 = vrot.lane.b32.xlu0 %v1933_v52, %s5613_s12  ;;  %v1747_v52 = vld [vmem:[#allocation2 + $0x111] sm:$0xff] }
 0x252   : > { %659 = vrot.lane.b32.xlu1 %v4574_v45, %s5614_s14  ;;  %v1072_v35 = vpop.permute.xlu2 %1071 }
 0x253   : > { %1142 = vst.msk [vmem:[#allocation3 + $0xd0] sm:$0xff] %vm1115_vm5, %v1072_v35  ;;  %v2036_v30 = vpop.permute.xlu0 %2035 }
 0x254   : > { %v668_v53 = vpop.permute.xlu1 %667  ;;  %2107 = vst.msk [vmem:[#allocation3 + $0xc8] sm:$0xff] %vm2081_vm10, %v2036_v30 }
 0x255   : > { %747 = vst.msk [vmem:[#allocation3 + $0x88] sm:$0xff] %vm729_vm2, %v668_v53 }
 0x258   : > { %1828 = vrot.lane.b32.xlu2 %v4921_v59, %s3830_s13 }
 0x259   : > { %1846 = vrot.lane.b32.xlu0 %v4923_v50, %s3830_s13 }
 0x25a   : > { %852 = vrot.lane.b32.xlu1 %v4595_v61, %s3825_s30  ;;  %v1265_v45 = vpop.permute.xlu2 %1264 }
 0x25b   : > { %1335 = vst.msk [vmem:[#allocation3 + $0xd0] sm:$0xff] %vm1308_vm6, %v1265_v45  ;;  %v1042_v23 = vpop.permute.xlu0 %1041  ;;  %v2139_v21 = vld [vmem:[#allocation3 + $0xc8] sm:$0xff] }
 0x25c   : > { %v861_v24 = vpop.permute.xlu1 %860  ;;  %1127 = vst.msk [vmem:[#allocation3 + $0x58] sm:$0xff] %vm1115_vm5, %v1042_v23  ;;  %3551 = vmatmul.msk.f32.gmra.mxu3 %vm2152_vm11, %v2139_v21  ;;  %v1940_v23 = vld [vmem:[#allocation2 + $0x112] sm:$0xff] }
 0x25d   : > { %940 = vst.msk [vmem:[#allocation3 + $0x88] sm:$0xff] %vm922_vm3, %v861_v24 }
 0x25f   : > { %v2339_v29 = vpop.f32.mrf.mxu3 }
 0x260   : > { %2021 = vrot.lane.b32.xlu2 %v4935_v41, %s5613_s12  ;;  %v2340_v61 = vadd.f32 %v4474_v42, %v2339_v29  ;;  %v414_v42 = vld [vmem:[%s4027_s16 + $0xf0] sm:$0xff]  ;;  %s5618_s16 = smov 24  }
 0x261   : > { %2039 = vrot.lane.b32.xlu0 %v4937_v58, %s5613_s12  ;;  %503 = vst.msk [vmem:[#allocation2 + $0x181] sm:$0xff] %vm416_vm0, %v414_v42 }
 0x262   : > { %671 = vrot.lane.b32.xlu1 %v4615_v15, %s5614_s14  ;;  %v2389_v31 = vmax.f32 %v2340_v61, 0.0  ;;  %v1458_v4 = vpop.permute.xlu2 %1457  ;;  %v517_v15 = vld [vmem:[#allocation2 + $0x90] sm:$0xff] }
 0x263   : > { %1528 = vst.msk [vmem:[#allocation3 + $0xd0] sm:$0xff] %vm1501_vm7, %v1458_v4  ;;  %v1235_v5 = vpop.permute.xlu0 %1234 }
 0x264   : > { %v1054_v54 = vpop.permute.xlu1 %1053  ;;  %2422 = vst.msk [vmem:[#allocation4 + $0xb8] sm:$0xff] %vm2398_vm12, %v2389_v31 }
 0x265   : > { %1320 = vst.msk [vmem:[#allocation3 + $0x58] sm:$0xff] %vm1308_vm6, %v1235_v5  ;;  %v533_v5 = vld [vmem:[#allocation2 + $0x150] sm:$0xff] }
 0x266   : > { %1133 = vst.msk [vmem:[#allocation3 + $0x88] sm:$0xff] %vm1115_vm5, %v1054_v54 }
 0x267   : > { %549 = vst.msk [vmem:[#allocation3 + $0x60] sm:$0xff] %vm416_vm0, %v517_v15 }
 0x268   : > { %689 = vrot.lane.b32.xlu2 %v4617_v12, %s5614_s14  ;;  %v1161_v12 = vld [vmem:[#allocation2 + $0xb1] sm:$0xff]  ;;  %v5005_v39 = vld [vmem:[#allocation2 + $0x180] sm:$0xff]  ;;  %565 = vst.msk [vmem:[#allocation3 + $0xe0] sm:$0xff] %vm416_vm0, %v533_v5 }
 0x269   : > { %1045 = vrot.lane.b32.xlu0 %v4685_v25, %s3826_s22  ;;  %v974_v25 = vld [vmem:[#allocation2 + $0xf8] sm:$0xff]  ;;  %v5016_v45 = vld [vmem:[#allocation2 + $0x181] sm:$0xff] }
 0x26a   : > { %864 = vrot.lane.b32.xlu1 %v4638_v40, %s3825_s30  ;;  %v1652_v49 = vpop.permute.xlu2 %1651  ;;  %v5019_v21 = vld [vmem:[#allocation2 + $0x182] sm:$0xff] }
 0x26b   : > { %1722 = vst.msk [vmem:[#allocation3 + $0xd0] sm:$0xff] %vm1695_vm8, %v1652_v49  ;;  %v1428_v10 = vpop.permute.xlu0 %1427 }
 0x26c   : > { %v1247_v36 = vpop.permute.xlu1 %1246  ;;  %1513 = vst.msk [vmem:[#allocation3 + $0x58] sm:$0xff] %vm1501_vm7, %v1428_v10 }
 0x26d   : > { %1326 = vst.msk [vmem:[#allocation3 + $0x88] sm:$0xff] %vm1308_vm6, %v1247_v36 }
 0x270   : > { %882 = vrot.lane.b32.xlu2 %v4640_v22, %s3825_s30  ;;  %v523_v22 = vld [vmem:[#allocation2 + $0xd8] sm:$0xff] }
 0x271   : > { %1238 = vrot.lane.b32.xlu0 %v1161_v12, %s3828_s25  ;;  %555 = vst.msk [vmem:[#allocation3 + $0x90] sm:$0xff] %vm416_vm0, %v523_v22  ;;  %v1941_v22 = vld [vmem:[#allocation2 + $0x122] sm:$0xff] }
 0x272   : > { %1057 = vrot.lane.b32.xlu1 %v974_v25, %s3826_s22  ;;  %v1827_v40 = vpop.permute.xlu2 %1826  ;;  %v1555_v25 = vld [vmem:[#allocation2 + $0x120] sm:$0xff] }
 0x273   : > { %v1622_v60 = vpop.permute.xlu0 %1621 }
 0x274   : > { %v1440_v62 = vpop.permute.xlu1 %1439  ;;  %1707 = vst.msk [vmem:[#allocation3 + $0x58] sm:$0xff] %vm1695_vm8, %v1622_v60 }
 0x275   : > { %1519 = vst.msk [vmem:[#allocation3 + $0x88] sm:$0xff] %vm1501_vm7, %v1440_v62 }
 0x278   : > { %1075 = vrot.lane.b32.xlu2 %v4812_v0, %s3826_s22 }
 0x279   : > { %1431 = vrot.lane.b32.xlu0 %v1354_v46, %s5615_s24  ;;  %v1748_v46 = vld [vmem:[#allocation2 + $0x121] sm:$0xff] }
 0x27a   : > { %1250 = vrot.lane.b32.xlu1 %v4824_v57, %s3828_s25  ;;  %v2020_v16 = vpop.permute.xlu2 %2019 }
 0x27b   : > { %v1815_v63 = vpop.permute.xlu0 %1814 }
 0x27c   : > { %v1634_v17 = vpop.permute.xlu1 %1633  ;;  %1900 = vst.msk [vmem:[#allocation3 + $0x58] sm:$0xff] %vm1888_vm9, %v1815_v63 }
 0x27d   : > { %1713 = vst.msk [vmem:[#allocation3 + $0x88] sm:$0xff] %vm1695_vm8, %v1634_v17 }
 0x27e   : > { %1906 = vst.msk [vmem:[#allocation3 + $0x88] sm:$0xff] %vm1888_vm9, %v1827_v40  ;;  %v5059_v40 = vld [vmem:[#allocation2 + $0x188] sm:$0xff] }
 0x27f   : > { %2099 = vst.msk [vmem:[#allocation3 + $0x88] sm:$0xff] %vm2081_vm10, %v2020_v16 }
 0x280   : > { %1268 = vrot.lane.b32.xlu2 %v4826_v19, %s3828_s25 }
 0x281   : > { %1625 = vrot.lane.b32.xlu0 %v1548_v6, %s5612_s29  ;;  %v1950_v6 = vld [vmem:[#allocation2 + $0x18a] sm:$0xff] }
 0x282   : > { %1443 = vrot.lane.b32.xlu1 %v4840_v55, %s5615_s24  ;;  %v688_v0 = vpop.permute.xlu2 %687 }
 0x283   : > { %757 = vst.msk [vmem:[#allocation3 + $0xd8] sm:$0xff] %vm729_vm2, %v688_v0  ;;  %v2008_v57 = vpop.permute.xlu0 %2007 }
 0x284   : > { %v658_v7 = vpop.permute.xlu1 %657  ;;  %2093 = vst.msk [vmem:[#allocation3 + $0x58] sm:$0xff] %vm2081_vm10, %v2008_v57 }
 0x285   : > { %742 = vst.msk [vmem:[#allocation3 + $0x60] sm:$0xff] %vm729_vm2, %v658_v7 }
 0x286   : > { %v2131_v18 = vld [vmem:[#allocation3 + $0x88] sm:$0xff] }
 0x287   : > { %3543 = vmatmul.msk.f32.gmra.mxu2 %vm2152_vm11, %v2131_v18 }
 0x288   : > { %1461 = vrot.lane.b32.xlu2 %v4842_v3, %s5615_s24 }
 0x289   : > { %1818 = vrot.lane.b32.xlu0 %v1741_v13, %s3830_s13  ;;  %v2297_v55 = vpop.f32.mrf.mxu0 }
 0x28a   : > { %1637 = vrot.lane.b32.xlu1 %v1554_v37, %s5612_s29  ;;  %v2315_v14 = vpop.f32.mrf.mxu2  ;;  %v881_v8 = vpop.permute.xlu2 %880  ;;  %v2298_v26 = vadd.f32 %v4998_v38, %v2297_v55 }
 0x28b   : > { %v2316_v51 = vadd.f32 %v4998_v38, %v2315_v14  ;;  %950 = vst.msk [vmem:[#allocation3 + $0xd8] sm:$0xff] %vm922_vm3, %v881_v8  ;;  %v1845_v2 = vpop.permute.xlu0 %1844  ;;  %v2125_v47 = vld [vmem:[#allocation3 + $0x58] sm:$0xff] }
 0x28c   : > { %v851_v9 = vpop.permute.xlu1 %850  ;;  %v2375_v48 = vmax.f32 %v2298_v26, 0.0  ;;  %1915 = vst.msk [vmem:[#allocation3 + $0xd0] sm:$0xff] %vm1888_vm9, %v1845_v2  ;;  %3537 = vmatmul.msk.f32.gmra.mxu0 %vm2152_vm11, %v2125_v47  ;;  %v1565_v47 = vld [vmem:[#allocation2 + $0x198] sm:$0xff] }
 0x28d   : > { %v2381_v32 = vmax.f32 %v2316_v51, 0.0  ;;  %935 = vst.msk [vmem:[#allocation3 + $0x60] sm:$0xff] %vm922_vm3, %v851_v9  ;;  %v1758_v9 = vld [vmem:[#allocation2 + $0x199] sm:$0xff] }
 0x28e   : > { %2408 = vst.msk [vmem:[#allocation4 + $0x48] sm:$0xff] %vm2398_vm12, %v2375_v48  ;;  %v1951_v48 = vld [vmem:[#allocation2 + $0x19a] sm:$0xff] }
 0x28f   : > { %2414 = vst.msk [vmem:[#allocation4 + $0x78] sm:$0xff] %vm2398_vm12, %v2381_v32  ;;  %v525_v32 = vld [vmem:[#allocation2 + $0xf0] sm:$0xff] }
 0x290   : > { %1655 = vrot.lane.b32.xlu2 %v5005_v39, %s5612_s29  ;;  %557 = vst.msk [vmem:[#allocation3 + $0xa0] sm:$0xff] %vm416_vm0, %v525_v32 }
 0x291   : > { %2011 = vrot.lane.b32.xlu0 %v1934_v44, %s5613_s12 }
 0x292   : > { %1830 = vrot.lane.b32.xlu1 %v1747_v52, %s3830_s13  ;;  %v1074_v35 = vpop.permute.xlu2 %1073 }
 0x293   : > { %1143 = vst.msk [vmem:[#allocation3 + $0xd8] sm:$0xff] %vm1115_vm5, %v1074_v35  ;;  %v2038_v30 = vpop.permute.xlu0 %2037 }
 0x294   : > { %v670_v53 = vpop.permute.xlu1 %669  ;;  %2108 = vst.msk [vmem:[#allocation3 + $0xd0] sm:$0xff] %vm2081_vm10, %v2038_v30 }
 0x295   : > { %748 = vst.msk [vmem:[#allocation3 + $0x90] sm:$0xff] %vm729_vm2, %v670_v53 }
 0x298   : > { %1848 = vrot.lane.b32.xlu2 %v5016_v45, %s3830_s13 }
 0x299   : > { %2023 = vrot.lane.b32.xlu0 %v1940_v23, %s5613_s12 }
 0x29a   : > { %2041 = vrot.lane.b32.xlu1 %v5019_v21, %s5613_s12  ;;  %v1267_v24 = vpop.permute.xlu2 %1266 }
 0x29b   : > { %1336 = vst.msk [vmem:[#allocation3 + $0xd8] sm:$0xff] %vm1308_vm6, %v1267_v24  ;;  %v1044_v29 = vpop.permute.xlu0 %1043  ;;  %v2140_v61 = vld [vmem:[#allocation3 + $0xd0] sm:$0xff] }
 0x29c   : > { %v863_v33 = vpop.permute.xlu1 %862  ;;  %1128 = vst.msk [vmem:[#allocation3 + $0x60] sm:$0xff] %vm1115_vm5, %v1044_v29  ;;  %3552 = vmatmul.msk.f32.gmra.mxu3 %vm2152_vm11, %v2140_v61 }
 0x29d   : > { %941 = vst.msk [vmem:[#allocation3 + $0x90] sm:$0xff] %vm922_vm3, %v863_v33  ;;  %v1759_v33 = vld [vmem:[#allocation2 + $0x1a1] sm:$0xff] }
 0x29f   : > { %v2342_v31 = vpop.f32.mrf.mxu3 }
 0x2a0   : > { %673 = vrot.lane.b32.xlu2 %v4727_v27, %s5614_s14  ;;  %v2343_v4 = vadd.f32 %v4998_v38, %v2342_v31  ;;  %v975_v27 = vld [vmem:[#allocation2 + $0x108] sm:$0xff] }
 0x2a1   : > { %691 = vrot.lane.b32.xlu0 %v4729_v28, %s5614_s14  ;;  %v518_v28 = vld [vmem:[#allocation2 + $0x98] sm:$0xff]  ;;  %v1952_v31 = vld [vmem:[#allocation2 + $0x1a2] sm:$0xff] }
 0x2a2   : > { %866 = vrot.lane.b32.xlu1 %v4741_v34, %s3825_s30  ;;  %v2390_v54 = vmax.f32 %v2343_v4, 0.0  ;;  %v1460_v42 = vpop.permute.xlu2 %1459  ;;  %550 = vst.msk [vmem:[#allocation3 + $0x68] sm:$0xff] %vm416_vm0, %v518_v28  ;;  %v2580_v4 = vld [vmem:[#allocation5 + $0x1] sm:$0xff] }
 0x2a3   : > { %1529 = vst.msk [vmem:[#allocation3 + $0xd8] sm:$0xff] %vm1501_vm7, %v1460_v42  ;;  %v1237_v15 = vpop.permute.xlu0 %1236 }
 0x2a4   : > { %v1056_v49 = vpop.permute.xlu1 %1055  ;;  %2423 = vst.msk [vmem:[#allocation4 + $0xc0] sm:$0xff] %vm2398_vm12, %v2390_v54 }
 0x2a5   : > { %1321 = vst.msk [vmem:[#allocation3 + $0x60] sm:$0xff] %vm1308_vm6, %v1237_v15  ;;  %v534_v15 = vld [vmem:[#allocation2 + $0x158] sm:$0xff] }
 0x2a6   : > { %1134 = vst.msk [vmem:[#allocation3 + $0x90] sm:$0xff] %vm1115_vm5, %v1056_v49  ;;  %v2629_v49 = vld [vmem:[#allocation5 + $0x2] sm:$0xff] }
 0x2a7   : > { %566 = vst.msk [vmem:[#allocation3 + $0xe8] sm:$0xff] %vm416_vm0, %v534_v15 }
 0x2a8   : > { %884 = vrot.lane.b32.xlu2 %v4743_v43, %s3825_s30 }
 0x2a9   : > { %1059 = vrot.lane.b32.xlu0 %v975_v27, %s3826_s22  ;;  %v2727_v27 = vld [vmem:[#allocation5 + $0x11] sm:$0xff] }
 0x2aa   : > { %1077 = vrot.lane.b32.xlu1 %v4872_v56, %s3826_s22  ;;  %v1654_v34 = vpop.permute.xlu2 %1653 }
 0x2ab   : > { %1723 = vst.msk [vmem:[#allocation3 + $0xd8] sm:$0xff] %vm1695_vm8, %v1654_v34  ;;  %v1430_v10 = vpop.permute.xlu0 %1429 }
 0x2ac   : > { %v1249_v36 = vpop.permute.xlu1 %1248  ;;  %1514 = vst.msk [vmem:[#allocation3 + $0x60] sm:$0xff] %vm1501_vm7, %v1430_v10 }
 0x2ad   : > { %1327 = vst.msk [vmem:[#allocation3 + $0x90] sm:$0xff] %vm1308_vm6, %v1249_v36  ;;  %v2776_v36 = vld [vmem:[#allocation5 + $0x12] sm:$0xff] }
 0x2b0   : > { %1252 = vrot.lane.b32.xlu2 %v4921_v59, %s3828_s25  ;;  %v524_v59 = vld [vmem:[#allocation2 + $0xe0] sm:$0xff] }
 0x2b1   : > { %1270 = vrot.lane.b32.xlu0 %v4923_v50, %s3828_s25  ;;  %556 = vst.msk [vmem:[#allocation3 + $0x98] sm:$0xff] %vm416_vm0, %v524_v59 }
 0x2b2   : > { %1445 = vrot.lane.b32.xlu1 %v4935_v41, %s5615_s24  ;;  %v1829_v43 = vpop.permute.xlu2 %1828 }
 0x2b3   : > { %v1624_v56 = vpop.permute.xlu0 %1623 }
 0x2b4   : > { %v1442_v12 = vpop.permute.xlu1 %1441  ;;  %1708 = vst.msk [vmem:[#allocation3 + $0x60] sm:$0xff] %vm1695_vm8, %v1624_v56 }
 0x2b5   : > { %1520 = vst.msk [vmem:[#allocation3 + $0x90] sm:$0xff] %vm1501_vm7, %v1442_v12 }
 0x2b8   : > { %1463 = vrot.lane.b32.xlu2 %v4937_v58, %s5615_s24 }
 0x2b9   : > { %1639 = vrot.lane.b32.xlu0 %v1555_v25, %s5612_s29  ;;  %v5152_v25 = vld [vmem:[#allocation5 + $0x22] sm:$0xff] }
 0x2ba   : > { %1657 = vrot.lane.b32.xlu1 %v5059_v40, %s5612_s29  ;;  %v2022_v41 = vpop.permute.xlu2 %2021 }
 0x2bb   : > { %v1817_v60 = vpop.permute.xlu0 %1816 }
 0x2bc   : > { %v1636_v62 = vpop.permute.xlu1 %1635  ;;  %1901 = vst.msk [vmem:[#allocation3 + $0x60] sm:$0xff] %vm1888_vm9, %v1817_v60 }
 0x2bd   : > { %1714 = vst.msk [vmem:[#allocation3 + $0x90] sm:$0xff] %vm1695_vm8, %v1636_v62 }
 0x2be   : > { %1907 = vst.msk [vmem:[#allocation3 + $0x90] sm:$0xff] %vm1888_vm9, %v1829_v43 }
 0x2bf   : > { %2100 = vst.msk [vmem:[#allocation3 + $0x90] sm:$0xff] %vm2081_vm10, %v2022_v41 }
 0x2c0   : > { %1832 = vrot.lane.b32.xlu2 %v1748_v46, %s3830_s13 }
 0x2c1   : > { %1850 = vrot.lane.b32.xlu0 %v5068_v11, %s3830_s13 }
 0x2c2   : > { %2025 = vrot.lane.b32.xlu1 %v1941_v22, %s5613_s12  ;;  %v690_v16 = vpop.permute.xlu2 %689 }
 0x2c3   : > { %758 = vst.msk [vmem:[#allocation3 + $0xe0] sm:$0xff] %vm729_vm2, %v690_v16  ;;  %v2010_v63 = vpop.permute.xlu0 %2009 }
 0x2c4   : > { %v660_v17 = vpop.permute.xlu1 %659  ;;  %2094 = vst.msk [vmem:[#allocation3 + $0x60] sm:$0xff] %vm2081_vm10, %v2010_v63 }
 0x2c5   : > { %743 = vst.msk [vmem:[#allocation3 + $0x68] sm:$0xff] %vm729_vm2, %v660_v17  ;;  %v2439_v17 = vld [vmem:[#allocation4 + $0x40] ss:$2 sm:$0xff] }
 0x2c6   : > { %v2132_v0 = vld [vmem:[#allocation3 + $0x90] sm:$0xff] }
 0x2c7   : > { %3544 = vmatmul.msk.f32.gmra.mxu2 %vm2152_vm11, %v2132_v0 }
 0x2c8   : > { %2043 = vrot.lane.b32.xlu2 %v1950_v6, %s5613_s12 }
 0x2c9   : > { %693 = vrot.lane.b32.xlu0 %v4826_v19, %s5614_s14  ;;  %v2300_v57 = vpop.f32.mrf.mxu0 }
 0x2ca   : > { %886 = vrot.lane.b32.xlu1 %v4842_v3, %s3825_s30  ;;  %v883_v7 = vpop.permute.xlu2 %882  ;;  %v2301_v13 = vadd.f32 %v4998_v38, %v2300_v57  ;;  %v2318_v18 = vpop.f32.mrf.mxu2 }
 0x2cb   : > { %951 = vst.msk [vmem:[#allocation3 + $0xe0] sm:$0xff] %vm922_vm3, %v883_v7  ;;  %v1847_v37 = vpop.permute.xlu0 %1846  ;;  %v2126_v55 = vld [vmem:[#allocation3 + $0x60] sm:$0xff]  ;;  %v2319_v8 = vadd.f32 %v4998_v38, %v2318_v18 }
 0x2cc   : > { %v853_v14 = vpop.permute.xlu1 %852  ;;  %v2376_v26 = vmax.f32 %v2301_v13, 0.0  ;;  %1916 = vst.msk [vmem:[#allocation3 + $0xd8] sm:$0xff] %vm1888_vm9, %v1847_v37  ;;  %3538 = vmatmul.msk.f32.gmra.mxu0 %vm2152_vm11, %v2126_v55 }
 0x2cd   : > { %936 = vst.msk [vmem:[#allocation3 + $0x68] sm:$0xff] %vm922_vm3, %v853_v14  ;;  %v2382_v19 = vmax.f32 %v2319_v8, 0.0 }
 0x2ce   : > { %2409 = vst.msk [vmem:[#allocation4 + $0x50] sm:$0xff] %vm2398_vm12, %v2376_v26 }
 0x2cf   : > { %2415 = vst.msk [vmem:[#allocation4 + $0x80] sm:$0xff] %vm2398_vm12, %v2382_v19 }
 0x2d0   : > { %1079 = vrot.lane.b32.xlu2 %v5005_v39, %s3826_s22 }
 0x2d1   : > { %1272 = vrot.lane.b32.xlu0 %v5016_v45, %s3828_s25 }
 0x2d2   : > { %1465 = vrot.lane.b32.xlu1 %v5019_v21, %s5615_s24  ;;  %v1076_v3 = vpop.permute.xlu2 %1075 }
 0x2d3   : > { %1144 = vst.msk [vmem:[#allocation3 + $0xe0] sm:$0xff] %vm1115_vm5, %v1076_v3  ;;  %v2040_v51 = vpop.permute.xlu0 %2039 }
 0x2d4   : > { %v672_v2 = vpop.permute.xlu1 %671  ;;  %2109 = vst.msk [vmem:[#allocation3 + $0xd8] sm:$0xff] %vm2081_vm10, %v2040_v51 }
 0x2d5   : > { %749 = vst.msk [vmem:[#allocation3 + $0x98] sm:$0xff] %vm729_vm2, %v672_v2 }
 0x2d8   : > { %1659 = vrot.lane.b32.xlu2 %v1565_v47, %s5612_s29  ;;  %v535_v47 = vld [vmem:[#allocation2 + $0x168] sm:$0xff] }
 0x2d9   : > { %1852 = vrot.lane.b32.xlu0 %v1758_v9, %s3830_s13  ;;  %567 = vst.msk [vmem:[#allocation3 + $0xf0] sm:$0xff] %vm416_vm0, %v535_v47  ;;  %vm2718_vm0 = vcmask 261312  }
 0x2da   : > { %2045 = vrot.lane.b32.xlu1 %v1951_v48, %s5613_s12  ;;  %v1269_v39 = vpop.permute.xlu2 %1268 }
 0x2db   : > { %1337 = vst.msk [vmem:[#allocation3 + $0xe0] sm:$0xff] %vm1308_vm6, %v1269_v39  ;;  %v1046_v44 = vpop.permute.xlu0 %1045  ;;  %v2141_v52 = vld [vmem:[#allocation3 + $0xd8] sm:$0xff] }
 0x2dc   : > { %v865_v35 = vpop.permute.xlu1 %864  ;;  %1129 = vst.msk [vmem:[#allocation3 + $0x68] sm:$0xff] %vm1115_vm5, %v1046_v44  ;;  %3553 = vmatmul.msk.f32.gmra.mxu3 %vm2152_vm11, %v2141_v52 }
 0x2dd   : > { %942 = vst.msk [vmem:[#allocation3 + $0x98] sm:$0xff] %vm922_vm3, %v865_v35 }
 0x2df   : > { %v2345_v30 = vpop.f32.mrf.mxu3 }
 0x2e0   : > { %695 = vrot.lane.b32.xlu2 %v4923_v50, %s5614_s14  ;;  %v2346_v53 = vadd.f32 %v4998_v38, %v2345_v30  ;;  %v1566_v50 = vld [vmem:[#allocation2 + $0x1a0] sm:$0xff]  ;;  %s3837_s14 = smov 56  }
 0x2e1   : > { %888 = vrot.lane.b32.xlu0 %v4937_v58, %s3825_s30  ;;  %s5600_s30 = smov 16  }
 0x2e2   : > { %1081 = vrot.lane.b32.xlu1 %v5059_v40, %s3826_s22  ;;  %v2391_v45 = vmax.f32 %v2346_v53, 0.0  ;;  %v1462_v23 = vpop.permute.xlu2 %1461  ;;  %s5598_s22 = smov 24  }
 0x2e3   : > { %1530 = vst.msk [vmem:[#allocation3 + $0xe0] sm:$0xff] %vm1501_vm7, %v1462_v23  ;;  %v1239_v21 = vpop.permute.xlu0 %1238 }
 0x2e4   : > { %v1058_v24 = vpop.permute.xlu1 %1057  ;;  %2424 = vst.msk [vmem:[#allocation4 + $0xc8] sm:$0xff] %vm2398_vm12, %v2391_v45 }
 0x2e5   : > { %1322 = vst.msk [vmem:[#allocation3 + $0x68] sm:$0xff] %vm1308_vm6, %v1239_v21 }
 0x2e6   : > { %1135 = vst.msk [vmem:[#allocation3 + $0x98] sm:$0xff] %vm1115_vm5, %v1058_v24 }
 0x2e8   : > { %1274 = vrot.lane.b32.xlu2 %v5068_v11, %s3828_s25  ;;  %s5594_s25 = smov 32  }
 0x2e9   : > { %1467 = vrot.lane.b32.xlu0 %v1950_v6, %s5615_s24  ;;  %s5602_s24 = smov 64   ;;  %v2471_v6 = vld [vmem:[#allocation4 + $0x41] ss:$2 sm:$0xff] }
 0x2ea   : > { %1661 = vrot.lane.b32.xlu1 %v1566_v50, %s5612_s29  ;;  %v1656_v58 = vpop.permute.xlu2 %1655  ;;  %s5604_s29 = smov 48   ;;  %v2498_v18 = vmax.f32 %v2439_v17, %v2471_v6  ;;  %v2983_v17 = vld [vmem:[%s5577_s3 + $0x10] sm:$0xff]  ;;  %v2982_v6 = vld [vmem:[%s5577_s3 + $0x8] sm:$0xff] }
 0x2eb   : > { %1724 = vst.msk [vmem:[#allocation3 + $0xe0] sm:$0xff] %vm1695_vm8, %v1656_v58  ;;  %v1432_v29 = vpop.permute.xlu0 %1431 }
 0x2ec   : > { %v1251_v61 = vpop.permute.xlu1 %1250  ;;  %1515 = vst.msk [vmem:[#allocation3 + $0x68] sm:$0xff] %vm1501_vm7, %v1432_v29  ;;  %v2516_v8 = vsel %vm2398_vm12, %v2498_v18, -inf }
 0x2ed   : > { %1328 = vst.msk [vmem:[#allocation3 + $0x98] sm:$0xff] %vm1308_vm6, %v1251_v61 }
 0x2f0   : > { %1854 = vrot.lane.b32.xlu2 %v1759_v33, %s3830_s13  ;;  %s5596_s13 = smov 40  }
 0x2f1   : > { %2047 = vrot.lane.b32.xlu0 %v1952_v31, %s5613_s12 }
 0x2f2   : > { %2596 = vrot.lane.b32.xlu1 %v2580_v4, %s5613_s12  ;;  %v1849_v5 = vpop.permute.xlu2 %1848 }
 0x2f3   : > { %1917 = vst.msk [vmem:[#allocation3 + $0xe0] sm:$0xff] %vm1888_vm9, %v1849_v5  ;;  %v1626_v54 = vpop.permute.xlu0 %1625 }
 0x2f4   : > { %v1444_v42 = vpop.permute.xlu1 %1443  ;;  %1709 = vst.msk [vmem:[#allocation3 + $0x68] sm:$0xff] %vm1695_vm8, %v1626_v54 }
 0x2f5   : > { %1521 = vst.msk [vmem:[#allocation3 + $0x98] sm:$0xff] %vm1501_vm7, %v1444_v42 }
 0x2f8   : > { %2645 = vrot.lane.b32.xlu2 %v2629_v49, %s5600_s30 }
 0x2f9   : > { %2694 = vrot.lane.b32.xlu0 %v4666_v20, %s5598_s22  ;;  %v5146_v20 = vld [vmem:[#allocation5 + $0x21] sm:$0xff] }
 0x2fa   : > { %2743 = vrot.lane.b32.xlu1 %v2727_v27, %s5594_s25  ;;  %v674_v28 = vpop.permute.xlu2 %673 }
 0x2fb   : > { %750 = vst.msk [vmem:[#allocation3 + $0xa0] sm:$0xff] %vm729_vm2, %v674_v28  ;;  %v1819_v34 = vpop.permute.xlu0 %1818  ;;  %v2564_v28 = vld [vmem:[#allocation5] sm:$0xff] }
 0x2fc   : > { %v1638_v10 = vpop.permute.xlu1 %1637  ;;  %1902 = vst.msk [vmem:[#allocation3 + $0x68] sm:$0xff] %vm1888_vm9, %v1819_v34 }
 0x2fd   : > { %1715 = vst.msk [vmem:[#allocation3 + $0x98] sm:$0xff] %vm1695_vm8, %v1638_v10 }
 0x2fe   : > { %2572 = vst.msk [vmem:[#allocation6] sm:$0xff] %vm2398_vm12, %v2564_v28 }
 0x300   : > { %2792 = vrot.lane.b32.xlu2 %v2776_v36, %s5596_s13 }
 0x301   : > { %2842 = vrot.lane.b32.xlu0 %v4857_v1, %s5604_s29 }
 0x302   : > { %2891 = vrot.lane.b32.xlu1 %v5146_v20, %s3837_s14  ;;  %v885_v43 = vpop.permute.xlu2 %884 }
 0x303   : > { %v2012_v56 = vpop.permute.xlu0 %2011 }
 0x304   : > { %v1831_v12 = vpop.permute.xlu1 %1830  ;;  %2095 = vst.msk [vmem:[#allocation3 + $0x68] sm:$0xff] %vm2081_vm10, %v2012_v56 }
 0x305   : > { %1908 = vst.msk [vmem:[#allocation3 + $0x98] sm:$0xff] %vm1888_vm9, %v1831_v12  ;;  %v2989_v12 = vld [vmem:[%s5577_s3 + $0x40] sm:$0xff] }
 0x306   : > { %3026 = vmatpush.msra.mxu1 %v2989_v12 }
 0x308   : > { %2940 = vrot.lane.b32.xlu2 %v5152_v25, %s5602_s24 }
 0x309   : > { %2598 = vrot.lane.b32.xlu0 %v2727_v27, %s5613_s12  ;;  %v2303_v40 = vpop.f32.mrf.mxu0 }
 0x30a   : > { %2647 = vrot.lane.b32.xlu1 %v2776_v36, %s5600_s30  ;;  %v1253_v59 = vpop.permute.xlu2 %1252  ;;  %v2304_v41 = vadd.f32 %v4998_v38, %v2303_v40  ;;  %v2321_v60 = vpop.f32.mrf.mxu2 }
 0x30b   : > { %v2024_v62 = vpop.permute.xlu0 %2023  ;;  %v2127_v46 = vld [vmem:[#allocation3 + $0x68] sm:$0xff]  ;;  %v2322_v11 = vadd.f32 %v4998_v38, %v2321_v60  ;;  %v2987_v60 = vld [vmem:[%s5577_s3 + $0x30] sm:$0xff] }
 0x30c   : > { %v2042_v22 = vpop.permute.xlu1 %2041  ;;  %v2377_v16 = vmax.f32 %v2304_v41, 0.0  ;;  %2101 = vst.msk [vmem:[#allocation3 + $0x98] sm:$0xff] %vm2081_vm10, %v2024_v62  ;;  %3539 = vmatmul.msk.f32.gmra.mxu0 %vm2152_vm11, %v2127_v46  ;;  %v2988_v41 = vld [vmem:[%s5577_s3 + $0x38] sm:$0xff]  ;;  %v2986_v46 = vld [vmem:[%s5577_s3 + $0x28] sm:$0xff] }
 0x30d   : > { %v2383_v63 = vmax.f32 %v2322_v11, 0.0  ;;  %2110 = vst.msk [vmem:[#allocation3 + $0xe0] sm:$0xff] %vm2081_vm10, %v2042_v22  ;;  %3027 = vmatpush.msra.mxu1 %v2988_v41  ;;  %v2985_v11 = vld [vmem:[%s5577_s3 + $0x20] sm:$0xff] }
 0x30e   : > { %2410 = vst.msk [vmem:[#allocation4 + $0x58] sm:$0xff] %vm2398_vm12, %v2377_v16 }
 0x30f   : > { %2416 = vst.msk [vmem:[#allocation4 + $0x88] sm:$0xff] %vm2398_vm12, %v2383_v63  ;;  %3028 = vmatpush.msra.mxu1 %v2987_v60  ;;  %v2984_v63 = vld [vmem:[%s5577_s3 + $0x18] sm:$0xff] }
 0x310   : > { %2696 = vrot.lane.b32.xlu2 %v4857_v1, %s5598_s22 }
 0x311   : > { %2745 = vrot.lane.b32.xlu0 %v5146_v20, %s5594_s25  ;;  %3029 = vmatpush.msra.mxu1 %v2986_v46 }
 0x312   : > { %2794 = vrot.lane.b32.xlu1 %v5152_v25, %s5596_s13  ;;  %v1464_v0 = vpop.permute.xlu2 %1463 }
 0x313   : > { %v692_v57 = vpop.permute.xlu0 %691  ;;  %v2133_v7 = vld [vmem:[#allocation3 + $0x98] sm:$0xff]  ;;  %3030 = vmatpush.msra.mxu1 %v2985_v11 }
 0x314   : > { %v867_v13 = vpop.permute.xlu1 %866  ;;  %759 = vst.msk [vmem:[#allocation3 + $0xe8] sm:$0xff] %vm729_vm2, %v692_v57  ;;  %3545 = vmatmul.msk.f32.gmra.mxu2 %vm2152_vm11, %v2133_v7  ;;  %v2142_v37 = vld [vmem:[#allocation3 + $0xe0] sm:$0xff] }
 0x315   : > { %v2441_v55 = vld [vmem:[#allocation4 + $0x50] ss:$2 sm:$0xff]  ;;  %v2473_v1 = vld [vmem:[#allocation4 + $0x51] ss:$2 sm:$0xff]  ;;  %952 = vst.msk [vmem:[#allocation3 + $0xe8] sm:$0xff] %vm922_vm3, %v885_v43  ;;  %3554 = vmatmul.msk.f32.gmra.mxu3 %vm2152_vm11, %v2142_v37  ;;  %3031 = vmatpush.msra.mxu1 %v2984_v63 }
 0x316   : > { %v2499_v14 = vmax.f32 %v2441_v55, %v2473_v1  ;;  %943 = vst.msk [vmem:[#allocation3 + $0xa0] sm:$0xff] %vm922_vm3, %v867_v13  ;;  %v2981_v13 = vld [vmem:[%s5577_s3] sm:$0xff]  ;;  %v2455_v1 = vld [vmem:[#allocation4 + $0xc0] ss:$2 sm:$0xff]  ;;  %v2479_v46 = vld [vmem:[#allocation4 + $0x81] ss:$2 sm:$0xff] }
 0x317   : > { %3032 = vmatpush.msra.mxu1 %v2983_v17 }
 0x318   : > { %v2517_v26 = vsel %vm2398_vm12, %v2499_v14, -inf  ;;  %v2487_v14 = vld [vmem:[#allocation4 + $0xc1] ss:$2 sm:$0xff] }
 0x319   : > { %v2518_v19 = vmax.f32 %v2516_v8, %v2517_v26  ;;  %3033 = vmatpush.msra.mxu1 %v2982_v6  ;;  %v2506_v8 = vmax.f32 %v2455_v1, %v2487_v14 }
 0x31a   : > { %v1833_v3 = vpop.permute.xlu2 %1832 }
 0x31b   : > { %2558 = vst.msk [vmem:[#allocation5 + $0x31] sm:$0xff] %vm2398_vm12, %v2518_v19  ;;  %v1060_v51 = vpop.permute.xlu0 %1059  ;;  %3034 = vmatpush.msra.mxu1 %v2981_v13 }
 0x31c   : > { %v1078_v2 = vpop.permute.xlu1 %1077  ;;  %1136 = vst.msk [vmem:[#allocation3 + $0xa0] sm:$0xff] %vm1115_vm5, %v1060_v51 }
 0x31d   : > { %1329 = vst.msk [vmem:[#allocation3 + $0xa0] sm:$0xff] %vm1308_vm6, %v1253_v59 }
 0x31e   : > { %1145 = vst.msk [vmem:[#allocation3 + $0xe8] sm:$0xff] %vm1115_vm5, %v1078_v2 }
 0x31f   : > { %v2348_v9 = vpop.f32.mrf.mxu3 }
 0x320   : > { %v2349_v48 = vadd.f32 %v4998_v38, %v2348_v9 }
 0x322   : > { %v2392_v32 = vmax.f32 %v2349_v48, 0.0  ;;  %v2044_v39 = vpop.permute.xlu2 %2043  ;;  %v2827_v44 = vld [vmem:[#allocation5 + $0x30] sm:$0xff]  ;;  %v2528_v48 = vsel %vm2398_vm12, %v2506_v8, -inf }
 0x323   : > { %v5184_v52 = vld [vmem:[#allocation5 + $0x32] sm:$0xff]  ;;  %v1271_v30 = vpop.permute.xlu0 %1270  ;;  %2844 = vrot.lane.b32.xlu2 %v2827_v44, %s5604_s29  ;;  %2575 = vst.msk [vmem:[#allocation6 + $0x18] sm:$0xff] %vm2398_vm12, %v2827_v44 }
 0x324   : > { %v5186_v35 = vld [vmem:[#allocation5 + $0x31] sm:$0xff]  ;;  %2942 = vrot.lane.b32.xlu1 %v5184_v52, %s5602_s24  ;;  %v1446_v53 = vpop.permute.xlu1 %1445  ;;  %2425 = vst.msk [vmem:[#allocation4 + $0xd0] sm:$0xff] %vm2398_vm12, %v2392_v32  ;;  %s5619_s24 = smov 40  }
 0x325   : > { %2893 = vrot.lane.b32.xlu0 %v5186_v35, %s3837_s14  ;;  %1338 = vst.msk [vmem:[#allocation3 + $0xe8] sm:$0xff] %vm1308_vm6, %v1271_v30 }
 0x326   : > { %1531 = vst.msk [vmem:[#allocation3 + $0xe8] sm:$0xff] %vm1501_vm7, %v1464_v0 }
 0x327   : > { %1522 = vst.msk [vmem:[#allocation3 + $0xa0] sm:$0xff] %vm1501_vm7, %v1446_v53 }
 0x32a   : > { %v1080_v45 = vpop.permute.xlu2 %1079 }
 0x32b   : > { %v1640_v23 = vpop.permute.xlu0 %1639  ;;  %2600 = vrot.lane.b32.xlu2 %v5146_v20, %s5613_s12 }
 0x32c   : > { %2698 = vrot.lane.b32.xlu1 %v2827_v44, %s5598_s22  ;;  %v1658_v21 = vpop.permute.xlu1 %1657  ;;  %1716 = vst.msk [vmem:[#allocation3 + $0xa0] sm:$0xff] %vm1695_vm8, %v1640_v23  ;;  %s5616_s22 = smov 64  }
 0x32d   : > { %2649 = vrot.lane.b32.xlu0 %v5152_v25, %s5600_s30  ;;  %1909 = vst.msk [vmem:[#allocation3 + $0xa0] sm:$0xff] %vm1888_vm9, %v1833_v3 }
 0x32e   : > { %1725 = vst.msk [vmem:[#allocation3 + $0xe8] sm:$0xff] %vm1695_vm8, %v1658_v21 }
 0x332   : > { %v1660_v24 = vpop.permute.xlu2 %1659 }
 0x333   : > { %v1851_v50 = vpop.permute.xlu0 %1850  ;;  %2747 = vrot.lane.b32.xlu2 %v5186_v35, %s5594_s25 }
 0x334   : > { %v2026_v58 = vpop.permute.xlu1 %2025  ;;  %1918 = vst.msk [vmem:[#allocation3 + $0xe8] sm:$0xff] %vm1888_vm9, %v1851_v50 }
 0x335   : > { %2796 = vrot.lane.b32.xlu0 %v5184_v52, %s5596_s13  ;;  %2111 = vst.msk [vmem:[#allocation3 + $0xe8] sm:$0xff] %vm2081_vm10, %v2044_v39  ;;  %s5617_s13 = smov 16  }
 0x336   : > { %2102 = vst.msk [vmem:[#allocation3 + $0xa0] sm:$0xff] %vm2081_vm10, %v2026_v58 }
 0x33a   : > { %v696_v29 = vpop.permute.xlu2 %695 }
 0x33b   : > { %761 = vst.msk [vmem:[#allocation3 + $0xf8] sm:$0xff] %vm729_vm2, %v696_v29  ;;  %v694_v61 = vpop.permute.xlu0 %693 }
 0x33c   : > { %v887_v33 = vpop.permute.xlu1 %886  ;;  %760 = vst.msk [vmem:[#allocation3 + $0xf0] sm:$0xff] %vm729_vm2, %v694_v61  ;;  %v2143_v31 = vld [vmem:[#allocation3 + $0xe8] sm:$0xff]  ;;  %vm2816_vm2 = vcmask 392512  }
 0x33d   : > { %3555 = vmatmul.msk.f32.gmra.mxu3 %vm2152_vm11, %v2143_v31  ;;  %953 = vst.msk [vmem:[#allocation3 + $0xf0] sm:$0xff] %vm922_vm3, %v887_v33  ;;  %v2134_v4 = vld [vmem:[#allocation3 + $0xa0] sm:$0xff] }
 0x33e   : > { %1146 = vst.msk [vmem:[#allocation3 + $0xf0] sm:$0xff] %vm1115_vm5, %v1080_v45  ;;  %3546 = vmatmul.msk.f32.gmra.mxu2 %vm2152_vm11, %v2134_v4 }
 0x342   : > { %v1275_v5 = vpop.permute.xlu2 %1274 }
 0x343   : > { %v1273_v54 = vpop.permute.xlu0 %1272 }
 0x344   : > { %v1466_v42 = vpop.permute.xlu1 %1465  ;;  %1339 = vst.msk [vmem:[#allocation3 + $0xf0] sm:$0xff] %vm1308_vm6, %v1273_v54  ;;  %v2477_v54 = vld [vmem:[#allocation4 + $0x71] ss:$2 sm:$0xff] }
 0x345   : > { %1532 = vst.msk [vmem:[#allocation3 + $0xf0] sm:$0xff] %vm1501_vm7, %v1466_v42 }
 0x346   : > { %1726 = vst.msk [vmem:[#allocation3 + $0xf0] sm:$0xff] %vm1695_vm8, %v1660_v24 }
 0x349   : > { %v2306_v15 = vpop.f32.mrf.mxu0 }
 0x34a   : > { %v2307_v49 = vadd.f32 %v4998_v38, %v2306_v15  ;;  %v2324_v27 = vpop.f32.mrf.mxu2  ;;  %v1855_v20 = vpop.permute.xlu2 %1854 }
 0x34b   : > { %v1853_v34 = vpop.permute.xlu0 %1852  ;;  %v2325_v36 = vadd.f32 %v4998_v38, %v2324_v27 }
 0x34c   : > { %v2046_v10 = vpop.permute.xlu1 %2045  ;;  %v2378_v43 = vmax.f32 %v2307_v49, 0.0  ;;  %1919 = vst.msk [vmem:[#allocation3 + $0xf0] sm:$0xff] %vm1888_vm9, %v1853_v34 }
 0x34d   : > { %2112 = vst.msk [vmem:[#allocation3 + $0xf0] sm:$0xff] %vm2081_vm10, %v2046_v10  ;;  %v2384_v56 = vmax.f32 %v2325_v36, 0.0 }
 0x34e   : > { %2411 = vst.msk [vmem:[#allocation4 + $0x60] sm:$0xff] %vm2398_vm12, %v2378_v43 }
 0x34f   : > { %2417 = vst.msk [vmem:[#allocation4 + $0x90] sm:$0xff] %vm2398_vm12, %v2384_v56 }
 0x352   : > { %v2646_v62 = vpop.permute.xlu2 %2645 }
 0x353   : > { %v889_v25 = vpop.permute.xlu0 %888 }
 0x354   : > { %v1082_v40 = vpop.permute.xlu1 %1081  ;;  %954 = vst.msk [vmem:[#allocation3 + $0xf8] sm:$0xff] %vm922_vm3, %v889_v25  ;;  %v2144_v59 = vld [vmem:[#allocation3 + $0xf0] sm:$0xff]  ;;  %vm2866_vm3 = vcmask 458112  }
 0x355   : > { %1147 = vst.msk [vmem:[#allocation3 + $0xf8] sm:$0xff] %vm1115_vm5, %v1082_v40  ;;  %3556 = vmatmul.msk.f32.gmra.mxu3 %vm2152_vm11, %v2144_v59  ;;  %vm2964_vm5 = vcmask 589312  }
 0x356   : > { %1340 = vst.msk [vmem:[#allocation3 + $0xf8] sm:$0xff] %vm1308_vm6, %v1275_v5  ;;  %vm2994_vm6 = vcmask 588800   ;;  %v2445_v5 = vld [vmem:[#allocation4 + $0x70] ss:$2 sm:$0xff] }
 0x357   : > { %v2501_v42 = vmax.f32 %v2445_v5, %v2477_v54 }
 0x359   : > { %v2520_v36 = vsel %vm2398_vm12, %v2501_v42, -inf }
 0x35a   : > { %v2793_v57 = vpop.permute.xlu2 %2792 }
 0x35b   : > { %v1468_v22 = vpop.permute.xlu0 %1467 }
 0x35c   : > { %v1662_v16 = vpop.permute.xlu1 %1661  ;;  %1533 = vst.msk [vmem:[#allocation3 + $0xf8] sm:$0xff] %vm1501_vm7, %v1468_v22  ;;  %vm3115_vm7 = vcmask 60416  }
 0x35d   : > { %1727 = vst.msk [vmem:[#allocation3 + $0xf8] sm:$0xff] %vm1695_vm8, %v1662_v16  ;;  %vm3129_vm8 = vcmask 57344  }
 0x35e   : > { %1920 = vst.msk [vmem:[#allocation3 + $0xf8] sm:$0xff] %vm1888_vm9, %v1855_v20  ;;  %vm3135_vm9 = vcmask 123969  }
 0x35f   : > { %v2351_v0 = vpop.f32.mrf.mxu3 }
 0x360   : > { %v2352_v7 = vadd.f32 %v4998_v38, %v2351_v0 }
 0x362   : > { %v2393_v18 = vmax.f32 %v2352_v7, 0.0  ;;  %v2941_v26 = vpop.permute.xlu2 %2940 }
 0x363   : > { %v2048_v37 = vpop.permute.xlu0 %2047 }
 0x364   : > { %v2597_v55 = vpop.permute.xlu1 %2596  ;;  %2426 = vst.msk [vmem:[#allocation4 + $0xd8] sm:$0xff] %vm2398_vm12, %v2393_v18 }
 0x365   : > { %2113 = vst.msk [vmem:[#allocation3 + $0xf8] sm:$0xff] %vm2081_vm10, %v2048_v37  ;;  %vm3140_vm10 = vcmask 190594  }
 0x366   : > { %2621 = vst.msk [vmem:[#allocation6] sm:$0xff] %vm2620_vm14, %v2597_v55 }
 0x367   : > { %2670 = vst.msk [vmem:[#allocation6] sm:$0xff] %vm2669_vm15, %v2646_v62  ;;  %v2447_v62 = vld [vmem:[#allocation4 + $0x80] ss:$2 sm:$0xff] }
 0x368   : > { %v2502_v16 = vmax.f32 %v2447_v62, %v2479_v46  ;;  %v2833_v46 = vld [vmem:[#allocation5 + $0x90] sm:$0xff] }
 0x36a   : > { %v2697_v53 = vpop.permute.xlu2 %2696  ;;  %v2522_v13 = vsel %vm2398_vm12, %v2502_v16, -inf }
 0x36b   : > { %v2457_v19 = vld [vmem:[#allocation4 + $0xd0] ss:$2 sm:$0xff]  ;;  %v2489_v3 = vld [vmem:[#allocation4 + $0xd1] ss:$2 sm:$0xff]  ;;  %v2695_v51 = vpop.permute.xlu0 %2694 }
 0x36c   : > { %v2744_v2 = vpop.permute.xlu1 %2743  ;;  %v2507_v47 = vmax.f32 %v2457_v19, %v2489_v3  ;;  %2719 = vst.msk [vmem:[#allocation6] sm:$0xff] %vm2718_vm0, %v2695_v51  ;;  %v2145_v9 = vld [vmem:[#allocation3 + $0xf8] sm:$0xff] }
 0x36d   : > { %3557 = vmatmul.msk.f32.gmra.mxu3 %vm2152_vm11, %v2145_v9  ;;  %2768 = vst.msk [vmem:[#allocation6] sm:$0xff] %vm2767_vm1, %v2744_v2  ;;  %v2453_v2 = vld [vmem:[#allocation4 + $0xb0] ss:$2 sm:$0xff]  ;;  %vm3145_vm11 = vcmask 257219  }
 0x36e   : > { %v2529_v32 = vsel %vm2398_vm12, %v2507_v47, -inf  ;;  %2817 = vst.msk [vmem:[#allocation6] sm:$0xff] %vm2816_vm2, %v2793_v57  ;;  %v2485_v47 = vld [vmem:[#allocation4 + $0xb1] ss:$2 sm:$0xff] }
 0x36f   : > { %v2530_v39 = vmax.f32 %v2528_v48, %v2529_v32  ;;  %v2505_v9 = vmax.f32 %v2453_v2, %v2485_v47 }
 0x371   : > { %2562 = vst.msk [vmem:[#allocation5 + $0x71] sm:$0xff] %vm2398_vm12, %v2530_v39 }
 0x373   : > { %v2843_v44 = vpop.permute.xlu0 %2842 }
 0x374   : > { %v2892_v30 = vpop.permute.xlu1 %2891  ;;  %2867 = vst.msk [vmem:[#allocation6] sm:$0xff] %vm2866_vm3, %v2843_v44  ;;  %v2526_v44 = vsel %vm2398_vm12, %v2505_v9, -inf }
 0x375   : > { %2916 = vst.msk [vmem:[#allocation6] sm:$0xff] %vm2915_vm4, %v2892_v30 }
 0x376   : > { %2965 = vst.msk [vmem:[#allocation6] sm:$0xff] %vm2964_vm5, %v2941_v26 }
 0x378   : > { %v5278_v45 = vld [vmem:[#allocation5 + $0x70] sm:$0xff] }
 0x379   : > { %2579 = vst.msk [vmem:[#allocation6 + $0x38] sm:$0xff] %vm2398_vm12, %v5278_v45  ;;  %v2929_v5 = vld [vmem:[#allocation5 + $0x72] sm:$0xff] }
 0x37b   : > { %v2599_v23 = vpop.permute.xlu0 %2598 }
 0x37c   : > { %v2648_v21 = vpop.permute.xlu1 %2647  ;;  %2622 = vst.msk [vmem:[#allocation6 + $0x8] sm:$0xff] %vm2620_vm14, %v2599_v23 }
 0x37d   : > { %v2845_v24 = vpop.permute.xlu2 %2844  ;;  %2671 = vst.msk [vmem:[#allocation6 + $0x8] sm:$0xff] %vm2669_vm15, %v2648_v21  ;;  %v2973_v50 = vld [vmem:[#allocation6] sm:$0xff] }
 0x37e   : > { %2720 = vst.msk [vmem:[#allocation6 + $0x8] sm:$0xff] %vm2718_vm0, %v2697_v53  ;;  %3558 = vmatmul.msk.f32.vlgmr.msra.gmra.mxu1 %vm2994_vm6, %v2973_v50 }
 0x383   : > { %v2746_v58 = vpop.permute.xlu0 %2745 }
 0x384   : > { %v2795_v29 = vpop.permute.xlu1 %2794  ;;  %2769 = vst.msk [vmem:[#allocation6 + $0x8] sm:$0xff] %vm2767_vm1, %v2746_v58 }
 0x385   : > { %v2601_v61 = vpop.permute.xlu2 %2600  ;;  %2818 = vst.msk [vmem:[#allocation6 + $0x8] sm:$0xff] %vm2816_vm2, %v2795_v29 }
 0x386   : > { %2623 = vst.msk [vmem:[#allocation6 + $0x10] sm:$0xff] %vm2620_vm14, %v2601_v61  ;;  %v3758_v61 = vld [vmem:[%s5576_s2] ss:$0 sm:$0xff] }
 0x387   : > { %2868 = vst.msk [vmem:[#allocation6 + $0x8] sm:$0xff] %vm2866_vm3, %v2845_v24 }
 0x389   : > { %v2309_v33 = vpop.f32.mrf.mxu0 }
 0x38a   : > { %v2310_v31 = vadd.f32 %v4998_v38, %v2309_v33 }
 0x38c   : > { %v2379_v4 = vmax.f32 %v2310_v31, 0.0  ;;  %v2880_v31 = vld [vmem:[#allocation5 + $0x71] sm:$0xff] }
 0x38d   : > { %v2748_v22 = vpop.permute.xlu2 %2747 }
 0x38e   : > { %2412 = vst.msk [vmem:[#allocation4 + $0x68] sm:$0xff] %vm2398_vm12, %v2379_v4 }
 0x395   : > { %v2443_v15 = vld [vmem:[#allocation4 + $0x60] ss:$2 sm:$0xff]  ;;  %v2475_v49 = vld [vmem:[#allocation4 + $0x61] ss:$2 sm:$0xff] }
 0x396   : > { %v2943_v27 = vpop.permute.xlu1 %2942  ;;  %v2500_v28 = vmax.f32 %v2443_v15, %v2475_v49  ;;  %v5359_v15 = vld [vmem:[%s5578_s4] ss:$0 sm:$0xff] }
 0x397   : > { %v2894_v34 = vpop.permute.xlu0 %2893  ;;  %v2327_v10 = vpop.f32.mrf.mxu2 }
 0x398   : > { %2917 = vst.msk [vmem:[#allocation6 + $0x8] sm:$0xff] %vm2915_vm4, %v2894_v34  ;;  %v2519_v20 = vsel %vm2398_vm12, %v2500_v28, -inf  ;;  %v2328_v43 = vadd.f32 %v4998_v38, %v2327_v10  ;;  %v2354_v56 = vpop.f32.mrf.mxu3 }
 0x399   : > { %2966 = vst.msk [vmem:[#allocation6 + $0x8] sm:$0xff] %vm2964_vm5, %v2943_v27  ;;  %v2521_v12 = vmax.f32 %v2519_v20, %v2520_v36  ;;  %v2355_v25 = vadd.f32 %v4998_v38, %v2354_v56 }
 0x39a   : > { %v2385_v40 = vmax.f32 %v2328_v43, 0.0 }
 0x39b   : > { %2559 = vst.msk [vmem:[#allocation5 + $0x41] sm:$0xff] %vm2398_vm12, %v2521_v12  ;;  %v2394_v59 = vmax.f32 %v2355_v25, 0.0 }
 0x39c   : > { %2418 = vst.msk [vmem:[#allocation4 + $0x98] sm:$0xff] %vm2398_vm12, %v2385_v40 }
 0x39d   : > { %2427 = vst.msk [vmem:[#allocation4 + $0xe0] sm:$0xff] %vm2398_vm12, %v2394_v59 }
 0x39e   : > { %v2699_v41 = vpop.permute.xlu1 %2698 }
 0x39f   : > { %v2650_v60 = vpop.permute.xlu0 %2649 }
 0x3a0   : > { %2672 = vst.msk [vmem:[#allocation6 + $0x10] sm:$0xff] %vm2669_vm15, %v2650_v60  ;;  %v2974_v11 = vld [vmem:[#allocation6 + $0x8] sm:$0xff] }
 0x3a1   : > { %2721 = vst.msk [vmem:[#allocation6 + $0x10] sm:$0xff] %vm2718_vm0, %v2699_v41  ;;  %3559 = vmatmul.msk.f32.gmra.mxu1 %vm2994_vm6, %v2974_v11 }
 0x3a2   : > { %2770 = vst.msk [vmem:[#allocation6 + $0x10] sm:$0xff] %vm2767_vm1, %v2748_v22  ;;  %v2877_v63 = vld [vmem:[#allocation5 + $0x41] sm:$0xff] }
 0x3a3   : > { %v2828_v17 = vld [vmem:[#allocation5 + $0x40] sm:$0xff]  ;;  %v2449_v0 = vld [vmem:[#allocation4 + $0x90] ss:$2 sm:$0xff]  ;;  %v2481_v57 = vld [vmem:[#allocation4 + $0x91] ss:$2 sm:$0xff]  ;;  %2895 = vrot.lane.b32.xlu2 %v2877_v63, %s3837_s14 }
 0x3a4   : > { %v2926_v6 = vld [vmem:[#allocation5 + $0x42] sm:$0xff]  ;;  %2846 = vrot.lane.b32.xlu1 %v2828_v17, %s5604_s29  ;;  %2576 = vst.msk [vmem:[#allocation6 + $0x20] sm:$0xff] %vm2398_vm12, %v2828_v17  ;;  %v2503_v7 = vmax.f32 %v2449_v0, %v2481_v57  ;;  %v2882_v0 = vld [vmem:[#allocation5 + $0x91] sm:$0xff] }
 0x3a5   : > { %2944 = vrot.lane.b32.xlu0 %v2926_v6, %s5616_s22  ;;  %v2931_v57 = vld [vmem:[#allocation5 + $0x92] sm:$0xff] }
 0x3a6   : > { %v2523_v18 = vsel %vm2398_vm12, %v2503_v7, -inf }
 0x3a7   : > { %v2797_v37 = vpop.permute.xlu0 %2796  ;;  %v2524_v55 = vmax.f32 %v2522_v13, %v2523_v18 }
 0x3a8   : > { %2819 = vst.msk [vmem:[#allocation6 + $0x10] sm:$0xff] %vm2816_vm2, %v2797_v37 }
 0x3a9   : > { %2560 = vst.msk [vmem:[#allocation5 + $0x51] sm:$0xff] %vm2398_vm12, %v2524_v55 }
 0x3ab   : > { %2651 = vrot.lane.b32.xlu2 %v5184_v52, %s5617_s13 }
 0x3ac   : > { %2602 = vrot.lane.b32.xlu1 %v5186_v35, %s5613_s12 }
 0x3ad   : > { %2700 = vrot.lane.b32.xlu0 %v2828_v17, %s5618_s16 }
 0x3b0   : > { %v2829_v1 = vld [vmem:[#allocation5 + $0x50] sm:$0xff] }
 0x3b1   : > { %2577 = vst.msk [vmem:[#allocation6 + $0x28] sm:$0xff] %vm2398_vm12, %v2829_v1  ;;  %v2927_v14 = vld [vmem:[#allocation5 + $0x52] sm:$0xff] }
 0x3b2   : > { %v2878_v8 = vld [vmem:[#allocation5 + $0x51] sm:$0xff] }
 0x3b3   : > { %2798 = vrot.lane.b32.xlu2 %v2926_v6, %s5619_s24 }
 0x3b4   : > { %2749 = vrot.lane.b32.xlu1 %v2877_v63, %s5620_s15 }
 0x3b5   : > { %2848 = vrot.lane.b32.xlu0 %v2829_v1, %s5604_s29 }
 0x3bb   : > { %2946 = vrot.lane.b32.xlu2 %v2927_v14, %s5616_s22 }
 0x3bc   : > { %2897 = vrot.lane.b32.xlu1 %v2878_v8, %s3837_s14 }
 0x3bd   : > { %2604 = vrot.lane.b32.xlu0 %v2877_v63, %s5613_s12 }
 0x3c0   : > { %v2357_v52 = vpop.f32.mrf.mxu3 }
 0x3c1   : > { %v2358_v35 = vadd.f32 %v4998_v38, %v2357_v52  ;;  %v2330_v26 = vpop.f32.mrf.mxu2 }
 0x3c2   : > { %v2331_v19 = vadd.f32 %v4998_v38, %v2330_v26 }
 0x3c3   : > { %v2395_v3 = vmax.f32 %v2358_v35, 0.0  ;;  %2702 = vrot.lane.b32.xlu2 %v2829_v1, %s5618_s16 }
 0x3c4   : > { %2653 = vrot.lane.b32.xlu1 %v2926_v6, %s5617_s13  ;;  %v2386_v51 = vmax.f32 %v2331_v19, 0.0 }
 0x3c5   : > { %2751 = vrot.lane.b32.xlu0 %v2878_v8, %s5620_s15  ;;  %2428 = vst.msk [vmem:[#allocation4 + $0xe8] sm:$0xff] %vm2398_vm12, %v2395_v3 }
 0x3c6   : > { %2419 = vst.msk [vmem:[#allocation4 + $0xa0] sm:$0xff] %vm2398_vm12, %v2386_v51 }
 0x3cc   : > { %2800 = vrot.lane.b32.xlu1 %v2927_v14, %s5619_s24  ;;  %v2459_v54 = vld [vmem:[#allocation4 + $0xe0] ss:$2 sm:$0xff]  ;;  %v2491_v42 = vld [vmem:[#allocation4 + $0xe1] ss:$2 sm:$0xff] }
 0x3cd   : > { %v2451_v48 = vld [vmem:[#allocation4 + $0xa0] ss:$2 sm:$0xff]  ;;  %v2483_v32 = vld [vmem:[#allocation4 + $0xa1] ss:$2 sm:$0xff]  ;;  %v2508_v49 = vmax.f32 %v2459_v54, %v2491_v42 }
 0x3ce   : > { %v2504_v39 = vmax.f32 %v2451_v48, %v2483_v32 }
 0x3cf   : > { %v2531_v43 = vsel %vm2398_vm12, %v2508_v49, -inf }
 0x3d0   : > { %v2525_v30 = vsel %vm2398_vm12, %v2504_v39, -inf }
 0x3d1   : > { %v2527_v53 = vmax.f32 %v2525_v30, %v2526_v44 }
 0x3d3   : > { %2561 = vst.msk [vmem:[#allocation5 + $0x61] sm:$0xff] %vm2398_vm12, %v2527_v53 }
 0x3d8   : > { %v2360_v23 = vpop.f32.mrf.mxu3 }
 0x3d9   : > { %v2361_v21 = vadd.f32 %v4998_v38, %v2360_v23 }
 0x3da   : > { %v2830_v24 = vld [vmem:[#allocation5 + $0x60] sm:$0xff] }
 0x3db   : > { %v2928_v50 = vld [vmem:[#allocation5 + $0x62] sm:$0xff]  ;;  %v2396_v29 = vmax.f32 %v2361_v21, 0.0  ;;  %2850 = vrot.lane.b32.xlu2 %v2830_v24, %s5604_s29  ;;  %2578 = vst.msk [vmem:[#allocation6 + $0x30] sm:$0xff] %vm2398_vm12, %v2830_v24 }
 0x3dc   : > { %v2879_v58 = vld [vmem:[#allocation5 + $0x61] sm:$0xff]  ;;  %2948 = vrot.lane.b32.xlu1 %v2928_v50, %s5616_s22 }
 0x3dd   : > { %2899 = vrot.lane.b32.xlu0 %v2879_v58, %s3837_s14  ;;  %2429 = vst.msk [vmem:[#allocation4 + $0xf0] sm:$0xff] %vm2398_vm12, %v2396_v29 }
 0x3e3   : > { %2606 = vrot.lane.b32.xlu2 %v2878_v8, %s5613_s12 }
 0x3e4   : > { %2704 = vrot.lane.b32.xlu1 %v2830_v24, %s5618_s16 }
 0x3e5   : > { %2655 = vrot.lane.b32.xlu0 %v2927_v14, %s5617_s13 }
 0x3eb   : > { %2753 = vrot.lane.b32.xlu2 %v2879_v58, %s5620_s15 }
 0x3ec   : > { %2852 = vrot.lane.b32.xlu1 %v5278_v45, %s5604_s29  ;;  %s3840_s29 = smov 80  }
 0x3ed   : > { %2802 = vrot.lane.b32.xlu0 %v2928_v50, %s5619_s24 }
 0x3f0   : > { %v2363_v38 = vpop.f32.mrf.mxu3 }
 0x3f1   : > { %v2364_v33 = vadd.f32 %v3758_v61, %v2363_v38 }
 0x3f3   : > { %v2397_v4 = vmax.f32 %v2364_v33, 0.0  ;;  %2901 = vrot.lane.b32.xlu2 %v2880_v31, %s3837_s14 }
 0x3f4   : > { %2608 = vrot.lane.b32.xlu1 %v2879_v58, %s5613_s12 }
 0x3f5   : > { %2950 = vrot.lane.b32.xlu0 %v2929_v5, %s5616_s22  ;;  %2430 = vst.msk [vmem:[#allocation4 + $0xf8] sm:$0xff] %vm2398_vm12, %v2397_v4 }
 0x3fb   : > { %2657 = vrot.lane.b32.xlu2 %v2928_v50, %s5617_s13  ;;  %v3036_v27 = vpop.f32.mrf.mxu1 }
 0x3fc   : > { %2755 = vrot.lane.b32.xlu1 %v2880_v31, %s5620_s15  ;;  %v2461_v28 = vld [vmem:[#allocation4 + $0xf0] ss:$2 sm:$0xff]  ;;  %v2493_v34 = vld [vmem:[#allocation4 + $0xf1] ss:$2 sm:$0xff]  ;;  %v3037_v10 = vadd.f32 %v5359_v15, %v3036_v27 }
 0x3fd   : > { %2706 = vrot.lane.b32.xlu0 %v5278_v45, %s5618_s16  ;;  %v2509_v36 = vmax.f32 %v2461_v28, %v2493_v34  ;;  %v2896_v25 = vpop.permute.xlu2 %2895 }
 0x3fe   : > { %v3060_v20 = vmax.f32 %v3037_v10, 0.0 }
 0x3ff   : > { %v2532_v56 = vsel %vm2398_vm12, %v2509_v36, -inf }
 0x400   : > { %v2533_v12 = vmax.f32 %v2531_v43, %v2532_v56  ;;  %3068 = vst.msk [vmem:[#allocation7] sm:$0xff] %vm2398_vm12, %v3060_v20 }
 0x402   : > { %2563 = vst.msk [vmem:[#allocation5 + $0x81] sm:$0xff] %vm2398_vm12, %v2533_v12 }
 0x403   : > { %2804 = vrot.lane.b32.xlu2 %v2929_v5, %s5619_s24 }
 0x405   : > { %v2652_v41 = vpop.permute.xlu2 %2651 }
 0x407   : > { %v3076_v55 = vld [vmem:[#allocation7] ss:$2 sm:$0xf]  ;;  %v3092_v1 = vld [vmem:[#allocation7 + $0x1] ss:$2 sm:$0xf] }
 0x408   : > { %v3107_v8 = vmax.f32 %v3076_v55, %v3092_v1 }
 0x409   : > { %v2881_v40 = vld [vmem:[#allocation5 + $0x81] sm:$0xff] }
 0x40a   : > { %v2832_v59 = vld [vmem:[#allocation5 + $0x80] sm:$0xff]  ;;  %2903 = vrot.lane.b32.xlu1 %v2881_v40, %s3837_s14  ;;  %v3116_v19 = vsel %vm3115_vm7, %v3107_v8, -inf }
 0x40b   : > { %2854 = vrot.lane.b32.xlu0 %v2832_v59, %s5621_s0  ;;  %v2930_v45 = vld [vmem:[#allocation5 + $0x82] sm:$0xff] }
 0x40c   : > { %2952 = vrot.lane.b32.xlu2 %v2930_v45, %s5616_s22 }
 0x40d   : > { %v2799_v11 = vpop.permute.xlu2 %2798 }
 0x412   : > { %2659 = vrot.lane.b32.xlu1 %v2929_v5, %s5617_s13 }
 0x413   : > { %2610 = vrot.lane.b32.xlu0 %v2880_v31, %s5613_s12 }
 0x414   : > { %2708 = vrot.lane.b32.xlu2 %v2832_v59, %s5618_s16 }
 0x415   : > { %v2947_v13 = vpop.permute.xlu2 %2946 }
 0x416   : > { %v2847_v60 = vpop.permute.xlu1 %2846 }
 0x417   : > { %2869 = vst.msk [vmem:[#allocation6 + $0x10] sm:$0xff] %vm2866_vm3, %v2847_v60  ;;  %v2945_v62 = vpop.permute.xlu0 %2944 }
 0x418   : > { %2918 = vst.msk [vmem:[#allocation6 + $0x10] sm:$0xff] %vm2915_vm4, %v2896_v25 }
 0x419   : > { %2967 = vst.msk [vmem:[#allocation6 + $0x10] sm:$0xff] %vm2964_vm5, %v2945_v62 }
 0x41a   : > { %2806 = vrot.lane.b32.xlu1 %v2930_v45, %s5619_s24 }
 0x41b   : > { %2757 = vrot.lane.b32.xlu0 %v2881_v40, %s5620_s15 }
 0x41c   : > { %2856 = vrot.lane.b32.xlu2 %v2833_v46, %s5621_s0 }
 0x41d   : > { %v2703_v26 = vpop.permute.xlu2 %2702 }
 0x41e   : > { %v3039_v22 = vpop.f32.mrf.mxu1  ;;  %v2603_v63 = vpop.permute.xlu1 %2602 }
 0x41f   : > { %v3040_v16 = vadd.f32 %v5359_v15, %v3039_v22  ;;  %v2701_v17 = vpop.permute.xlu0 %2700  ;;  %2624 = vst.msk [vmem:[#allocation6 + $0x18] sm:$0xff] %vm2620_vm14, %v2603_v63 }
 0x420   : > { %v2975_v6 = vld [vmem:[#allocation6 + $0x10] sm:$0xff]  ;;  %2673 = vst.msk [vmem:[#allocation6 + $0x18] sm:$0xff] %vm2669_vm15, %v2652_v41 }
 0x421   : > { %v3061_v7 = vmax.f32 %v3040_v16, 0.0  ;;  %3560 = vmatmul.msk.f32.gmra.mxu1 %vm2994_vm6, %v2975_v6  ;;  %2722 = vst.msk [vmem:[#allocation6 + $0x18] sm:$0xff] %vm2718_vm0, %v2701_v17 }
 0x422   : > { %2954 = vrot.lane.b32.xlu1 %v2931_v57, %s5616_s22 }
 0x423   : > { %3069 = vst.msk [vmem:[#allocation7 + $0x8] sm:$0xff] %vm2398_vm12, %v3061_v7  ;;  %2905 = vrot.lane.b32.xlu0 %v2882_v0, %s3837_s14 }
 0x426   : > { %v2750_v18 = vpop.permute.xlu1 %2749 }
 0x427   : > { %v2849_v37 = vpop.permute.xlu0 %2848  ;;  %2771 = vst.msk [vmem:[#allocation6 + $0x18] sm:$0xff] %vm2767_vm1, %v2750_v18 }
 0x428   : > { %2820 = vst.msk [vmem:[#allocation6 + $0x18] sm:$0xff] %vm2816_vm2, %v2799_v11 }
 0x429   : > { %2870 = vst.msk [vmem:[#allocation6 + $0x18] sm:$0xff] %vm2866_vm3, %v2849_v37 }
 0x42a   : > { %v3078_v14 = vld [vmem:[#allocation7 + $0x8] ss:$2 sm:$0xf]  ;;  %v3094_v52 = vld [vmem:[#allocation7 + $0x9] ss:$2 sm:$0xf] }
 0x42b   : > { %v3108_v35 = vmax.f32 %v3078_v14, %v3094_v52 }
 0x42d   : > { %v3117_v3 = vsel %vm3115_vm7, %v3108_v35, -inf }
 0x42e   : > { %v2898_v51 = vpop.permute.xlu1 %2897  ;;  %v3118_v47 = vmax.f32 %v3116_v19, %v3117_v3 }
 0x42f   : > { %v2605_v2 = vpop.permute.xlu0 %2604  ;;  %2919 = vst.msk [vmem:[#allocation6 + $0x18] sm:$0xff] %vm2915_vm4, %v2898_v51 }
 0x430   : > { %2968 = vst.msk [vmem:[#allocation6 + $0x18] sm:$0xff] %vm2964_vm5, %v2947_v13  ;;  %3142 = vrot.lane.b32.xlu1 %v3118_v47, %s5618_s16  ;;  %3137 = vrot.lane.b32.xlu0 %v3118_v47, %s5617_s13  ;;  %s3843_s13 = smov 112   ;;  %s3844_s16 = smov 104  }
 0x431   : > { %2625 = vst.msk [vmem:[#allocation6 + $0x20] sm:$0xff] %vm2620_vm14, %v2605_v2  ;;  %3132 = vrot.lane.b32.xlu2 %v3118_v47, %s5613_s12  ;;  %s3839_s12 = smov 72  }
 0x432   : > { %3130 = vst.msk [vmem:[#allocation8] sm:$0x1] %vm3129_vm8, %v3118_v47 }
 0x435   : > { %v2851_v9 = vpop.permute.xlu2 %2850 }
 0x436   : > { %v2654_v48 = vpop.permute.xlu1 %2653 }
 0x437   : > { %2674 = vst.msk [vmem:[#allocation6 + $0x20] sm:$0xff] %vm2669_vm15, %v2654_v48  ;;  %v2976_v32 = vld [vmem:[#allocation6 + $0x18] sm:$0xff]  ;;  %v2752_v39 = vpop.permute.xlu0 %2751 }
 0x438   : > { %2723 = vst.msk [vmem:[#allocation6 + $0x20] sm:$0xff] %vm2718_vm0, %v2703_v26  ;;  %3561 = vmatmul.msk.f32.gmra.mxu1 %vm2994_vm6, %v2976_v32 }
 0x439   : > { %2772 = vst.msk [vmem:[#allocation6 + $0x20] sm:$0xff] %vm2767_vm1, %v2752_v39 }
 0x43d   : > { %v2607_v44 = vpop.permute.xlu2 %2606 }
 0x43e   : > { %v2801_v30 = vpop.permute.xlu1 %2800  ;;  %2626 = vst.msk [vmem:[#allocation6 + $0x28] sm:$0xff] %vm2620_vm14, %v2607_v44 }
 0x43f   : > { %2821 = vst.msk [vmem:[#allocation6 + $0x20] sm:$0xff] %vm2816_vm2, %v2801_v30 }
 0x440   : > { %2871 = vst.msk [vmem:[#allocation6 + $0x20] sm:$0xff] %vm2866_vm3, %v2851_v9 }
 0x445   : > { %v2754_v53 = vpop.permute.xlu2 %2753 }
 0x44d   : > { %v2902_v24 = vpop.permute.xlu2 %2901 }
 0x44e   : > { %v2949_v23 = vpop.permute.xlu1 %2948 }
 0x44f   : > { %v2900_v21 = vpop.permute.xlu0 %2899 }
 0x450   : > { %2920 = vst.msk [vmem:[#allocation6 + $0x20] sm:$0xff] %vm2915_vm4, %v2900_v21 }
 0x451   : > { %2969 = vst.msk [vmem:[#allocation6 + $0x20] sm:$0xff] %vm2964_vm5, %v2949_v23 }
 0x455   : > { %v2658_v38 = vpop.permute.xlu2 %2657 }
 0x456   : > { %v2705_v50 = vpop.permute.xlu1 %2704 }
 0x457   : > { %v2656_v58 = vpop.permute.xlu0 %2655 }
 0x458   : > { %2675 = vst.msk [vmem:[#allocation6 + $0x28] sm:$0xff] %vm2669_vm15, %v2656_v58  ;;  %v2977_v29 = vld [vmem:[#allocation6 + $0x20] sm:$0xff] }
 0x459   : > { %2724 = vst.msk [vmem:[#allocation6 + $0x28] sm:$0xff] %vm2718_vm0, %v2705_v50  ;;  %3562 = vmatmul.msk.f32.gmra.mxu1 %vm2994_vm6, %v2977_v29 }
 0x45a   : > { %2773 = vst.msk [vmem:[#allocation6 + $0x28] sm:$0xff] %vm2767_vm1, %v2754_v53 }
 0x45d   : > { %v2805_v31 = vpop.permute.xlu2 %2804 }
 0x45e   : > { %v2853_v61 = vpop.permute.xlu1 %2852 }
 0x45f   : > { %v2803_v33 = vpop.permute.xlu0 %2802 }
 0x460   : > { %2822 = vst.msk [vmem:[#allocation6 + $0x28] sm:$0xff] %vm2816_vm2, %v2803_v33 }
 0x461   : > { %2872 = vst.msk [vmem:[#allocation6 + $0x28] sm:$0xff] %vm2866_vm3, %v2853_v61 }
 0x462   : > { %2921 = vst.msk [vmem:[#allocation6 + $0x28] sm:$0xff] %vm2915_vm4, %v2902_v24 }
 0x466   : > { %v2609_v4 = vpop.permute.xlu1 %2608  ;;  %v2953_v49 = vpop.permute.xlu2 %2952 }
 0x467   : > { %2627 = vst.msk [vmem:[#allocation6 + $0x30] sm:$0xff] %vm2620_vm14, %v2609_v4  ;;  %v2951_v5 = vpop.permute.xlu0 %2950 }
 0x468   : > { %2676 = vst.msk [vmem:[#allocation6 + $0x30] sm:$0xff] %vm2669_vm15, %v2658_v38 }
 0x469   : > { %2970 = vst.msk [vmem:[#allocation6 + $0x28] sm:$0xff] %vm2964_vm5, %v2951_v5 }
 0x46e   : > { %v2756_v54 = vpop.permute.xlu1 %2755  ;;  %v2709_v28 = vpop.permute.xlu2 %2708 }
 0x46f   : > { %v2707_v42 = vpop.permute.xlu0 %2706 }
 0x470   : > { %2725 = vst.msk [vmem:[#allocation6 + $0x30] sm:$0xff] %vm2718_vm0, %v2707_v42  ;;  %v2978_v27 = vld [vmem:[#allocation6 + $0x28] sm:$0xff] }
 0x471   : > { %2774 = vst.msk [vmem:[#allocation6 + $0x30] sm:$0xff] %vm2767_vm1, %v2756_v54  ;;  %3563 = vmatmul.msk.f32.gmra.mxu1 %vm2994_vm6, %v2978_v27 }
 0x472   : > { %2823 = vst.msk [vmem:[#allocation6 + $0x30] sm:$0xff] %vm2816_vm2, %v2805_v31 }
 0x476   : > { %v2857_v36 = vpop.permute.xlu2 %2856 }
 0x47c   : > { %v2904_v34 = vpop.permute.xlu1 %2903 }
 0x47d   : > { %v2855_v10 = vpop.permute.xlu0 %2854 }
 0x47e   : > { %2873 = vst.msk [vmem:[#allocation6 + $0x30] sm:$0xff] %vm2866_vm3, %v2855_v10  ;;  %v3670_v10 = vld [vmem:[%s5579_s5 + $0x28] sm:$0xff] }
 0x47f   : > { %2922 = vst.msk [vmem:[#allocation6 + $0x30] sm:$0xff] %vm2915_vm4, %v2904_v34  ;;  %v3671_v34 = vld [vmem:[%s5579_s5 + $0x30] sm:$0xff] }
 0x480   : > { %2971 = vst.msk [vmem:[#allocation6 + $0x30] sm:$0xff] %vm2964_vm5, %v2953_v49 }
 0x484   : > { %v2660_v20 = vpop.permute.xlu1 %2659 }
 0x485   : > { %v2611_v43 = vpop.permute.xlu0 %2610 }
 0x486   : > { %2628 = vst.msk [vmem:[#allocation6 + $0x38] sm:$0xff] %vm2620_vm14, %v2611_v43  ;;  %vm3161_vm14 = vcmask 452994  }
 0x487   : > { %2677 = vst.msk [vmem:[#allocation6 + $0x38] sm:$0xff] %vm2669_vm15, %v2660_v20  ;;  %v2979_v56 = vld [vmem:[#allocation6 + $0x30] sm:$0xff]  ;;  %vm3166_vm15 = vcmask 519619   ;;  %v3668_v20 = vld [vmem:[%s5579_s5 + $0x18] sm:$0xff] }
 0x488   : > { %2726 = vst.msk [vmem:[#allocation6 + $0x38] sm:$0xff] %vm2718_vm0, %v2709_v28  ;;  %3564 = vmatmul.msk.f32.gmra.mxu1 %vm2994_vm6, %v2979_v56  ;;  %v3672_v28 = vld [vmem:[%s5579_s5 + $0x38] sm:$0xff]  ;;  %vm3172_vm0 = vcmask 582144  }
 0x489   : > { %3277 = vmatpush.bf16.msrb.mxu2 %v3672_v28 }
 0x48b   : > { %v3133_v12 = vpop.permute.xlu2 %3132 }
 0x48c   : > { %3136 = vst.msk [vmem:[#allocation8 - $0x1] sm:$0x2] %vm3135_vm9, %v3133_v12  ;;  %v2807_v25 = vpop.permute.xlu1 %2806  ;;  %v3667_v12 = vld [vmem:[%s5579_s5 + $0x10] sm:$0xff] }
 0x48d   : > { %v2758_v40 = vpop.permute.xlu0 %2757  ;;  %3278 = vmatpush.bf16.msrb.mxu2 %v3671_v34 }
 0x48e   : > { %2775 = vst.msk [vmem:[#allocation6 + $0x38] sm:$0xff] %vm2767_vm1, %v2758_v40  ;;  %vm3177_vm1 = vcmask 648769  }
 0x48f   : > { %2824 = vst.msk [vmem:[#allocation6 + $0x38] sm:$0xff] %vm2816_vm2, %v2807_v25  ;;  %vm3182_vm2 = vcmask 715394  }
 0x490   : > { %2874 = vst.msk [vmem:[#allocation6 + $0x38] sm:$0xff] %vm2866_vm3, %v2857_v36  ;;  %v3669_v36 = vld [vmem:[%s5579_s5 + $0x20] sm:$0xff]  ;;  %vm3187_vm3 = vcmask 782019  }
 0x491   : > { %3279 = vmatpush.bf16.msrb.mxu2 %v3670_v10 }
 0x494   : > { %v2955_v45 = vpop.permute.xlu1 %2954 }
 0x495   : > { %v2906_v59 = vpop.permute.xlu0 %2905  ;;  %3280 = vmatpush.bf16.msrb.mxu2 %v3669_v36 }
 0x496   : > { %2923 = vst.msk [vmem:[#allocation6 + $0x38] sm:$0xff] %vm2915_vm4, %v2906_v59  ;;  %v3666_v59 = vld [vmem:[%s5579_s5 + $0x8] sm:$0xff]  ;;  %vm3193_vm4 = vcmask 844544  }
 0x497   : > { %2972 = vst.msk [vmem:[#allocation6 + $0x38] sm:$0xff] %vm2964_vm5, %v2955_v45  ;;  %v3665_v45 = vld [vmem:[%s5579_s5] sm:$0xff]  ;;  %vm3198_vm5 = vcmask 911169  }
 0x499   : > { %3281 = vmatpush.bf16.msrb.mxu2 %v3668_v20 }
 0x49d   : > { %3282 = vmatpush.bf16.msrb.mxu2 %v3667_v12 }
 0x49e   : > { %v3042_v41 = vpop.f32.mrf.mxu1  ;;  %v2980_v60 = vld [vmem:[#allocation6 + $0x38] sm:$0xff] }
 0x49f   : > { %v3043_v62 = vadd.f32 %v5359_v15, %v3042_v41  ;;  %3565 = vmatmul.msk.f32.gmra.mxu1 %vm2994_vm6, %v2980_v60  ;;  %v3680_v41 = vld [vmem:[%s5581_s7 + $0x38] sm:$0xff]  ;;  %v3679_v60 = vld [vmem:[%s5581_s7 + $0x30] sm:$0xff]  ;;  %vm3203_vm6 = vcmask 977794  }
 0x4a0   : > { %3357 = vmatpush.bf16.msrb.mxu3 %v3680_v41 }
 0x4a1   : > { %v3062_v46 = vmax.f32 %v3043_v62, 0.0  ;;  %3283 = vmatpush.bf16.msrb.mxu2 %v3666_v59  ;;  %v3678_v62 = vld [vmem:[%s5581_s7 + $0x28] sm:$0xff] }
 0x4a2   : > { %v3143_v11 = vpop.permute.xlu1 %3142  ;;  %v3138_v22 = vpop.permute.xlu0 %3137 }
 0x4a3   : > { %3070 = vst.msk [vmem:[#allocation7 + $0x10] sm:$0xff] %vm2398_vm12, %v3062_v46  ;;  %v3677_v46 = vld [vmem:[%s5581_s7 + $0x20] sm:$0xff] }
 0x4a4   : > { %3141 = vst.msk [vmem:[#allocation8 - $0x2] sm:$0x4] %vm3140_vm10, %v3138_v22  ;;  %3358 = vmatpush.bf16.msrb.mxu3 %v3679_v60 }
 0x4a5   : > { %3146 = vst.msk [vmem:[#allocation8 - $0x3] sm:$0x8] %vm3145_vm11, %v3143_v11  ;;  %3284 = vmatpush.bf16.msrb.mxu2 %v3665_v45 }
 0x4a8   : > { %3359 = vmatpush.bf16.msrb.mxu3 %v3678_v62 }
 0x4aa   : > { %v3080_v6 = vld [vmem:[#allocation7 + $0x10] ss:$2 sm:$0xf]  ;;  %v3096_v0 = vld [vmem:[#allocation7 + $0x11] ss:$2 sm:$0xf] }
 0x4ab   : > { %v3109_v57 = vmax.f32 %v3080_v6, %v3096_v0  ;;  %v3674_v0 = vld [vmem:[%s5581_s7 + $0x8] sm:$0xff] }
 0x4ac   : > { %3360 = vmatpush.bf16.msrb.mxu3 %v3677_v46 }
 0x4ad   : > { %v3119_v37 = vsel %vm3115_vm7, %v3109_v57, -inf  ;;  %v3673_v57 = vld [vmem:[%s5581_s7] sm:$0xff] }
 0x4b5   : > { %v3045_v16 = vpop.f32.mrf.mxu1 }
 0x4b6   : > { %v3046_v63 = vadd.f32 %v5359_v15, %v3045_v16  ;;  %v3676_v16 = vld [vmem:[%s5581_s7 + $0x18] sm:$0xff] }
 0x4b7   : > { %3361 = vmatpush.bf16.msrb.mxu3 %v3676_v16 }
 0x4b8   : > { %v3063_v17 = vmax.f32 %v3046_v63, 0.0 }
 0x4ba   : > { %3071 = vst.msk [vmem:[#allocation7 + $0x18] sm:$0xff] %vm2398_vm12, %v3063_v17  ;;  %v3675_v17 = vld [vmem:[%s5581_s7 + $0x10] sm:$0xff] }
 0x4bb   : > { %3362 = vmatpush.bf16.msrb.mxu3 %v3675_v17 }
 0x4bf   : > { %3363 = vmatpush.bf16.msrb.mxu3 %v3674_v0 }
 0x4c1   : > { %v3082_v7 = vld [vmem:[#allocation7 + $0x18] ss:$2 sm:$0xf]  ;;  %v3098_v13 = vld [vmem:[#allocation7 + $0x19] ss:$2 sm:$0xf] }
 0x4c2   : > { %v3110_v18 = vmax.f32 %v3082_v7, %v3098_v13 }
 0x4c3   : > { %3364 = vmatpush.bf16.msrb.mxu3 %v3673_v57 }
 0x4c4   : > { %v3120_v55 = vsel %vm3115_vm7, %v3110_v18, -inf  ;;  %v3688_v18 = vld [vmem:[%s5583_s9 + $0x38] sm:$0xff] }
 0x4c5   : > { %v3121_v1 = vmax.f32 %v3119_v37, %v3120_v55  ;;  %3437 = vmatpush.bf16.msra.mxu2 %v3688_v18  ;;  %v3687_v37 = vld [vmem:[%s5583_s9 + $0x30] sm:$0xff]  ;;  %v3686_v55 = vld [vmem:[%s5583_s9 + $0x28] sm:$0xff] }
 0x4c7   : > { %3158 = vrot.lane.b32.xlu1 %v3121_v1, %s5621_s0  ;;  %3153 = vrot.lane.b32.xlu0 %v3121_v1, %s5619_s24  ;;  %s3845_s24 = smov 120  }
 0x4c8   : > { %3148 = vrot.lane.b32.xlu2 %v3121_v1, %s5620_s15  ;;  %s3460_s15 = scalar_lea.hbm %s5585_s11, %s3927_s21 }
 0x4c9   : > { %3438 = vmatpush.bf16.msra.mxu2 %v3687_v37 }
 0x4cd   : > { %3439 = vmatpush.bf16.msra.mxu2 %v3686_v55 }
 0x4d0   : > { %3163 = vrot.lane.b32.xlu2 %v3121_v1, %s3837_s14  ;;  %s3841_s14 = smov 88   ;;  %v3685_v1 = vld [vmem:[%s5583_s9 + $0x20] sm:$0xff] }
 0x4d1   : > { %3440 = vmatpush.bf16.msra.mxu2 %v3685_v1 }
 0x4d6   : > { %v3048_v14 = vpop.f32.mrf.mxu1 }
 0x4d7   : > { %v3049_v8 = vadd.f32 %v5359_v15, %v3048_v14  ;;  %v3684_v14 = vld [vmem:[%s5583_s9 + $0x18] sm:$0xff] }
 0x4d8   : > { %3441 = vmatpush.bf16.msra.mxu2 %v3684_v14 }
 0x4d9   : > { %v3064_v52 = vmax.f32 %v3049_v8, 0.0  ;;  %v3683_v8 = vld [vmem:[%s5583_s9 + $0x10] sm:$0xff] }
 0x4db   : > { %3072 = vst.msk [vmem:[#allocation7 + $0x20] sm:$0xff] %vm2398_vm12, %v3064_v52  ;;  %v3228_v52 = vld [vmem:[%s5580_s6] sm:$0x1] }
 0x4dc   : > { %3442 = vmatpush.bf16.msra.mxu2 %v3683_v8 }
 0x4e2   : > { %v3084_v3 = vld [vmem:[#allocation7 + $0x20] ss:$2 sm:$0xf]  ;;  %v3100_v51 = vld [vmem:[#allocation7 + $0x21] ss:$2 sm:$0xf] }
 0x4e3   : > { %v3111_v2 = vmax.f32 %v3084_v3, %v3100_v51 }
 0x4e5   : > { %v3122_v32 = vsel %vm3115_vm7, %v3111_v2, -inf  ;;  %v3682_v2 = vld [vmem:[%s5583_s9 + $0x8] sm:$0xff] }
 0x4e6   : > { %3443 = vmatpush.bf16.msra.mxu2 %v3682_v2 }
 0x4ee   : > { %v3051_v35 = vpop.f32.mrf.mxu1 }
 0x4ef   : > { %v3052_v26 = vadd.f32 %v5359_v15, %v3051_v35 }
 0x4f1   : > { %v3065_v19 = vmax.f32 %v3052_v26, 0.0 }
 0x4f3   : > { %3073 = vst.msk [vmem:[#allocation7 + $0x28] sm:$0xff] %vm2398_vm12, %v3065_v19 }
 0x4fa   : > { %v3086_v47 = vld [vmem:[#allocation7 + $0x28] ss:$2 sm:$0xf]  ;;  %v3102_v9 = vld [vmem:[#allocation7 + $0x29] ss:$2 sm:$0xf] }
 0x4fb   : > { %v3112_v48 = vmax.f32 %v3086_v47, %v3102_v9  ;;  %v3681_v47 = vld [vmem:[%s5583_s9] sm:$0xff] }
 0x4fc   : > { %3444 = vmatpush.bf16.msra.mxu2 %v3681_v47  ;;  %v3308_v9 = vld [vmem:[%s5582_s8] sm:$0x1] }
 0x4fd   : > { %v3123_v39 = vsel %vm3115_vm7, %v3112_v48, -inf }
 0x4fe   : > { %v3124_v44 = vmax.f32 %v3122_v32, %v3123_v39 }
 0x500   : > { %3174 = vrot.lane.b32.xlu1 %v3124_v44, %s3839_s12  ;;  %3169 = vrot.lane.b32.xlu0 %v3124_v44, %s5616_s22  ;;  %s3842_s22 = smov 96  }
 0x501   : > { %3179 = vrot.lane.b32.xlu2 %v3124_v44, %s3840_s29  ;;  %s3464_s29 = sshll.u32 %s3460_s15, 4  ;;  %s3465_s29 = int_to_ptr.hbm [resolvable:$true] %s3464_s29 }
 0x505   : > { %v3054_v30 = vpop.f32.mrf.mxu1 }
 0x506   : > { %v3055_v53 = vadd.f32 %v5359_v15, %v3054_v30 }
 0x508   : > { %v3066_v23 = vmax.f32 %v3055_v53, 0.0  ;;  %3184 = vrot.lane.b32.xlu0 %v3124_v44, %s3841_s14  ;;  %v3388_v53 = vld [vmem:[%s5584_s10] sm:$0x1] }
 0x50a   : > { %3074 = vst.msk [vmem:[#allocation7 + $0x30] sm:$0xff] %vm2398_vm12, %v3066_v23 }
 0x511   : > { %v3088_v29 = vld [vmem:[#allocation7 + $0x30] ss:$2 sm:$0xf]  ;;  %v3104_v38 = vld [vmem:[#allocation7 + $0x31] ss:$2 sm:$0xf] }
 0x512   : > { %v3113_v61 = vmax.f32 %v3088_v29, %v3104_v38 }
 0x514   : > { %v3125_v5 = vsel %vm3115_vm7, %v3113_v61, -inf }
 0x51c   : > { %v3057_v21 = vpop.f32.mrf.mxu1 }
 0x51d   : > { %v3058_v24 = vadd.f32 %v5359_v15, %v3057_v21 }
 0x51f   : > { %v3067_v50 = vmax.f32 %v3058_v24, 0.0 }
 0x521   : > { %3075 = vst.msk [vmem:[#allocation7 + $0x38] sm:$0xff] %vm2398_vm12, %v3067_v50  ;;  %vm3156_vm12 = vcmask 386369  }
 0x522   : > { %v3149_v58 = vpop.permute.xlu2 %3148 }
 0x523   : > { %3152 = vst.msk [vmem:[#allocation8] sm:$0x1] %vm3151_vm13, %v3149_v58 }
 0x528   : > { %v3090_v33 = vld [vmem:[#allocation7 + $0x38] ss:$2 sm:$0xf]  ;;  %v3106_v31 = vld [vmem:[#allocation7 + $0x39] ss:$2 sm:$0xf] }
 0x529   : > { %v3114_v4 = vmax.f32 %v3090_v33, %v3106_v31 }
 0x52a   : > { %v3164_v27 = vpop.permute.xlu2 %3163 }
 0x52b   : > { %v3126_v54 = vsel %vm3115_vm7, %v3114_v4, -inf  ;;  %vm3208_vm7 = vcmask 1044419  }
 0x52c   : > { %v3127_v42 = vmax.f32 %v3125_v5, %v3126_v54 }
 0x52e   : > { %3190 = vrot.lane.b32.xlu1 %v3127_v42, %s3842_s22  ;;  %3200 = vrot.lane.b32.xlu0 %v3127_v42, %s3843_s13  ;;  %s377_s13 = sand.u32 1, %s3813_s18   ;;  %s3773_s22 = sshra.s32 %s3465_s29, 4  ;;  %s3774_s22 = int_to_ptr.hbm [resolvable:$true] %s3773_s22 }
 0x52f   : > { %3195 = vrot.lane.b32.xlu2 %v3127_v42, %s3844_s16  ;;  %s378_s0 = scalar_lea.vmem [#allocation9], %s377_s13  ;;  %s3452_s14 = scalar_lea.sflag [#allocation10], %s377_s13 }
 0x530   : > { %s3462_s12 = sshll.u32 %s378_s0, 4  ;;  %s3775_s1 = scalar_lea.hbm %s3774_s22, 1  ;;  %s3463_s12 = int_to_ptr.vmem [resolvable:$true] %s3462_s12 }
 0x531   : > { %p3776_p11 = scmp.ne.s32.totalorder %s3774_s22, %s3775_s1  ;;  %p3780_p0 = scmp.lt.s32.totalorder %s3774_s22, %s5585_s11 }
 0x533   : > { %p3777_p12 = pnand %p3776_p11, %p3944_p5 }
 0x535   : > { %p3778_p13 = pneg %p3777_p12 }
 0x536   : > { %3205 = vrot.lane.b32.xlu1 %v3127_v42, %s3845_s24  ;;  %s3779_s24 = scalar_lea.hbm %s5585_s11, 2 }
 0x537   : > { %p3781_p1 = scmp.lt.s32.totalorder %s3779_s24, %s3775_s1 }
 0x539   : > { %v3159_v15 = vpop.permute.xlu1 %3158  ;;  %v3154_v49 = vpop.permute.xlu0 %3153  ;;  %p3782_p2 = por %p3781_p1, %p3780_p0 }
 0x53a   : > { %3157 = vst.msk [vmem:[#allocation8 - $0x1] sm:$0x2] %vm3156_vm12, %v3154_v49 }
 0x53b   : > { %3162 = vst.msk [vmem:[#allocation8 - $0x2] sm:$0x4] %vm3161_vm14, %v3159_v15  ;;  %p3783_p3 = pnand %p3782_p2, %p3778_p13 }
 0x53c   : > { %3167 = vst.msk [vmem:[#allocation8 - $0x3] sm:$0x8] %vm3166_vm15, %v3164_v27 }
 0x55b   : > { %v3180_v25 = vpop.permute.xlu2 %3179 }
 0x572   : > { %v3175_v43 = vpop.permute.xlu1 %3174  ;;  %v3170_v56 = vpop.permute.xlu0 %3169 }
 0x573   : > { %3173 = vst.msk [vmem:[#allocation8] sm:$0x1] %vm3172_vm0, %v3170_v56 }
 0x574   : > { %3178 = vst.msk [vmem:[#allocation8 - $0x1] sm:$0x2] %vm3177_vm1, %v3175_v43 }
 0x575   : > { %3183 = vst.msk [vmem:[#allocation8 - $0x2] sm:$0x4] %vm3182_vm2, %v3180_v25 }
 0x57a   : > { %v3185_v40 = vpop.permute.xlu0 %3184 }
 0x57b   : > { %3188 = vst.msk [vmem:[#allocation8 - $0x3] sm:$0x8] %vm3187_vm3, %v3185_v40 }
 0x589   : > { %v3196_v22 = vpop.permute.xlu2 %3195 }
 0x5a0   : > { %v3191_v11 = vpop.permute.xlu1 %3190  ;;  %v3201_v63 = vpop.permute.xlu0 %3200 }
 0x5a1   : > { %3194 = vst.msk [vmem:[#allocation8] sm:$0x1] %vm3193_vm4, %v3191_v11 }
 0x5a2   : > { %3199 = vst.msk [vmem:[#allocation8 - $0x1] sm:$0x2] %vm3198_vm5, %v3196_v22 }
 0x5a3   : > { %3204 = vst.msk [vmem:[#allocation8 - $0x2] sm:$0x4] %vm3203_vm6, %v3201_v63 }
 0x5a8   : > { %v3206_v6 = vpop.permute.xlu1 %3205 }
 0x5a9   : > { %3209 = vst.msk [vmem:[#allocation8 - $0x3] sm:$0x8] %vm3208_vm7, %v3206_v6 }
 0x5b0   : > { %v3210_v7 = vld [vmem:[#allocation8] sm:$0x1] }
 0x5b1   : > { %v3211_v13 = vpack.c.bf16 %v3210_v7, %v3210_v7 }
 0x5b3   : > { %3285 = vmatmul.bf16.vlgmr.msrb.gmra.mxu2 %v3211_v13 }
 0x636   : > { %v3286_v35 = vpop.f32.mrf.mxu2 }
 0x637   : > { %v3287_v26 = vadd.f32 %v3286_v35, %v3228_v52 }
 0x639   : > { %v3290_v19 = vmax.f32 %v3287_v26, 0.0 }
 0x63b   : > { %v3291_v3 = vpack.c.bf16 %v3290_v19, %v3290_v19 }
 0x63d   : > { %3365 = vmatmul.bf16.vlgmr.msrb.gmra.mxu3 %v3291_v3 }
 0x63e   : > { %v3288_v51 = vpop.f32.mrf.mxu2 }
 0x6c0   : > { %v3366_v48 = vpop.f32.mrf.mxu3 }
 0x6c1   : > { %v3367_v32 = vadd.f32 %v3366_v48, %v3308_v9 }
 0x6c3   : > { %v3370_v39 = vmax.f32 %v3367_v32, 0.0 }
 0x6c5   : > { %v3371_v44 = vpack.c.bf16 %v3370_v39, %v3370_v39 }
 0x6c7   : > { %3445 = vmatmul.bf16.vlgmr.msra.gmra.mxu2 %v3371_v44 }
 0x6c8   : > { %v3368_v30 = vpop.f32.mrf.mxu3 }
 0x74a   : > { %v3446_v23 = vpop.f32.mrf.mxu2 }
 0x74b   : > { %v3447_v21 = vadd.f32 %v3446_v23, %v3388_v53 }
 0x74d   : > { %3450 = vst [vmem:[%s378_s0] sm:$0x1] %v3447_v21 }
 0x74e   : > { %3786 = shalt.err (!%p3783_p3)
}
 0x74f   : > { %3693 = dma.vmem_to_hbm [thread:$0]  (%p3944_p5), %s3463_s12, 16, %s3465_s29, %s3452_s14  }
 0x752   : > { %v3448_v24 = vpop.f32.mrf.mxu2 }
 0x753 PF: > { %p3699_p4 = scmp.ge.s32.totalorder %s3821_s20, 2  ;;  %s3476_s13 = sand.u32 1, %s3809_s17  }
 0x754   : > { %s3477_s15 = scalar_lea.sflag [#allocation10], %s3476_s13 }
 0x755   : > { %p3696_p7 = pnand %p3699_p4, %p3948_p6 }
 0x757   : > { %p3697_p8 = pneg %p3696_p7 }
 0x759   : > { %3804 = dma.done.wait (%p3697_p8), %s3477_s15, 16  }
 0x75a   : > { %3806 = vsyncadd (%p3697_p8), %s3477_s15, 4294967280  ;;  %p21_p9 = scmp.ge.s32.totalorder %s3931_s23, 4   ;;  %s5622_s17 = smov %s3813_s18 }
 0x75b   : > { %s5623_s18 = smov %s3817_s19  ;;  %s5624_s19 = smov %s3942_s26 }
 0x75c   : > { %s5625_s20 = smov %s3931_s23  ;;  %23 = sbr.rel (!%p21_p9) target bundleno = 6 (0x6), region = 149 }
 0x761   :  { %3482 = vsyncpa [#allocation10], 1 }
 0x762   :  { %3484 = vsyncpa [#allocation10 + $0x1], 1 }

</bundles_post_ra>
